<compile_context>
chip_gen: v5e
topology: v5e:2x2
jax: 0.10.0
libtpu: 0.0.40
codegen_flags: <defaults>
</compile_context>

<pallas_src>
import math
import functools

import jax
import jax.numpy as jnp
from jax import lax
from jax.experimental import pallas as pl
from jax.experimental.pallas import tpu as pltpu

EPS = 1e-6


# ---------------------------------------------------------------- helpers ---
def _ln_stats(x):
    # Matches the module's LayerNorm exactly: torch.std is *unbiased*
    # (divides by D-1) and eps is added to std (not var).
    d = x.shape[-1]
    mean = jnp.mean(x, axis=-1, keepdims=True)
    var = jnp.sum((x - mean) ** 2, axis=-1, keepdims=True) * (1.0 / (d - 1))
    return mean, jnp.sqrt(var)


def _layernorm(x, a, b):
    # Exact divide (review: keep approx reciprocal only in softmax).
    mean, std = _ln_stats(x)
    return a * (x - mean) / (std + EPS) + b


# ----------------------------------------------------------- fused kernel ---
def fused_transformer_kernel(x_ref, pos_ref,
                             ln1a_ref, ln1b_ref, ln2a_ref, ln2b_ref,
                             wqkv_ref, bqkv_ref, wo_ref, bo_ref,
                             w1_ref, b1_ref, w2cat_ref, b2_ref,
                             *rest, n_heads, stride_num):
    """Whole forward (all layers) for one batch element, fully VMEM-resident.

    `rest` = (per-layer tap-selection matrices..., o_ref).  The selection
    matrices are laid out per layer as [sel_m1, sel_p1] (+ [sel_0] iff s>1),
    a recipe that is fully determined by the static `stride_num` schedule.
    """
    o_ref = rest[-1]
    sel_refs = rest[:-1]

    x = x_ref[0]                                     # (L0, D) f32
    D = x.shape[-1]
    dk = D // n_heads
    L = x.shape[0]
    n_pos = pos_ref.shape[0]                         # module has exactly 3

    sel_i = 0
    for i, s in enumerate(stride_num):               # static python unroll
        # ---- positional embedding (module only has embeddings for i<3) ----
        if i < n_pos:
            x = x + pos_ref[i][:L, :]

        # ---- self-attention sublayer: x + MHA(LN(x)) ----
        xn = _layernorm(x, ln1a_ref[i], ln1b_ref[i])
        # Fused QKV projection; 1/sqrt(dk) is folded into the Q slab of
        # wqkv/bqkv at pack time (constant weight transform).
        qkv = jnp.dot(xn, wqkv_ref[i],
                      preferred_element_type=jnp.float32) + bqkv_ref[i]
        q = qkv[:, :D]
        k = qkv[:, D:2 * D]
        v = qkv[:, 2 * D:]

        ctx_parts = []
        for h in range(n_heads):                     # static head unroll
            sl = slice(h * dk, (h + 1) * dk)
            qh, kh, vh = q[:, sl], k[:, sl], v[:, sl]
            # scores = qh @ kh.T without an explicit transpose
            sc = lax.dot_general(qh, kh, (((1,), (1,)), ((), ())),
                                 preferred_element_type=jnp.float32)
            sc = sc - jnp.max(sc, axis=-1, keepdims=True)
            e = jnp.exp(sc)
            p = e * pl.reciprocal(jnp.sum(e, axis=-1, keepdims=True),
                                  approx=True)
            ctx_parts.append(jnp.dot(p, vh,
                                     preferred_element_type=jnp.float32))
        ctx = jnp.concatenate(ctx_parts, axis=-1)    # (L, D), lane-packed heads
        # Single output projection per layer (no per-head wo matmuls).
        x = x + jnp.dot(ctx, wo_ref[i],
                        preferred_element_type=jnp.float32) + bo_ref[i]

        # ---- conv FFN sublayer: Conv1d(k=1) -> ReLU -> Conv1d(k=3,p=1,stride=s)
        Lout = (L - 1) // s + 1
        xn2 = _layernorm(x, ln2a_ref[i], ln2b_ref[i])
        y1 = jnp.dot(xn2, w1_ref[i],
                     preferred_element_type=jnp.float32) + b1_ref[i]
        y1 = jnp.maximum(y1, 0.0)                    # (L, F)

        # Fused k=3 taps: one (L,F)@(F,3D) matmul, then cheap tap selection.
        z = jnp.dot(y1, w2cat_ref[i],
                    preferred_element_type=jnp.float32)       # (L, 3D)
        z_m1, z_0, z_p1 = z[:, :D], z[:, D:2 * D], z[:, 2 * D:]

        sel_m1 = sel_refs[sel_i][...]                # (Lout, L): tap t*s-1
        sel_p1 = sel_refs[sel_i + 1][...]            # (Lout, L): tap t*s+1
        if s == 1:
            sel_i += 2
            # sel_0 == identity and the MaxPool residual is the identity.
            x = (x + b2_ref[i] + z_0
                 + jnp.dot(sel_m1, z_m1, preferred_element_type=jnp.float32)
                 + jnp.dot(sel_p1, z_p1, preferred_element_type=jnp.float32))
        else:
            sel_0 = sel_refs[sel_i + 2][...]         # (Lout, L): tap t*s
            sel_i += 3
            # MaxPool1d(kernel=1, stride=s) residual == sel_0 @ x, folded
            # into the center-tap matmul -> zero extra MXU pushes.
            x = (b2_ref[i]
                 + jnp.dot(sel_0, x + z_0, preferred_element_type=jnp.float32)
                 + jnp.dot(sel_m1, z_m1, preferred_element_type=jnp.float32)
                 + jnp.dot(sel_p1, z_p1, preferred_element_type=jnp.float32))
        L = Lout

    # NOTE: Encoder defines self.norm but never applies it in forward(),
    # so there is no final LayerNorm.
    o_ref[0] = x


# --------------------------------------------------------------- wrappers ---
def _full_spec(shape):
    nd = len(shape)
    return pl.BlockSpec(shape, lambda *_: (0,) * nd)


def _pack_params(params, n_heads):
    """Stack per-layer params; fuse QKV (+fold 1/sqrt(dk)) and the conv taps."""
    layers = params['layers']
    d_model = layers[0]['wq'].shape[0]
    scale = 1.0 / math.sqrt(d_model // n_heads)
    stk = lambda name: jnp.stack([p[name] for p in layers], axis=0)
    wqkv = jnp.stack(
        [jnp.concatenate([p['wq'] * scale, p['wk'], p['wv']], axis=1)
         for p in layers], axis=0)                            # (NL, D, 3D)
    bqkv = jnp.stack(
        [jnp.concatenate([p['bq'] * scale, p['bk'], p['bv']], axis=1)
         for p in layers], axis=0)                            # (NL, 1, 3D)
    w2cat = jnp.stack(
        [jnp.concatenate([p['w2'][0], p['w2'][1], p['w2'][2]], axis=1)
         for p in layers], axis=0)                            # (NL, F, 3D)
    return dict(
        pos=jnp.concatenate(params['pos'], axis=0),           # (3, length, D)
        ln1a=stk('ln1_a'), ln1b=stk('ln1_b'),
        ln2a=stk('ln2_a'), ln2b=stk('ln2_b'),
        wqkv=wqkv, bqkv=bqkv,
        wo=stk('wo'), bo=stk('bo'),
        w1=stk('w1'), b1=stk('b1'),
        w2cat=w2cat, b2=stk('b2'),
    )


def _build_sel_mats(L0, stride_num):
    """Pack-time tap-selection matrices for the k=3, pad=1, stride=s conv.

    Per layer (static schedule): sel_m1 (tap t*s-1), sel_p1 (tap t*s+1),
    and for s>1 also sel_0 (tap t*s, doubles as the MaxPool residual).
    Out-of-range taps give all-zero rows == the conv zero padding.
    """
    sels = []
    L = L0
    for s in stride_num:
        Lout = (L - 1) // s + 1
        centers = jnp.arange(Lout, dtype=jnp.int32)[:, None] * s
        cols = jnp.arange(L, dtype=jnp.int32)[None, :]
        sels.append((cols == centers - 1).astype(jnp.float32))   # off = -1
        sels.append((cols == centers + 1).astype(jnp.float32))   # off = +1
        if s != 1:
            sels.append((cols == centers).astype(jnp.float32))   # off =  0
        L = Lout
    return sels


def transformer_forward(x, params, stride_num, n_heads):
    B, L0, D = x.shape
    n_layers = len(params['layers'])
    assert len(stride_num) == n_layers

    Lf = L0
    for s in stride_num:
        Lf = (Lf - 1) // s + 1

    packed = _pack_params(params, n_heads)
    order = ['pos', 'ln1a', 'ln1b', 'ln2a', 'ln2b',
             'wqkv', 'bqkv', 'wo', 'bo',
             'w1', 'b1', 'w2cat', 'b2']
    plist = [packed[k] for k in order]
    sel_list = _build_sel_mats(L0, stride_num)

    kern = functools.partial(fused_transformer_kernel,
                             n_heads=n_heads, stride_num=tuple(stride_num))
    in_specs = [pl.BlockSpec((1, L0, D), lambda b: (b, 0, 0))] + \
               [_full_spec(p.shape) for p in plist + sel_list]

    # TODO(synk): on single-TC chips (v5e/v6e) grid=(B,) is a serial loop with
    # ~0.35 us/step overhead; folding the batch loop into one invocation would
    # remove it, at the cost of idling one TC on v7x when B>=2.
    return pl.pallas_call(
        kern,
        out_shape=jax.ShapeDtypeStruct((B, Lf, D), jnp.float32),
        grid=(B,),
        in_specs=in_specs,
        out_specs=pl.BlockSpec((1, Lf, D), lambda b: (b, 0, 0)),
        compiler_params=pltpu.CompilerParams(
            dimension_semantics=("parallel",)),   # v7x: one batch elem per TC
    )(x, *plist, *sel_list)


# --------------------------------------------------------- params & reference
def init_params(key, n_layers, d_model, d_ff, length):
    n_keys = 12 * n_layers + 3            # 12 random tensors per layer + 3 pos
    keys = iter(jax.random.split(key, n_keys))

    def nrm(shape, scale=0.1):
        return scale * jax.random.normal(next(keys), shape, jnp.float32)

    layers = []
    for _ in range(n_layers):
        layers.append(dict(
            ln1_a=jnp.ones((1, d_model), jnp.float32),
            ln1_b=jnp.zeros((1, d_model), jnp.float32),
            ln2_a=jnp.ones((1, d_model), jnp.float32),
            ln2_b=jnp.zeros((1, d_model), jnp.float32),
            wq=nrm((d_model, d_model)), bq=nrm((1, d_model), 0.02),
            wk=nrm((d_model, d_model)), bk=nrm((1, d_model), 0.02),
            wv=nrm((d_model, d_model)), bv=nrm((1, d_model), 0.02),
            wo=nrm((d_model, d_model)), bo=nrm((1, d_model), 0.02),
            w1=nrm((d_model, d_ff)), b1=nrm((1, d_ff), 0.02),        # conv k=1
            w2=nrm((3, d_ff, d_model)), b2=nrm((1, d_model), 0.02),  # conv k=3
        ))
    # The PyTorch module always has exactly 3 positional embeddings.
    pos = [jax.random.normal(next(keys), (1, length, d_model), jnp.float32)
           for _ in range(3)]
    return dict(layers=layers, pos=pos)


def _layernorm_ref(x, a, b):
    mean, std = _ln_stats(x)
    return a * (x - mean) / (std + EPS) + b


def ref_forward(x, params, stride_num, n_heads):
    """Pure-JAX reference mirroring the PyTorch forward (eval mode, mask=None)."""
    for i, p in enumerate(params['layers']):
        B, L, D = x.shape
        dk = D // n_heads
        if i < len(params['pos']):
            x = x + params['pos'][i][:, :L]
        xn = _layernorm_ref(x, p['ln1_a'], p['ln1_b'])
        q = (xn @ p['wq'] + p['bq']).reshape(B, L, n_heads, dk).transpose(0, 2, 1, 3)
        k = (xn @ p['wk'] + p['bk']).reshape(B, L, n_heads, dk).transpose(0, 2, 1, 3)
        v = (xn @ p['wv'] + p['bv']).reshape(B, L, n_heads, dk).transpose(0, 2, 1, 3)
        sc = jnp.einsum('bhqd,bhkd->bhqk', q, k) / math.sqrt(dk)
        pa = jax.nn.softmax(sc, axis=-1)
        ctx = jnp.einsum('bhqk,bhkd->bhqd', pa, v).transpose(0, 2, 1, 3).reshape(B, L, D)
        x = x + (ctx @ p['wo'] + p['bo'])

        xn2 = _layernorm_ref(x, p['ln2_a'], p['ln2_b'])
        y1 = jnp.maximum(xn2 @ p['w1'] + p['b1'], 0.0)
        y1p = jnp.pad(y1, ((0, 0), (1, 1), (0, 0)))
        s = stride_num[i]
        lout = (L - 1) // s + 1
        rows = []
        for t in range(lout):
            acc = p['b2']
            for kk in range(3):
                acc = acc + y1p[:, t * s + kk] @ p['w2'][kk]
            rows.append(acc)
        ff = jnp.stack(rows, axis=1)
        x = (x + ff) if s == 1 else (x[:, ::s] + ff)
    return x    # Encoder.forward never applies self.norm


# -------------------------------------------------------------------- main ---
if __name__ == "__main__":
    B, SEQ, D_MODEL, D_FF, HEADS = 2, 8, 32, 64, 4
    N_LAYERS = 3
    STRIDE_NUM = (1, 2, 2)

    key = jax.random.PRNGKey(0)
    kx, kp = jax.random.split(key)
    x = jax.random.normal(kx, (B, SEQ, D_MODEL), jnp.float32)
    params = init_params(kp, N_LAYERS, D_MODEL, D_FF, SEQ)

    out = jax.block_until_ready(transformer_forward(x, params, STRIDE_NUM, HEADS))
    ref = ref_forward(x, params, STRIDE_NUM, HEADS)

    assert out.shape == ref.shape, (out.shape, ref.shape)
    max_err = float(jnp.max(jnp.abs(out - ref)))
    # Headroom for the approx reciprocal in softmax normalization.
    assert jnp.allclose(out, ref, rtol=2e-3, atol=2e-3), max_err
    print("KERNEL_OK")
</pallas_src>

<mosaic_0001>
module attributes {stable_mosaic.version = 11 : i64} {
  func.func @fused_transformer_kernel(%arg0: i32, %arg1: memref<1x8x32xf32, #tpu.memory_space<vmem>>, %arg2: memref<3x8x32xf32, #tpu.memory_space<vmem>>, %arg3: memref<3x1x32xf32, #tpu.memory_space<vmem>>, %arg4: memref<3x1x32xf32, #tpu.memory_space<vmem>>, %arg5: memref<3x1x32xf32, #tpu.memory_space<vmem>>, %arg6: memref<3x1x32xf32, #tpu.memory_space<vmem>>, %arg7: memref<3x32x96xf32, #tpu.memory_space<vmem>>, %arg8: memref<3x1x96xf32, #tpu.memory_space<vmem>>, %arg9: memref<3x32x32xf32, #tpu.memory_space<vmem>>, %arg10: memref<3x1x32xf32, #tpu.memory_space<vmem>>, %arg11: memref<3x32x64xf32, #tpu.memory_space<vmem>>, %arg12: memref<3x1x64xf32, #tpu.memory_space<vmem>>, %arg13: memref<3x64x96xf32, #tpu.memory_space<vmem>>, %arg14: memref<3x1x32xf32, #tpu.memory_space<vmem>>, %arg15: memref<8x8xf32, #tpu.memory_space<vmem>>, %arg16: memref<8x8xf32, #tpu.memory_space<vmem>>, %arg17: memref<4x8xf32, #tpu.memory_space<vmem>>, %arg18: memref<4x8xf32, #tpu.memory_space<vmem>>, %arg19: memref<4x8xf32, #tpu.memory_space<vmem>>, %arg20: memref<2x4xf32, #tpu.memory_space<vmem>>, %arg21: memref<2x4xf32, #tpu.memory_space<vmem>>, %arg22: memref<2x4xf32, #tpu.memory_space<vmem>>, %arg23: memref<1x2x32xf32, #tpu.memory_space<vmem>>) attributes {dimension_semantics = [#tpu.dimension_semantics<parallel>], iteration_bounds = array<i64: 2>, scalar_prefetch = 0 : i64, scratch_operands = 0 : i64, tpu.core_type = #tpu.core_type<tc>, window_params = [{transform_indices = @transform_0, window_bounds = array<i64: 1, 8, 32>}, {pipeline_mode = #tpu.pipeline_mode<synchronous>, transform_indices = @transform_1, window_bounds = array<i64: 3, 8, 32>}, {pipeline_mode = #tpu.pipeline_mode<synchronous>, transform_indices = @transform_2, window_bounds = array<i64: 3, 1, 32>}, {pipeline_mode = #tpu.pipeline_mode<synchronous>, transform_indices = @transform_3, window_bounds = array<i64: 3, 1, 32>}, {pipeline_mode = #tpu.pipeline_mode<synchronous>, transform_indices = @transform_4, window_bounds = array<i64: 3, 1, 32>}, {pipeline_mode = #tpu.pipeline_mode<synchronous>, transform_indices = @transform_5, window_bounds = array<i64: 3, 1, 32>}, {pipeline_mode = #tpu.pipeline_mode<synchronous>, transform_indices = @transform_6, window_bounds = array<i64: 3, 32, 96>}, {pipeline_mode = #tpu.pipeline_mode<synchronous>, transform_indices = @transform_7, window_bounds = array<i64: 3, 1, 96>}, {pipeline_mode = #tpu.pipeline_mode<synchronous>, transform_indices = @transform_8, window_bounds = array<i64: 3, 32, 32>}, {pipeline_mode = #tpu.pipeline_mode<synchronous>, transform_indices = @transform_9, window_bounds = array<i64: 3, 1, 32>}, {pipeline_mode = #tpu.pipeline_mode<synchronous>, transform_indices = @transform_10, window_bounds = array<i64: 3, 32, 64>}, {pipeline_mode = #tpu.pipeline_mode<synchronous>, transform_indices = @transform_11, window_bounds = array<i64: 3, 1, 64>}, {pipeline_mode = #tpu.pipeline_mode<synchronous>, transform_indices = @transform_12, window_bounds = array<i64: 3, 64, 96>}, {pipeline_mode = #tpu.pipeline_mode<synchronous>, transform_indices = @transform_13, window_bounds = array<i64: 3, 1, 32>}, {pipeline_mode = #tpu.pipeline_mode<synchronous>, transform_indices = @transform_14, window_bounds = array<i64: 8, 8>}, {pipeline_mode = #tpu.pipeline_mode<synchronous>, transform_indices = @transform_15, window_bounds = array<i64: 8, 8>}, {pipeline_mode = #tpu.pipeline_mode<synchronous>, transform_indices = @transform_16, window_bounds = array<i64: 4, 8>}, {pipeline_mode = #tpu.pipeline_mode<synchronous>, transform_indices = @transform_17, window_bounds = array<i64: 4, 8>}, {pipeline_mode = #tpu.pipeline_mode<synchronous>, transform_indices = @transform_18, window_bounds = array<i64: 4, 8>}, {pipeline_mode = #tpu.pipeline_mode<synchronous>, transform_indices = @transform_19, window_bounds = array<i64: 2, 4>}, {pipeline_mode = #tpu.pipeline_mode<synchronous>, transform_indices = @transform_20, window_bounds = array<i64: 2, 4>}, {pipeline_mode = #tpu.pipeline_mode<synchronous>, transform_indices = @transform_21, window_bounds = array<i64: 2, 4>}, {transform_indices = @transform_22, window_bounds = array<i64: 1, 2, 32>}]} {
    %c0 = arith.constant 0 : index
    %c0_0 = arith.constant 0 : index
    %c0_1 = arith.constant 0 : index
    %0 = vector.load %arg1[%c0, %c0_0, %c0_1] : memref<1x8x32xf32, #tpu.memory_space<vmem>>, vector<1x8x32xf32>
    %1 = vector.shape_cast %0 : vector<1x8x32xf32> to vector<8x32xf32>
    %c0_2 = arith.constant 0 : index
    %c0_3 = arith.constant 0 : index
    %c0_4 = arith.constant 0 : index
    %2 = vector.load %arg2[%c0_2, %c0_3, %c0_4] : memref<3x8x32xf32, #tpu.memory_space<vmem>>, vector<1x8x32xf32>
    %3 = vector.shape_cast %2 : vector<1x8x32xf32> to vector<8x32xf32>
    %4 = arith.addf %1, %3 : vector<8x32xf32>
    %c0_5 = arith.constant 0 : index
    %c0_6 = arith.constant 0 : index
    %c0_7 = arith.constant 0 : index
    %5 = vector.load %arg3[%c0_5, %c0_6, %c0_7] : memref<3x1x32xf32, #tpu.memory_space<vmem>>, vector<1x1x32xf32>
    %6 = vector.shape_cast %5 : vector<1x1x32xf32> to vector<1x32xf32>
    %c0_8 = arith.constant 0 : index
    %c0_9 = arith.constant 0 : index
    %c0_10 = arith.constant 0 : index
    %7 = vector.load %arg4[%c0_8, %c0_9, %c0_10] : memref<3x1x32xf32, #tpu.memory_space<vmem>>, vector<1x1x32xf32>
    %8 = vector.shape_cast %7 : vector<1x1x32xf32> to vector<1x32xf32>
    %cst = arith.constant dense<0.000000e+00> : vector<8xf32>
    %9 = vector.multi_reduction <add>, %4, %cst [1] : vector<8x32xf32> to vector<8xf32>
    %10 = vector.shape_cast %9 : vector<8xf32> to vector<8x1xf32>
    %cst_11 = arith.constant 3.200000e+01 : f32
    %11 = vector.broadcast %cst_11 : f32 to vector<8x1xf32>
    %12 = arith.divf %10, %11 : vector<8x1xf32>
    %13 = vector.broadcast %12 : vector<8x1xf32> to vector<8x32xf32>
    %14 = arith.subf %4, %13 : vector<8x32xf32>
    %15 = arith.mulf %14, %14 : vector<8x32xf32>
    %cst_12 = arith.constant dense<0.000000e+00> : vector<8xf32>
    %16 = vector.multi_reduction <add>, %15, %cst_12 [1] : vector<8x32xf32> to vector<8xf32>
    %17 = vector.shape_cast %16 : vector<8xf32> to vector<8x1xf32>
    %cst_13 = arith.constant 0.0322580636 : f32
    %18 = vector.broadcast %cst_13 : f32 to vector<8x1xf32>
    %19 = arith.mulf %17, %18 : vector<8x1xf32>
    %20 = math.sqrt %19 : vector<8x1xf32>
    %21 = vector.broadcast %12 : vector<8x1xf32> to vector<8x32xf32>
    %22 = arith.subf %4, %21 : vector<8x32xf32>
    %23 = vector.broadcast %6 : vector<1x32xf32> to vector<8x32xf32>
    %24 = arith.mulf %23, %22 : vector<8x32xf32>
    %cst_14 = arith.constant 9.99999997E-7 : f32
    %25 = vector.broadcast %cst_14 : f32 to vector<8x1xf32>
    %26 = arith.addf %20, %25 : vector<8x1xf32>
    %27 = vector.broadcast %26 : vector<8x1xf32> to vector<8x32xf32>
    %28 = arith.divf %24, %27 : vector<8x32xf32>
    %29 = vector.broadcast %8 : vector<1x32xf32> to vector<8x32xf32>
    %30 = arith.addf %28, %29 : vector<8x32xf32>
    %c0_15 = arith.constant 0 : index
    %c0_16 = arith.constant 0 : index
    %c0_17 = arith.constant 0 : index
    %31 = vector.load %arg7[%c0_15, %c0_16, %c0_17] : memref<3x32x96xf32, #tpu.memory_space<vmem>>, vector<1x32x96xf32>
    %32 = vector.shape_cast %31 : vector<1x32x96xf32> to vector<32x96xf32>
    %cst_18 = arith.constant dense<0.000000e+00> : vector<8x96xf32>
    %33 = tpu.matmul %30, %32, %cst_18 {dimension_numbers = #tpu.dot_dimension_numbers<[1], [0], [0], [1], [0, 0, 1, 1], [], []>} : vector<8x32xf32>, vector<32x96xf32>, vector<8x96xf32> -> vector<8x96xf32>
    %c0_19 = arith.constant 0 : index
    %c0_20 = arith.constant 0 : index
    %c0_21 = arith.constant 0 : index
    %34 = vector.load %arg8[%c0_19, %c0_20, %c0_21] : memref<3x1x96xf32, #tpu.memory_space<vmem>>, vector<1x1x96xf32>
    %35 = vector.shape_cast %34 : vector<1x1x96xf32> to vector<1x96xf32>
    %36 = vector.broadcast %35 : vector<1x96xf32> to vector<8x96xf32>
    %37 = arith.addf %33, %36 : vector<8x96xf32>
    %38 = vector.extract_strided_slice %37 {offsets = [0, 0], sizes = [8, 32], strides = [1, 1]} : vector<8x96xf32> to vector<8x32xf32>
    %39 = vector.extract_strided_slice %37 {offsets = [0, 32], sizes = [8, 32], strides = [1, 1]} : vector<8x96xf32> to vector<8x32xf32>
    %40 = vector.extract_strided_slice %37 {offsets = [0, 64], sizes = [8, 32], strides = [1, 1]} : vector<8x96xf32> to vector<8x32xf32>
    %41 = vector.extract_strided_slice %38 {offsets = [0, 0], sizes = [8, 8], strides = [1, 1]} : vector<8x32xf32> to vector<8x8xf32>
    %42 = vector.extract_strided_slice %39 {offsets = [0, 0], sizes = [8, 8], strides = [1, 1]} : vector<8x32xf32> to vector<8x8xf32>
    %43 = vector.extract_strided_slice %40 {offsets = [0, 0], sizes = [8, 8], strides = [1, 1]} : vector<8x32xf32> to vector<8x8xf32>
    %cst_22 = arith.constant dense<0.000000e+00> : vector<8x8xf32>
    %44 = tpu.matmul %41, %42, %cst_22 {dimension_numbers = #tpu.dot_dimension_numbers<[1], [1], [0], [0], [0, 0, 1, 0], [], []>} : vector<8x8xf32>, vector<8x8xf32>, vector<8x8xf32> -> vector<8x8xf32>
    %cst_23 = arith.constant dense<0xFF800000> : vector<8xf32>
    %45 = vector.multi_reduction <maximumf>, %44, %cst_23 [1] : vector<8x8xf32> to vector<8xf32>
    %46 = vector.shape_cast %45 : vector<8xf32> to vector<8x1xf32>
    %47 = vector.broadcast %46 : vector<8x1xf32> to vector<8x8xf32>
    %48 = arith.subf %44, %47 : vector<8x8xf32>
    %49 = math.exp %48 : vector<8x8xf32>
    %cst_24 = arith.constant dense<0.000000e+00> : vector<8xf32>
    %50 = vector.multi_reduction <add>, %49, %cst_24 [1] : vector<8x8xf32> to vector<8xf32>
    %51 = vector.shape_cast %50 : vector<8xf32> to vector<8x1xf32>
    %52 = tpu.reciprocal %51 {approx = true} : vector<8x1xf32> -> vector<8x1xf32>
    %53 = vector.broadcast %52 : vector<8x1xf32> to vector<8x8xf32>
    %54 = arith.mulf %49, %53 : vector<8x8xf32>
    %cst_25 = arith.constant dense<0.000000e+00> : vector<8x8xf32>
    %55 = tpu.matmul %54, %43, %cst_25 {dimension_numbers = #tpu.dot_dimension_numbers<[1], [0], [0], [1], [0, 0, 1, 1], [], []>} : vector<8x8xf32>, vector<8x8xf32>, vector<8x8xf32> -> vector<8x8xf32>
    %56 = vector.extract_strided_slice %38 {offsets = [0, 8], sizes = [8, 8], strides = [1, 1]} : vector<8x32xf32> to vector<8x8xf32>
    %57 = vector.extract_strided_slice %39 {offsets = [0, 8], sizes = [8, 8], strides = [1, 1]} : vector<8x32xf32> to vector<8x8xf32>
    %58 = vector.extract_strided_slice %40 {offsets = [0, 8], sizes = [8, 8], strides = [1, 1]} : vector<8x32xf32> to vector<8x8xf32>
    %cst_26 = arith.constant dense<0.000000e+00> : vector<8x8xf32>
    %59 = tpu.matmul %56, %57, %cst_26 {dimension_numbers = #tpu.dot_dimension_numbers<[1], [1], [0], [0], [0, 0, 1, 0], [], []>} : vector<8x8xf32>, vector<8x8xf32>, vector<8x8xf32> -> vector<8x8xf32>
    %cst_27 = arith.constant dense<0xFF800000> : vector<8xf32>
    %60 = vector.multi_reduction <maximumf>, %59, %cst_27 [1] : vector<8x8xf32> to vector<8xf32>
    %61 = vector.shape_cast %60 : vector<8xf32> to vector<8x1xf32>
    %62 = vector.broadcast %61 : vector<8x1xf32> to vector<8x8xf32>
    %63 = arith.subf %59, %62 : vector<8x8xf32>
    %64 = math.exp %63 : vector<8x8xf32>
    %cst_28 = arith.constant dense<0.000000e+00> : vector<8xf32>
    %65 = vector.multi_reduction <add>, %64, %cst_28 [1] : vector<8x8xf32> to vector<8xf32>
    %66 = vector.shape_cast %65 : vector<8xf32> to vector<8x1xf32>
    %67 = tpu.reciprocal %66 {approx = true} : vector<8x1xf32> -> vector<8x1xf32>
    %68 = vector.broadcast %67 : vector<8x1xf32> to vector<8x8xf32>
    %69 = arith.mulf %64, %68 : vector<8x8xf32>
    %cst_29 = arith.constant dense<0.000000e+00> : vector<8x8xf32>
    %70 = tpu.matmul %69, %58, %cst_29 {dimension_numbers = #tpu.dot_dimension_numbers<[1], [0], [0], [1], [0, 0, 1, 1], [], []>} : vector<8x8xf32>, vector<8x8xf32>, vector<8x8xf32> -> vector<8x8xf32>
    %71 = vector.extract_strided_slice %38 {offsets = [0, 16], sizes = [8, 8], strides = [1, 1]} : vector<8x32xf32> to vector<8x8xf32>
    %72 = vector.extract_strided_slice %39 {offsets = [0, 16], sizes = [8, 8], strides = [1, 1]} : vector<8x32xf32> to vector<8x8xf32>
    %73 = vector.extract_strided_slice %40 {offsets = [0, 16], sizes = [8, 8], strides = [1, 1]} : vector<8x32xf32> to vector<8x8xf32>
    %cst_30 = arith.constant dense<0.000000e+00> : vector<8x8xf32>
    %74 = tpu.matmul %71, %72, %cst_30 {dimension_numbers = #tpu.dot_dimension_numbers<[1], [1], [0], [0], [0, 0, 1, 0], [], []>} : vector<8x8xf32>, vector<8x8xf32>, vector<8x8xf32> -> vector<8x8xf32>
    %cst_31 = arith.constant dense<0xFF800000> : vector<8xf32>
    %75 = vector.multi_reduction <maximumf>, %74, %cst_31 [1] : vector<8x8xf32> to vector<8xf32>
    %76 = vector.shape_cast %75 : vector<8xf32> to vector<8x1xf32>
    %77 = vector.broadcast %76 : vector<8x1xf32> to vector<8x8xf32>
    %78 = arith.subf %74, %77 : vector<8x8xf32>
    %79 = math.exp %78 : vector<8x8xf32>
    %cst_32 = arith.constant dense<0.000000e+00> : vector<8xf32>
    %80 = vector.multi_reduction <add>, %79, %cst_32 [1] : vector<8x8xf32> to vector<8xf32>
    %81 = vector.shape_cast %80 : vector<8xf32> to vector<8x1xf32>
    %82 = tpu.reciprocal %81 {approx = true} : vector<8x1xf32> -> vector<8x1xf32>
    %83 = vector.broadcast %82 : vector<8x1xf32> to vector<8x8xf32>
    %84 = arith.mulf %79, %83 : vector<8x8xf32>
    %cst_33 = arith.constant dense<0.000000e+00> : vector<8x8xf32>
    %85 = tpu.matmul %84, %73, %cst_33 {dimension_numbers = #tpu.dot_dimension_numbers<[1], [0], [0], [1], [0, 0, 1, 1], [], []>} : vector<8x8xf32>, vector<8x8xf32>, vector<8x8xf32> -> vector<8x8xf32>
    %86 = vector.extract_strided_slice %38 {offsets = [0, 24], sizes = [8, 8], strides = [1, 1]} : vector<8x32xf32> to vector<8x8xf32>
    %87 = vector.extract_strided_slice %39 {offsets = [0, 24], sizes = [8, 8], strides = [1, 1]} : vector<8x32xf32> to vector<8x8xf32>
    %88 = vector.extract_strided_slice %40 {offsets = [0, 24], sizes = [8, 8], strides = [1, 1]} : vector<8x32xf32> to vector<8x8xf32>
    %cst_34 = arith.constant dense<0.000000e+00> : vector<8x8xf32>
    %89 = tpu.matmul %86, %87, %cst_34 {dimension_numbers = #tpu.dot_dimension_numbers<[1], [1], [0], [0], [0, 0, 1, 0], [], []>} : vector<8x8xf32>, vector<8x8xf32>, vector<8x8xf32> -> vector<8x8xf32>
    %cst_35 = arith.constant dense<0xFF800000> : vector<8xf32>
    %90 = vector.multi_reduction <maximumf>, %89, %cst_35 [1] : vector<8x8xf32> to vector<8xf32>
    %91 = vector.shape_cast %90 : vector<8xf32> to vector<8x1xf32>
    %92 = vector.broadcast %91 : vector<8x1xf32> to vector<8x8xf32>
    %93 = arith.subf %89, %92 : vector<8x8xf32>
    %94 = math.exp %93 : vector<8x8xf32>
    %cst_36 = arith.constant dense<0.000000e+00> : vector<8xf32>
    %95 = vector.multi_reduction <add>, %94, %cst_36 [1] : vector<8x8xf32> to vector<8xf32>
    %96 = vector.shape_cast %95 : vector<8xf32> to vector<8x1xf32>
    %97 = tpu.reciprocal %96 {approx = true} : vector<8x1xf32> -> vector<8x1xf32>
    %98 = vector.broadcast %97 : vector<8x1xf32> to vector<8x8xf32>
    %99 = arith.mulf %94, %98 : vector<8x8xf32>
    %cst_37 = arith.constant dense<0.000000e+00> : vector<8x8xf32>
    %100 = tpu.matmul %99, %88, %cst_37 {dimension_numbers = #tpu.dot_dimension_numbers<[1], [0], [0], [1], [0, 0, 1, 1], [], []>} : vector<8x8xf32>, vector<8x8xf32>, vector<8x8xf32> -> vector<8x8xf32>
    %101 = tpu.concatenate %55, %70, %85, %100 in 1 : vector<8x8xf32>, vector<8x8xf32>, vector<8x8xf32>, vector<8x8xf32> -> vector<8x32xf32>
    %c0_38 = arith.constant 0 : index
    %c0_39 = arith.constant 0 : index
    %c0_40 = arith.constant 0 : index
    %102 = vector.load %arg9[%c0_38, %c0_39, %c0_40] : memref<3x32x32xf32, #tpu.memory_space<vmem>>, vector<1x32x32xf32>
    %103 = vector.shape_cast %102 : vector<1x32x32xf32> to vector<32x32xf32>
    %cst_41 = arith.constant dense<0.000000e+00> : vector<8x32xf32>
    %104 = tpu.matmul %101, %103, %cst_41 {dimension_numbers = #tpu.dot_dimension_numbers<[1], [0], [0], [1], [0, 0, 1, 1], [], []>} : vector<8x32xf32>, vector<32x32xf32>, vector<8x32xf32> -> vector<8x32xf32>
    %105 = arith.addf %4, %104 : vector<8x32xf32>
    %c0_42 = arith.constant 0 : index
    %c0_43 = arith.constant 0 : index
    %c0_44 = arith.constant 0 : index
    %106 = vector.load %arg10[%c0_42, %c0_43, %c0_44] : memref<3x1x32xf32, #tpu.memory_space<vmem>>, vector<1x1x32xf32>
    %107 = vector.shape_cast %106 : vector<1x1x32xf32> to vector<1x32xf32>
    %108 = vector.broadcast %107 : vector<1x32xf32> to vector<8x32xf32>
    %109 = arith.addf %105, %108 : vector<8x32xf32>
    %c0_45 = arith.constant 0 : index
    %c0_46 = arith.constant 0 : index
    %c0_47 = arith.constant 0 : index
    %110 = vector.load %arg5[%c0_45, %c0_46, %c0_47] : memref<3x1x32xf32, #tpu.memory_space<vmem>>, vector<1x1x32xf32>
    %111 = vector.shape_cast %110 : vector<1x1x32xf32> to vector<1x32xf32>
    %c0_48 = arith.constant 0 : index
    %c0_49 = arith.constant 0 : index
    %c0_50 = arith.constant 0 : index
    %112 = vector.load %arg6[%c0_48, %c0_49, %c0_50] : memref<3x1x32xf32, #tpu.memory_space<vmem>>, vector<1x1x32xf32>
    %113 = vector.shape_cast %112 : vector<1x1x32xf32> to vector<1x32xf32>
    %cst_51 = arith.constant dense<0.000000e+00> : vector<8xf32>
    %114 = vector.multi_reduction <add>, %109, %cst_51 [1] : vector<8x32xf32> to vector<8xf32>
    %115 = vector.shape_cast %114 : vector<8xf32> to vector<8x1xf32>
    %cst_52 = arith.constant 3.200000e+01 : f32
    %116 = vector.broadcast %cst_52 : f32 to vector<8x1xf32>
    %117 = arith.divf %115, %116 : vector<8x1xf32>
    %118 = vector.broadcast %117 : vector<8x1xf32> to vector<8x32xf32>
    %119 = arith.subf %109, %118 : vector<8x32xf32>
    %120 = arith.mulf %119, %119 : vector<8x32xf32>
    %cst_53 = arith.constant dense<0.000000e+00> : vector<8xf32>
    %121 = vector.multi_reduction <add>, %120, %cst_53 [1] : vector<8x32xf32> to vector<8xf32>
    %122 = vector.shape_cast %121 : vector<8xf32> to vector<8x1xf32>
    %cst_54 = arith.constant 0.0322580636 : f32
    %123 = vector.broadcast %cst_54 : f32 to vector<8x1xf32>
    %124 = arith.mulf %122, %123 : vector<8x1xf32>
    %125 = math.sqrt %124 : vector<8x1xf32>
    %126 = vector.broadcast %117 : vector<8x1xf32> to vector<8x32xf32>
    %127 = arith.subf %109, %126 : vector<8x32xf32>
    %128 = vector.broadcast %111 : vector<1x32xf32> to vector<8x32xf32>
    %129 = arith.mulf %128, %127 : vector<8x32xf32>
    %cst_55 = arith.constant 9.99999997E-7 : f32
    %130 = vector.broadcast %cst_55 : f32 to vector<8x1xf32>
    %131 = arith.addf %125, %130 : vector<8x1xf32>
    %132 = vector.broadcast %131 : vector<8x1xf32> to vector<8x32xf32>
    %133 = arith.divf %129, %132 : vector<8x32xf32>
    %134 = vector.broadcast %113 : vector<1x32xf32> to vector<8x32xf32>
    %135 = arith.addf %133, %134 : vector<8x32xf32>
    %c0_56 = arith.constant 0 : index
    %c0_57 = arith.constant 0 : index
    %c0_58 = arith.constant 0 : index
    %136 = vector.load %arg11[%c0_56, %c0_57, %c0_58] : memref<3x32x64xf32, #tpu.memory_space<vmem>>, vector<1x32x64xf32>
    %137 = vector.shape_cast %136 : vector<1x32x64xf32> to vector<32x64xf32>
    %cst_59 = arith.constant dense<0.000000e+00> : vector<8x64xf32>
    %138 = tpu.matmul %135, %137, %cst_59 {dimension_numbers = #tpu.dot_dimension_numbers<[1], [0], [0], [1], [0, 0, 1, 1], [], []>} : vector<8x32xf32>, vector<32x64xf32>, vector<8x64xf32> -> vector<8x64xf32>
    %c0_60 = arith.constant 0 : index
    %c0_61 = arith.constant 0 : index
    %c0_62 = arith.constant 0 : index
    %139 = vector.load %arg12[%c0_60, %c0_61, %c0_62] : memref<3x1x64xf32, #tpu.memory_space<vmem>>, vector<1x1x64xf32>
    %140 = vector.shape_cast %139 : vector<1x1x64xf32> to vector<1x64xf32>
    %141 = vector.broadcast %140 : vector<1x64xf32> to vector<8x64xf32>
    %142 = arith.addf %138, %141 : vector<8x64xf32>
    %cst_63 = arith.constant 0.000000e+00 : f32
    %143 = vector.broadcast %cst_63 : f32 to vector<8x64xf32>
    %144 = arith.maximumf %142, %143 : vector<8x64xf32>
    %c0_64 = arith.constant 0 : index
    %c0_65 = arith.constant 0 : index
    %c0_66 = arith.constant 0 : index
    %145 = vector.load %arg13[%c0_64, %c0_65, %c0_66] : memref<3x64x96xf32, #tpu.memory_space<vmem>>, vector<1x64x96xf32>
    %146 = vector.shape_cast %145 : vector<1x64x96xf32> to vector<64x96xf32>
    %cst_67 = arith.constant dense<0.000000e+00> : vector<8x96xf32>
    %147 = tpu.matmul %144, %146, %cst_67 {dimension_numbers = #tpu.dot_dimension_numbers<[1], [0], [0], [1], [0, 0, 1, 1], [], []>} : vector<8x64xf32>, vector<64x96xf32>, vector<8x96xf32> -> vector<8x96xf32>
    %148 = vector.extract_strided_slice %147 {offsets = [0, 0], sizes = [8, 32], strides = [1, 1]} : vector<8x96xf32> to vector<8x32xf32>
    %149 = vector.extract_strided_slice %147 {offsets = [0, 32], sizes = [8, 32], strides = [1, 1]} : vector<8x96xf32> to vector<8x32xf32>
    %150 = vector.extract_strided_slice %147 {offsets = [0, 64], sizes = [8, 32], strides = [1, 1]} : vector<8x96xf32> to vector<8x32xf32>
    %c0_68 = arith.constant 0 : index
    %c0_69 = arith.constant 0 : index
    %151 = vector.load %arg15[%c0_68, %c0_69] : memref<8x8xf32, #tpu.memory_space<vmem>>, vector<8x8xf32>
    %c0_70 = arith.constant 0 : index
    %c0_71 = arith.constant 0 : index
    %152 = vector.load %arg16[%c0_70, %c0_71] : memref<8x8xf32, #tpu.memory_space<vmem>>, vector<8x8xf32>
    %c0_72 = arith.constant 0 : index
    %c0_73 = arith.constant 0 : index
    %c0_74 = arith.constant 0 : index
    %153 = vector.load %arg14[%c0_72, %c0_73, %c0_74] : memref<3x1x32xf32, #tpu.memory_space<vmem>>, vector<1x1x32xf32>
    %154 = vector.shape_cast %153 : vector<1x1x32xf32> to vector<1x32xf32>
    %155 = vector.broadcast %154 : vector<1x32xf32> to vector<8x32xf32>
    %156 = arith.addf %109, %155 : vector<8x32xf32>
    %157 = arith.addf %156, %149 : vector<8x32xf32>
    %cst_75 = arith.constant dense<0.000000e+00> : vector<8x32xf32>
    %158 = tpu.matmul %151, %148, %cst_75 {dimension_numbers = #tpu.dot_dimension_numbers<[1], [0], [0], [1], [0, 0, 1, 1], [], []>} : vector<8x8xf32>, vector<8x32xf32>, vector<8x32xf32> -> vector<8x32xf32>
    %159 = arith.addf %157, %158 : vector<8x32xf32>
    %cst_76 = arith.constant dense<0.000000e+00> : vector<8x32xf32>
    %160 = tpu.matmul %152, %150, %cst_76 {dimension_numbers = #tpu.dot_dimension_numbers<[1], [0], [0], [1], [0, 0, 1, 1], [], []>} : vector<8x8xf32>, vector<8x32xf32>, vector<8x32xf32> -> vector<8x32xf32>
    %161 = arith.addf %159, %160 : vector<8x32xf32>
    %c1 = arith.constant 1 : index
    %c0_77 = arith.constant 0 : index
    %c0_78 = arith.constant 0 : index
    %162 = vector.load %arg2[%c1, %c0_77, %c0_78] : memref<3x8x32xf32, #tpu.memory_space<vmem>>, vector<1x8x32xf32>
    %163 = vector.shape_cast %162 : vector<1x8x32xf32> to vector<8x32xf32>
    %164 = arith.addf %161, %163 : vector<8x32xf32>
    %c1_79 = arith.constant 1 : index
    %c0_80 = arith.constant 0 : index
    %c0_81 = arith.constant 0 : index
    %165 = vector.load %arg3[%c1_79, %c0_80, %c0_81] : memref<3x1x32xf32, #tpu.memory_space<vmem>>, vector<1x1x32xf32>
    %166 = vector.shape_cast %165 : vector<1x1x32xf32> to vector<1x32xf32>
    %c1_82 = arith.constant 1 : index
    %c0_83 = arith.constant 0 : index
    %c0_84 = arith.constant 0 : index
    %167 = vector.load %arg4[%c1_82, %c0_83, %c0_84] : memref<3x1x32xf32, #tpu.memory_space<vmem>>, vector<1x1x32xf32>
    %168 = vector.shape_cast %167 : vector<1x1x32xf32> to vector<1x32xf32>
    %cst_85 = arith.constant dense<0.000000e+00> : vector<8xf32>
    %169 = vector.multi_reduction <add>, %164, %cst_85 [1] : vector<8x32xf32> to vector<8xf32>
    %170 = vector.shape_cast %169 : vector<8xf32> to vector<8x1xf32>
    %cst_86 = arith.constant 3.200000e+01 : f32
    %171 = vector.broadcast %cst_86 : f32 to vector<8x1xf32>
    %172 = arith.divf %170, %171 : vector<8x1xf32>
    %173 = vector.broadcast %172 : vector<8x1xf32> to vector<8x32xf32>
    %174 = arith.subf %164, %173 : vector<8x32xf32>
    %175 = arith.mulf %174, %174 : vector<8x32xf32>
    %cst_87 = arith.constant dense<0.000000e+00> : vector<8xf32>
    %176 = vector.multi_reduction <add>, %175, %cst_87 [1] : vector<8x32xf32> to vector<8xf32>
    %177 = vector.shape_cast %176 : vector<8xf32> to vector<8x1xf32>
    %cst_88 = arith.constant 0.0322580636 : f32
    %178 = vector.broadcast %cst_88 : f32 to vector<8x1xf32>
    %179 = arith.mulf %177, %178 : vector<8x1xf32>
    %180 = math.sqrt %179 : vector<8x1xf32>
    %181 = vector.broadcast %172 : vector<8x1xf32> to vector<8x32xf32>
    %182 = arith.subf %164, %181 : vector<8x32xf32>
    %183 = vector.broadcast %166 : vector<1x32xf32> to vector<8x32xf32>
    %184 = arith.mulf %183, %182 : vector<8x32xf32>
    %cst_89 = arith.constant 9.99999997E-7 : f32
    %185 = vector.broadcast %cst_89 : f32 to vector<8x1xf32>
    %186 = arith.addf %180, %185 : vector<8x1xf32>
    %187 = vector.broadcast %186 : vector<8x1xf32> to vector<8x32xf32>
    %188 = arith.divf %184, %187 : vector<8x32xf32>
    %189 = vector.broadcast %168 : vector<1x32xf32> to vector<8x32xf32>
    %190 = arith.addf %188, %189 : vector<8x32xf32>
    %c1_90 = arith.constant 1 : index
    %c0_91 = arith.constant 0 : index
    %c0_92 = arith.constant 0 : index
    %191 = vector.load %arg7[%c1_90, %c0_91, %c0_92] : memref<3x32x96xf32, #tpu.memory_space<vmem>>, vector<1x32x96xf32>
    %192 = vector.shape_cast %191 : vector<1x32x96xf32> to vector<32x96xf32>
    %cst_93 = arith.constant dense<0.000000e+00> : vector<8x96xf32>
    %193 = tpu.matmul %190, %192, %cst_93 {dimension_numbers = #tpu.dot_dimension_numbers<[1], [0], [0], [1], [0, 0, 1, 1], [], []>} : vector<8x32xf32>, vector<32x96xf32>, vector<8x96xf32> -> vector<8x96xf32>
    %c1_94 = arith.constant 1 : index
    %c0_95 = arith.constant 0 : index
    %c0_96 = arith.constant 0 : index
    %194 = vector.load %arg8[%c1_94, %c0_95, %c0_96] : memref<3x1x96xf32, #tpu.memory_space<vmem>>, vector<1x1x96xf32>
    %195 = vector.shape_cast %194 : vector<1x1x96xf32> to vector<1x96xf32>
    %196 = vector.broadcast %195 : vector<1x96xf32> to vector<8x96xf32>
    %197 = arith.addf %193, %196 : vector<8x96xf32>
    %198 = vector.extract_strided_slice %197 {offsets = [0, 0], sizes = [8, 32], strides = [1, 1]} : vector<8x96xf32> to vector<8x32xf32>
    %199 = vector.extract_strided_slice %197 {offsets = [0, 32], sizes = [8, 32], strides = [1, 1]} : vector<8x96xf32> to vector<8x32xf32>
    %200 = vector.extract_strided_slice %197 {offsets = [0, 64], sizes = [8, 32], strides = [1, 1]} : vector<8x96xf32> to vector<8x32xf32>
    %201 = vector.extract_strided_slice %198 {offsets = [0, 0], sizes = [8, 8], strides = [1, 1]} : vector<8x32xf32> to vector<8x8xf32>
    %202 = vector.extract_strided_slice %199 {offsets = [0, 0], sizes = [8, 8], strides = [1, 1]} : vector<8x32xf32> to vector<8x8xf32>
    %203 = vector.extract_strided_slice %200 {offsets = [0, 0], sizes = [8, 8], strides = [1, 1]} : vector<8x32xf32> to vector<8x8xf32>
    %cst_97 = arith.constant dense<0.000000e+00> : vector<8x8xf32>
    %204 = tpu.matmul %201, %202, %cst_97 {dimension_numbers = #tpu.dot_dimension_numbers<[1], [1], [0], [0], [0, 0, 1, 0], [], []>} : vector<8x8xf32>, vector<8x8xf32>, vector<8x8xf32> -> vector<8x8xf32>
    %cst_98 = arith.constant dense<0xFF800000> : vector<8xf32>
    %205 = vector.multi_reduction <maximumf>, %204, %cst_98 [1] : vector<8x8xf32> to vector<8xf32>
    %206 = vector.shape_cast %205 : vector<8xf32> to vector<8x1xf32>
    %207 = vector.broadcast %206 : vector<8x1xf32> to vector<8x8xf32>
    %208 = arith.subf %204, %207 : vector<8x8xf32>
    %209 = math.exp %208 : vector<8x8xf32>
    %cst_99 = arith.constant dense<0.000000e+00> : vector<8xf32>
    %210 = vector.multi_reduction <add>, %209, %cst_99 [1] : vector<8x8xf32> to vector<8xf32>
    %211 = vector.shape_cast %210 : vector<8xf32> to vector<8x1xf32>
    %212 = tpu.reciprocal %211 {approx = true} : vector<8x1xf32> -> vector<8x1xf32>
    %213 = vector.broadcast %212 : vector<8x1xf32> to vector<8x8xf32>
    %214 = arith.mulf %209, %213 : vector<8x8xf32>
    %cst_100 = arith.constant dense<0.000000e+00> : vector<8x8xf32>
    %215 = tpu.matmul %214, %203, %cst_100 {dimension_numbers = #tpu.dot_dimension_numbers<[1], [0], [0], [1], [0, 0, 1, 1], [], []>} : vector<8x8xf32>, vector<8x8xf32>, vector<8x8xf32> -> vector<8x8xf32>
    %216 = vector.extract_strided_slice %198 {offsets = [0, 8], sizes = [8, 8], strides = [1, 1]} : vector<8x32xf32> to vector<8x8xf32>
    %217 = vector.extract_strided_slice %199 {offsets = [0, 8], sizes = [8, 8], strides = [1, 1]} : vector<8x32xf32> to vector<8x8xf32>
    %218 = vector.extract_strided_slice %200 {offsets = [0, 8], sizes = [8, 8], strides = [1, 1]} : vector<8x32xf32> to vector<8x8xf32>
    %cst_101 = arith.constant dense<0.000000e+00> : vector<8x8xf32>
    %219 = tpu.matmul %216, %217, %cst_101 {dimension_numbers = #tpu.dot_dimension_numbers<[1], [1], [0], [0], [0, 0, 1, 0], [], []>} : vector<8x8xf32>, vector<8x8xf32>, vector<8x8xf32> -> vector<8x8xf32>
    %cst_102 = arith.constant dense<0xFF800000> : vector<8xf32>
    %220 = vector.multi_reduction <maximumf>, %219, %cst_102 [1] : vector<8x8xf32> to vector<8xf32>
    %221 = vector.shape_cast %220 : vector<8xf32> to vector<8x1xf32>
    %222 = vector.broadcast %221 : vector<8x1xf32> to vector<8x8xf32>
    %223 = arith.subf %219, %222 : vector<8x8xf32>
    %224 = math.exp %223 : vector<8x8xf32>
    %cst_103 = arith.constant dense<0.000000e+00> : vector<8xf32>
    %225 = vector.multi_reduction <add>, %224, %cst_103 [1] : vector<8x8xf32> to vector<8xf32>
    %226 = vector.shape_cast %225 : vector<8xf32> to vector<8x1xf32>
    %227 = tpu.reciprocal %226 {approx = true} : vector<8x1xf32> -> vector<8x1xf32>
    %228 = vector.broadcast %227 : vector<8x1xf32> to vector<8x8xf32>
    %229 = arith.mulf %224, %228 : vector<8x8xf32>
    %cst_104 = arith.constant dense<0.000000e+00> : vector<8x8xf32>
    %230 = tpu.matmul %229, %218, %cst_104 {dimension_numbers = #tpu.dot_dimension_numbers<[1], [0], [0], [1], [0, 0, 1, 1], [], []>} : vector<8x8xf32>, vector<8x8xf32>, vector<8x8xf32> -> vector<8x8xf32>
    %231 = vector.extract_strided_slice %198 {offsets = [0, 16], sizes = [8, 8], strides = [1, 1]} : vector<8x32xf32> to vector<8x8xf32>
    %232 = vector.extract_strided_slice %199 {offsets = [0, 16], sizes = [8, 8], strides = [1, 1]} : vector<8x32xf32> to vector<8x8xf32>
    %233 = vector.extract_strided_slice %200 {offsets = [0, 16], sizes = [8, 8], strides = [1, 1]} : vector<8x32xf32> to vector<8x8xf32>
    %cst_105 = arith.constant dense<0.000000e+00> : vector<8x8xf32>
    %234 = tpu.matmul %231, %232, %cst_105 {dimension_numbers = #tpu.dot_dimension_numbers<[1], [1], [0], [0], [0, 0, 1, 0], [], []>} : vector<8x8xf32>, vector<8x8xf32>, vector<8x8xf32> -> vector<8x8xf32>
    %cst_106 = arith.constant dense<0xFF800000> : vector<8xf32>
    %235 = vector.multi_reduction <maximumf>, %234, %cst_106 [1] : vector<8x8xf32> to vector<8xf32>
    %236 = vector.shape_cast %235 : vector<8xf32> to vector<8x1xf32>
    %237 = vector.broadcast %236 : vector<8x1xf32> to vector<8x8xf32>
    %238 = arith.subf %234, %237 : vector<8x8xf32>
    %239 = math.exp %238 : vector<8x8xf32>
    %cst_107 = arith.constant dense<0.000000e+00> : vector<8xf32>
    %240 = vector.multi_reduction <add>, %239, %cst_107 [1] : vector<8x8xf32> to vector<8xf32>
    %241 = vector.shape_cast %240 : vector<8xf32> to vector<8x1xf32>
    %242 = tpu.reciprocal %241 {approx = true} : vector<8x1xf32> -> vector<8x1xf32>
    %243 = vector.broadcast %242 : vector<8x1xf32> to vector<8x8xf32>
    %244 = arith.mulf %239, %243 : vector<8x8xf32>
    %cst_108 = arith.constant dense<0.000000e+00> : vector<8x8xf32>
    %245 = tpu.matmul %244, %233, %cst_108 {dimension_numbers = #tpu.dot_dimension_numbers<[1], [0], [0], [1], [0, 0, 1, 1], [], []>} : vector<8x8xf32>, vector<8x8xf32>, vector<8x8xf32> -> vector<8x8xf32>
    %246 = vector.extract_strided_slice %198 {offsets = [0, 24], sizes = [8, 8], strides = [1, 1]} : vector<8x32xf32> to vector<8x8xf32>
    %247 = vector.extract_strided_slice %199 {offsets = [0, 24], sizes = [8, 8], strides = [1, 1]} : vector<8x32xf32> to vector<8x8xf32>
    %248 = vector.extract_strided_slice %200 {offsets = [0, 24], sizes = [8, 8], strides = [1, 1]} : vector<8x32xf32> to vector<8x8xf32>
    %cst_109 = arith.constant dense<0.000000e+00> : vector<8x8xf32>
    %249 = tpu.matmul %246, %247, %cst_109 {dimension_numbers = #tpu.dot_dimension_numbers<[1], [1], [0], [0], [0, 0, 1, 0], [], []>} : vector<8x8xf32>, vector<8x8xf32>, vector<8x8xf32> -> vector<8x8xf32>
    %cst_110 = arith.constant dense<0xFF800000> : vector<8xf32>
    %250 = vector.multi_reduction <maximumf>, %249, %cst_110 [1] : vector<8x8xf32> to vector<8xf32>
    %251 = vector.shape_cast %250 : vector<8xf32> to vector<8x1xf32>
    %252 = vector.broadcast %251 : vector<8x1xf32> to vector<8x8xf32>
    %253 = arith.subf %249, %252 : vector<8x8xf32>
    %254 = math.exp %253 : vector<8x8xf32>
    %cst_111 = arith.constant dense<0.000000e+00> : vector<8xf32>
    %255 = vector.multi_reduction <add>, %254, %cst_111 [1] : vector<8x8xf32> to vector<8xf32>
    %256 = vector.shape_cast %255 : vector<8xf32> to vector<8x1xf32>
    %257 = tpu.reciprocal %256 {approx = true} : vector<8x1xf32> -> vector<8x1xf32>
    %258 = vector.broadcast %257 : vector<8x1xf32> to vector<8x8xf32>
    %259 = arith.mulf %254, %258 : vector<8x8xf32>
    %cst_112 = arith.constant dense<0.000000e+00> : vector<8x8xf32>
    %260 = tpu.matmul %259, %248, %cst_112 {dimension_numbers = #tpu.dot_dimension_numbers<[1], [0], [0], [1], [0, 0, 1, 1], [], []>} : vector<8x8xf32>, vector<8x8xf32>, vector<8x8xf32> -> vector<8x8xf32>
    %261 = tpu.concatenate %215, %230, %245, %260 in 1 : vector<8x8xf32>, vector<8x8xf32>, vector<8x8xf32>, vector<8x8xf32> -> vector<8x32xf32>
    %c1_113 = arith.constant 1 : index
    %c0_114 = arith.constant 0 : index
    %c0_115 = arith.constant 0 : index
    %262 = vector.load %arg9[%c1_113, %c0_114, %c0_115] : memref<3x32x32xf32, #tpu.memory_space<vmem>>, vector<1x32x32xf32>
    %263 = vector.shape_cast %262 : vector<1x32x32xf32> to vector<32x32xf32>
    %cst_116 = arith.constant dense<0.000000e+00> : vector<8x32xf32>
    %264 = tpu.matmul %261, %263, %cst_116 {dimension_numbers = #tpu.dot_dimension_numbers<[1], [0], [0], [1], [0, 0, 1, 1], [], []>} : vector<8x32xf32>, vector<32x32xf32>, vector<8x32xf32> -> vector<8x32xf32>
    %265 = arith.addf %164, %264 : vector<8x32xf32>
    %c1_117 = arith.constant 1 : index
    %c0_118 = arith.constant 0 : index
    %c0_119 = arith.constant 0 : index
    %266 = vector.load %arg10[%c1_117, %c0_118, %c0_119] : memref<3x1x32xf32, #tpu.memory_space<vmem>>, vector<1x1x32xf32>
    %267 = vector.shape_cast %266 : vector<1x1x32xf32> to vector<1x32xf32>
    %268 = vector.broadcast %267 : vector<1x32xf32> to vector<8x32xf32>
    %269 = arith.addf %265, %268 : vector<8x32xf32>
    %c1_120 = arith.constant 1 : index
    %c0_121 = arith.constant 0 : index
    %c0_122 = arith.constant 0 : index
    %270 = vector.load %arg5[%c1_120, %c0_121, %c0_122] : memref<3x1x32xf32, #tpu.memory_space<vmem>>, vector<1x1x32xf32>
    %271 = vector.shape_cast %270 : vector<1x1x32xf32> to vector<1x32xf32>
    %c1_123 = arith.constant 1 : index
    %c0_124 = arith.constant 0 : index
    %c0_125 = arith.constant 0 : index
    %272 = vector.load %arg6[%c1_123, %c0_124, %c0_125] : memref<3x1x32xf32, #tpu.memory_space<vmem>>, vector<1x1x32xf32>
    %273 = vector.shape_cast %272 : vector<1x1x32xf32> to vector<1x32xf32>
    %cst_126 = arith.constant dense<0.000000e+00> : vector<8xf32>
    %274 = vector.multi_reduction <add>, %269, %cst_126 [1] : vector<8x32xf32> to vector<8xf32>
    %275 = vector.shape_cast %274 : vector<8xf32> to vector<8x1xf32>
    %cst_127 = arith.constant 3.200000e+01 : f32
    %276 = vector.broadcast %cst_127 : f32 to vector<8x1xf32>
    %277 = arith.divf %275, %276 : vector<8x1xf32>
    %278 = vector.broadcast %277 : vector<8x1xf32> to vector<8x32xf32>
    %279 = arith.subf %269, %278 : vector<8x32xf32>
    %280 = arith.mulf %279, %279 : vector<8x32xf32>
    %cst_128 = arith.constant dense<0.000000e+00> : vector<8xf32>
    %281 = vector.multi_reduction <add>, %280, %cst_128 [1] : vector<8x32xf32> to vector<8xf32>
    %282 = vector.shape_cast %281 : vector<8xf32> to vector<8x1xf32>
    %cst_129 = arith.constant 0.0322580636 : f32
    %283 = vector.broadcast %cst_129 : f32 to vector<8x1xf32>
    %284 = arith.mulf %282, %283 : vector<8x1xf32>
    %285 = math.sqrt %284 : vector<8x1xf32>
    %286 = vector.broadcast %277 : vector<8x1xf32> to vector<8x32xf32>
    %287 = arith.subf %269, %286 : vector<8x32xf32>
    %288 = vector.broadcast %271 : vector<1x32xf32> to vector<8x32xf32>
    %289 = arith.mulf %288, %287 : vector<8x32xf32>
    %cst_130 = arith.constant 9.99999997E-7 : f32
    %290 = vector.broadcast %cst_130 : f32 to vector<8x1xf32>
    %291 = arith.addf %285, %290 : vector<8x1xf32>
    %292 = vector.broadcast %291 : vector<8x1xf32> to vector<8x32xf32>
    %293 = arith.divf %289, %292 : vector<8x32xf32>
    %294 = vector.broadcast %273 : vector<1x32xf32> to vector<8x32xf32>
    %295 = arith.addf %293, %294 : vector<8x32xf32>
    %c1_131 = arith.constant 1 : index
    %c0_132 = arith.constant 0 : index
    %c0_133 = arith.constant 0 : index
    %296 = vector.load %arg11[%c1_131, %c0_132, %c0_133] : memref<3x32x64xf32, #tpu.memory_space<vmem>>, vector<1x32x64xf32>
    %297 = vector.shape_cast %296 : vector<1x32x64xf32> to vector<32x64xf32>
    %cst_134 = arith.constant dense<0.000000e+00> : vector<8x64xf32>
    %298 = tpu.matmul %295, %297, %cst_134 {dimension_numbers = #tpu.dot_dimension_numbers<[1], [0], [0], [1], [0, 0, 1, 1], [], []>} : vector<8x32xf32>, vector<32x64xf32>, vector<8x64xf32> -> vector<8x64xf32>
    %c1_135 = arith.constant 1 : index
    %c0_136 = arith.constant 0 : index
    %c0_137 = arith.constant 0 : index
    %299 = vector.load %arg12[%c1_135, %c0_136, %c0_137] : memref<3x1x64xf32, #tpu.memory_space<vmem>>, vector<1x1x64xf32>
    %300 = vector.shape_cast %299 : vector<1x1x64xf32> to vector<1x64xf32>
    %301 = vector.broadcast %300 : vector<1x64xf32> to vector<8x64xf32>
    %302 = arith.addf %298, %301 : vector<8x64xf32>
    %cst_138 = arith.constant 0.000000e+00 : f32
    %303 = vector.broadcast %cst_138 : f32 to vector<8x64xf32>
    %304 = arith.maximumf %302, %303 : vector<8x64xf32>
    %c1_139 = arith.constant 1 : index
    %c0_140 = arith.constant 0 : index
    %c0_141 = arith.constant 0 : index
    %305 = vector.load %arg13[%c1_139, %c0_140, %c0_141] : memref<3x64x96xf32, #tpu.memory_space<vmem>>, vector<1x64x96xf32>
    %306 = vector.shape_cast %305 : vector<1x64x96xf32> to vector<64x96xf32>
    %cst_142 = arith.constant dense<0.000000e+00> : vector<8x96xf32>
    %307 = tpu.matmul %304, %306, %cst_142 {dimension_numbers = #tpu.dot_dimension_numbers<[1], [0], [0], [1], [0, 0, 1, 1], [], []>} : vector<8x64xf32>, vector<64x96xf32>, vector<8x96xf32> -> vector<8x96xf32>
    %308 = vector.extract_strided_slice %307 {offsets = [0, 0], sizes = [8, 32], strides = [1, 1]} : vector<8x96xf32> to vector<8x32xf32>
    %309 = vector.extract_strided_slice %307 {offsets = [0, 32], sizes = [8, 32], strides = [1, 1]} : vector<8x96xf32> to vector<8x32xf32>
    %310 = vector.extract_strided_slice %307 {offsets = [0, 64], sizes = [8, 32], strides = [1, 1]} : vector<8x96xf32> to vector<8x32xf32>
    %c0_143 = arith.constant 0 : index
    %c0_144 = arith.constant 0 : index
    %311 = vector.load %arg17[%c0_143, %c0_144] : memref<4x8xf32, #tpu.memory_space<vmem>>, vector<4x8xf32>
    %c0_145 = arith.constant 0 : index
    %c0_146 = arith.constant 0 : index
    %312 = vector.load %arg18[%c0_145, %c0_146] : memref<4x8xf32, #tpu.memory_space<vmem>>, vector<4x8xf32>
    %c0_147 = arith.constant 0 : index
    %c0_148 = arith.constant 0 : index
    %313 = vector.load %arg19[%c0_147, %c0_148] : memref<4x8xf32, #tpu.memory_space<vmem>>, vector<4x8xf32>
    %c1_149 = arith.constant 1 : index
    %c0_150 = arith.constant 0 : index
    %c0_151 = arith.constant 0 : index
    %314 = vector.load %arg14[%c1_149, %c0_150, %c0_151] : memref<3x1x32xf32, #tpu.memory_space<vmem>>, vector<1x1x32xf32>
    %315 = vector.shape_cast %314 : vector<1x1x32xf32> to vector<1x32xf32>
    %316 = arith.addf %269, %309 : vector<8x32xf32>
    %cst_152 = arith.constant dense<0.000000e+00> : vector<4x32xf32>
    %317 = tpu.matmul %313, %316, %cst_152 {dimension_numbers = #tpu.dot_dimension_numbers<[1], [0], [0], [1], [0, 0, 1, 1], [], []>} : vector<4x8xf32>, vector<8x32xf32>, vector<4x32xf32> -> vector<4x32xf32>
    %318 = vector.broadcast %315 : vector<1x32xf32> to vector<4x32xf32>
    %319 = arith.addf %318, %317 : vector<4x32xf32>
    %cst_153 = arith.constant dense<0.000000e+00> : vector<4x32xf32>
    %320 = tpu.matmul %311, %308, %cst_153 {dimension_numbers = #tpu.dot_dimension_numbers<[1], [0], [0], [1], [0, 0, 1, 1], [], []>} : vector<4x8xf32>, vector<8x32xf32>, vector<4x32xf32> -> vector<4x32xf32>
    %321 = arith.addf %319, %320 : vector<4x32xf32>
    %cst_154 = arith.constant dense<0.000000e+00> : vector<4x32xf32>
    %322 = tpu.matmul %312, %310, %cst_154 {dimension_numbers = #tpu.dot_dimension_numbers<[1], [0], [0], [1], [0, 0, 1, 1], [], []>} : vector<4x8xf32>, vector<8x32xf32>, vector<4x32xf32> -> vector<4x32xf32>
    %323 = arith.addf %321, %322 : vector<4x32xf32>
    %c2 = arith.constant 2 : index
    %c0_155 = arith.constant 0 : index
    %c0_156 = arith.constant 0 : index
    %324 = vector.load %arg2[%c2, %c0_155, %c0_156] : memref<3x8x32xf32, #tpu.memory_space<vmem>>, vector<1x8x32xf32>
    %325 = vector.shape_cast %324 : vector<1x8x32xf32> to vector<8x32xf32>
    %326 = vector.extract_strided_slice %325 {offsets = [0, 0], sizes = [4, 32], strides = [1, 1]} : vector<8x32xf32> to vector<4x32xf32>
    %327 = arith.addf %323, %326 : vector<4x32xf32>
    %c2_157 = arith.constant 2 : index
    %c0_158 = arith.constant 0 : index
    %c0_159 = arith.constant 0 : index
    %328 = vector.load %arg3[%c2_157, %c0_158, %c0_159] : memref<3x1x32xf32, #tpu.memory_space<vmem>>, vector<1x1x32xf32>
    %329 = vector.shape_cast %328 : vector<1x1x32xf32> to vector<1x32xf32>
    %c2_160 = arith.constant 2 : index
    %c0_161 = arith.constant 0 : index
    %c0_162 = arith.constant 0 : index
    %330 = vector.load %arg4[%c2_160, %c0_161, %c0_162] : memref<3x1x32xf32, #tpu.memory_space<vmem>>, vector<1x1x32xf32>
    %331 = vector.shape_cast %330 : vector<1x1x32xf32> to vector<1x32xf32>
    %cst_163 = arith.constant dense<0.000000e+00> : vector<4xf32>
    %332 = vector.multi_reduction <add>, %327, %cst_163 [1] : vector<4x32xf32> to vector<4xf32>
    %333 = vector.shape_cast %332 : vector<4xf32> to vector<4x1xf32>
    %cst_164 = arith.constant 3.200000e+01 : f32
    %334 = vector.broadcast %cst_164 : f32 to vector<4x1xf32>
    %335 = arith.divf %333, %334 : vector<4x1xf32>
    %336 = vector.broadcast %335 : vector<4x1xf32> to vector<4x32xf32>
    %337 = arith.subf %327, %336 : vector<4x32xf32>
    %338 = arith.mulf %337, %337 : vector<4x32xf32>
    %cst_165 = arith.constant dense<0.000000e+00> : vector<4xf32>
    %339 = vector.multi_reduction <add>, %338, %cst_165 [1] : vector<4x32xf32> to vector<4xf32>
    %340 = vector.shape_cast %339 : vector<4xf32> to vector<4x1xf32>
    %cst_166 = arith.constant 0.0322580636 : f32
    %341 = vector.broadcast %cst_166 : f32 to vector<4x1xf32>
    %342 = arith.mulf %340, %341 : vector<4x1xf32>
    %343 = math.sqrt %342 : vector<4x1xf32>
    %344 = vector.broadcast %335 : vector<4x1xf32> to vector<4x32xf32>
    %345 = arith.subf %327, %344 : vector<4x32xf32>
    %346 = vector.broadcast %329 : vector<1x32xf32> to vector<4x32xf32>
    %347 = arith.mulf %346, %345 : vector<4x32xf32>
    %cst_167 = arith.constant 9.99999997E-7 : f32
    %348 = vector.broadcast %cst_167 : f32 to vector<4x1xf32>
    %349 = arith.addf %343, %348 : vector<4x1xf32>
    %350 = vector.broadcast %349 : vector<4x1xf32> to vector<4x32xf32>
    %351 = arith.divf %347, %350 : vector<4x32xf32>
    %352 = vector.broadcast %331 : vector<1x32xf32> to vector<4x32xf32>
    %353 = arith.addf %351, %352 : vector<4x32xf32>
    %c2_168 = arith.constant 2 : index
    %c0_169 = arith.constant 0 : index
    %c0_170 = arith.constant 0 : index
    %354 = vector.load %arg7[%c2_168, %c0_169, %c0_170] : memref<3x32x96xf32, #tpu.memory_space<vmem>>, vector<1x32x96xf32>
    %355 = vector.shape_cast %354 : vector<1x32x96xf32> to vector<32x96xf32>
    %cst_171 = arith.constant dense<0.000000e+00> : vector<4x96xf32>
    %356 = tpu.matmul %353, %355, %cst_171 {dimension_numbers = #tpu.dot_dimension_numbers<[1], [0], [0], [1], [0, 0, 1, 1], [], []>} : vector<4x32xf32>, vector<32x96xf32>, vector<4x96xf32> -> vector<4x96xf32>
    %c2_172 = arith.constant 2 : index
    %c0_173 = arith.constant 0 : index
    %c0_174 = arith.constant 0 : index
    %357 = vector.load %arg8[%c2_172, %c0_173, %c0_174] : memref<3x1x96xf32, #tpu.memory_space<vmem>>, vector<1x1x96xf32>
    %358 = vector.shape_cast %357 : vector<1x1x96xf32> to vector<1x96xf32>
    %359 = vector.broadcast %358 : vector<1x96xf32> to vector<4x96xf32>
    %360 = arith.addf %356, %359 : vector<4x96xf32>
    %361 = vector.extract_strided_slice %360 {offsets = [0, 0], sizes = [4, 32], strides = [1, 1]} : vector<4x96xf32> to vector<4x32xf32>
    %362 = vector.extract_strided_slice %360 {offsets = [0, 32], sizes = [4, 32], strides = [1, 1]} : vector<4x96xf32> to vector<4x32xf32>
    %363 = vector.extract_strided_slice %360 {offsets = [0, 64], sizes = [4, 32], strides = [1, 1]} : vector<4x96xf32> to vector<4x32xf32>
    %364 = vector.extract_strided_slice %361 {offsets = [0, 0], sizes = [4, 8], strides = [1, 1]} : vector<4x32xf32> to vector<4x8xf32>
    %365 = vector.extract_strided_slice %362 {offsets = [0, 0], sizes = [4, 8], strides = [1, 1]} : vector<4x32xf32> to vector<4x8xf32>
    %366 = vector.extract_strided_slice %363 {offsets = [0, 0], sizes = [4, 8], strides = [1, 1]} : vector<4x32xf32> to vector<4x8xf32>
    %cst_175 = arith.constant dense<0.000000e+00> : vector<4x4xf32>
    %367 = tpu.matmul %364, %365, %cst_175 {dimension_numbers = #tpu.dot_dimension_numbers<[1], [1], [0], [0], [0, 0, 1, 0], [], []>} : vector<4x8xf32>, vector<4x8xf32>, vector<4x4xf32> -> vector<4x4xf32>
    %cst_176 = arith.constant dense<0xFF800000> : vector<4xf32>
    %368 = vector.multi_reduction <maximumf>, %367, %cst_176 [1] : vector<4x4xf32> to vector<4xf32>
    %369 = vector.shape_cast %368 : vector<4xf32> to vector<4x1xf32>
    %370 = vector.broadcast %369 : vector<4x1xf32> to vector<4x4xf32>
    %371 = arith.subf %367, %370 : vector<4x4xf32>
    %372 = math.exp %371 : vector<4x4xf32>
    %cst_177 = arith.constant dense<0.000000e+00> : vector<4xf32>
    %373 = vector.multi_reduction <add>, %372, %cst_177 [1] : vector<4x4xf32> to vector<4xf32>
    %374 = vector.shape_cast %373 : vector<4xf32> to vector<4x1xf32>
    %375 = tpu.reciprocal %374 {approx = true} : vector<4x1xf32> -> vector<4x1xf32>
    %376 = vector.broadcast %375 : vector<4x1xf32> to vector<4x4xf32>
    %377 = arith.mulf %372, %376 : vector<4x4xf32>
    %cst_178 = arith.constant dense<0.000000e+00> : vector<4x8xf32>
    %378 = tpu.matmul %377, %366, %cst_178 {dimension_numbers = #tpu.dot_dimension_numbers<[1], [0], [0], [1], [0, 0, 1, 1], [], []>} : vector<4x4xf32>, vector<4x8xf32>, vector<4x8xf32> -> vector<4x8xf32>
    %379 = vector.extract_strided_slice %361 {offsets = [0, 8], sizes = [4, 8], strides = [1, 1]} : vector<4x32xf32> to vector<4x8xf32>
    %380 = vector.extract_strided_slice %362 {offsets = [0, 8], sizes = [4, 8], strides = [1, 1]} : vector<4x32xf32> to vector<4x8xf32>
    %381 = vector.extract_strided_slice %363 {offsets = [0, 8], sizes = [4, 8], strides = [1, 1]} : vector<4x32xf32> to vector<4x8xf32>
    %cst_179 = arith.constant dense<0.000000e+00> : vector<4x4xf32>
    %382 = tpu.matmul %379, %380, %cst_179 {dimension_numbers = #tpu.dot_dimension_numbers<[1], [1], [0], [0], [0, 0, 1, 0], [], []>} : vector<4x8xf32>, vector<4x8xf32>, vector<4x4xf32> -> vector<4x4xf32>
    %cst_180 = arith.constant dense<0xFF800000> : vector<4xf32>
    %383 = vector.multi_reduction <maximumf>, %382, %cst_180 [1] : vector<4x4xf32> to vector<4xf32>
    %384 = vector.shape_cast %383 : vector<4xf32> to vector<4x1xf32>
    %385 = vector.broadcast %384 : vector<4x1xf32> to vector<4x4xf32>
    %386 = arith.subf %382, %385 : vector<4x4xf32>
    %387 = math.exp %386 : vector<4x4xf32>
    %cst_181 = arith.constant dense<0.000000e+00> : vector<4xf32>
    %388 = vector.multi_reduction <add>, %387, %cst_181 [1] : vector<4x4xf32> to vector<4xf32>
    %389 = vector.shape_cast %388 : vector<4xf32> to vector<4x1xf32>
    %390 = tpu.reciprocal %389 {approx = true} : vector<4x1xf32> -> vector<4x1xf32>
    %391 = vector.broadcast %390 : vector<4x1xf32> to vector<4x4xf32>
    %392 = arith.mulf %387, %391 : vector<4x4xf32>
    %cst_182 = arith.constant dense<0.000000e+00> : vector<4x8xf32>
    %393 = tpu.matmul %392, %381, %cst_182 {dimension_numbers = #tpu.dot_dimension_numbers<[1], [0], [0], [1], [0, 0, 1, 1], [], []>} : vector<4x4xf32>, vector<4x8xf32>, vector<4x8xf32> -> vector<4x8xf32>
    %394 = vector.extract_strided_slice %361 {offsets = [0, 16], sizes = [4, 8], strides = [1, 1]} : vector<4x32xf32> to vector<4x8xf32>
    %395 = vector.extract_strided_slice %362 {offsets = [0, 16], sizes = [4, 8], strides = [1, 1]} : vector<4x32xf32> to vector<4x8xf32>
    %396 = vector.extract_strided_slice %363 {offsets = [0, 16], sizes = [4, 8], strides = [1, 1]} : vector<4x32xf32> to vector<4x8xf32>
    %cst_183 = arith.constant dense<0.000000e+00> : vector<4x4xf32>
    %397 = tpu.matmul %394, %395, %cst_183 {dimension_numbers = #tpu.dot_dimension_numbers<[1], [1], [0], [0], [0, 0, 1, 0], [], []>} : vector<4x8xf32>, vector<4x8xf32>, vector<4x4xf32> -> vector<4x4xf32>
    %cst_184 = arith.constant dense<0xFF800000> : vector<4xf32>
    %398 = vector.multi_reduction <maximumf>, %397, %cst_184 [1] : vector<4x4xf32> to vector<4xf32>
    %399 = vector.shape_cast %398 : vector<4xf32> to vector<4x1xf32>
    %400 = vector.broadcast %399 : vector<4x1xf32> to vector<4x4xf32>
    %401 = arith.subf %397, %400 : vector<4x4xf32>
    %402 = math.exp %401 : vector<4x4xf32>
    %cst_185 = arith.constant dense<0.000000e+00> : vector<4xf32>
    %403 = vector.multi_reduction <add>, %402, %cst_185 [1] : vector<4x4xf32> to vector<4xf32>
    %404 = vector.shape_cast %403 : vector<4xf32> to vector<4x1xf32>
    %405 = tpu.reciprocal %404 {approx = true} : vector<4x1xf32> -> vector<4x1xf32>
    %406 = vector.broadcast %405 : vector<4x1xf32> to vector<4x4xf32>
    %407 = arith.mulf %402, %406 : vector<4x4xf32>
    %cst_186 = arith.constant dense<0.000000e+00> : vector<4x8xf32>
    %408 = tpu.matmul %407, %396, %cst_186 {dimension_numbers = #tpu.dot_dimension_numbers<[1], [0], [0], [1], [0, 0, 1, 1], [], []>} : vector<4x4xf32>, vector<4x8xf32>, vector<4x8xf32> -> vector<4x8xf32>
    %409 = vector.extract_strided_slice %361 {offsets = [0, 24], sizes = [4, 8], strides = [1, 1]} : vector<4x32xf32> to vector<4x8xf32>
    %410 = vector.extract_strided_slice %362 {offsets = [0, 24], sizes = [4, 8], strides = [1, 1]} : vector<4x32xf32> to vector<4x8xf32>
    %411 = vector.extract_strided_slice %363 {offsets = [0, 24], sizes = [4, 8], strides = [1, 1]} : vector<4x32xf32> to vector<4x8xf32>
    %cst_187 = arith.constant dense<0.000000e+00> : vector<4x4xf32>
    %412 = tpu.matmul %409, %410, %cst_187 {dimension_numbers = #tpu.dot_dimension_numbers<[1], [1], [0], [0], [0, 0, 1, 0], [], []>} : vector<4x8xf32>, vector<4x8xf32>, vector<4x4xf32> -> vector<4x4xf32>
    %cst_188 = arith.constant dense<0xFF800000> : vector<4xf32>
    %413 = vector.multi_reduction <maximumf>, %412, %cst_188 [1] : vector<4x4xf32> to vector<4xf32>
    %414 = vector.shape_cast %413 : vector<4xf32> to vector<4x1xf32>
    %415 = vector.broadcast %414 : vector<4x1xf32> to vector<4x4xf32>
    %416 = arith.subf %412, %415 : vector<4x4xf32>
    %417 = math.exp %416 : vector<4x4xf32>
    %cst_189 = arith.constant dense<0.000000e+00> : vector<4xf32>
    %418 = vector.multi_reduction <add>, %417, %cst_189 [1] : vector<4x4xf32> to vector<4xf32>
    %419 = vector.shape_cast %418 : vector<4xf32> to vector<4x1xf32>
    %420 = tpu.reciprocal %419 {approx = true} : vector<4x1xf32> -> vector<4x1xf32>
    %421 = vector.broadcast %420 : vector<4x1xf32> to vector<4x4xf32>
    %422 = arith.mulf %417, %421 : vector<4x4xf32>
    %cst_190 = arith.constant dense<0.000000e+00> : vector<4x8xf32>
    %423 = tpu.matmul %422, %411, %cst_190 {dimension_numbers = #tpu.dot_dimension_numbers<[1], [0], [0], [1], [0, 0, 1, 1], [], []>} : vector<4x4xf32>, vector<4x8xf32>, vector<4x8xf32> -> vector<4x8xf32>
    %424 = tpu.concatenate %378, %393, %408, %423 in 1 : vector<4x8xf32>, vector<4x8xf32>, vector<4x8xf32>, vector<4x8xf32> -> vector<4x32xf32>
    %c2_191 = arith.constant 2 : index
    %c0_192 = arith.constant 0 : index
    %c0_193 = arith.constant 0 : index
    %425 = vector.load %arg9[%c2_191, %c0_192, %c0_193] : memref<3x32x32xf32, #tpu.memory_space<vmem>>, vector<1x32x32xf32>
    %426 = vector.shape_cast %425 : vector<1x32x32xf32> to vector<32x32xf32>
    %cst_194 = arith.constant dense<0.000000e+00> : vector<4x32xf32>
    %427 = tpu.matmul %424, %426, %cst_194 {dimension_numbers = #tpu.dot_dimension_numbers<[1], [0], [0], [1], [0, 0, 1, 1], [], []>} : vector<4x32xf32>, vector<32x32xf32>, vector<4x32xf32> -> vector<4x32xf32>
    %428 = arith.addf %327, %427 : vector<4x32xf32>
    %c2_195 = arith.constant 2 : index
    %c0_196 = arith.constant 0 : index
    %c0_197 = arith.constant 0 : index
    %429 = vector.load %arg10[%c2_195, %c0_196, %c0_197] : memref<3x1x32xf32, #tpu.memory_space<vmem>>, vector<1x1x32xf32>
    %430 = vector.shape_cast %429 : vector<1x1x32xf32> to vector<1x32xf32>
    %431 = vector.broadcast %430 : vector<1x32xf32> to vector<4x32xf32>
    %432 = arith.addf %428, %431 : vector<4x32xf32>
    %c2_198 = arith.constant 2 : index
    %c0_199 = arith.constant 0 : index
    %c0_200 = arith.constant 0 : index
    %433 = vector.load %arg5[%c2_198, %c0_199, %c0_200] : memref<3x1x32xf32, #tpu.memory_space<vmem>>, vector<1x1x32xf32>
    %434 = vector.shape_cast %433 : vector<1x1x32xf32> to vector<1x32xf32>
    %c2_201 = arith.constant 2 : index
    %c0_202 = arith.constant 0 : index
    %c0_203 = arith.constant 0 : index
    %435 = vector.load %arg6[%c2_201, %c0_202, %c0_203] : memref<3x1x32xf32, #tpu.memory_space<vmem>>, vector<1x1x32xf32>
    %436 = vector.shape_cast %435 : vector<1x1x32xf32> to vector<1x32xf32>
    %cst_204 = arith.constant dense<0.000000e+00> : vector<4xf32>
    %437 = vector.multi_reduction <add>, %432, %cst_204 [1] : vector<4x32xf32> to vector<4xf32>
    %438 = vector.shape_cast %437 : vector<4xf32> to vector<4x1xf32>
    %cst_205 = arith.constant 3.200000e+01 : f32
    %439 = vector.broadcast %cst_205 : f32 to vector<4x1xf32>
    %440 = arith.divf %438, %439 : vector<4x1xf32>
    %441 = vector.broadcast %440 : vector<4x1xf32> to vector<4x32xf32>
    %442 = arith.subf %432, %441 : vector<4x32xf32>
    %443 = arith.mulf %442, %442 : vector<4x32xf32>
    %cst_206 = arith.constant dense<0.000000e+00> : vector<4xf32>
    %444 = vector.multi_reduction <add>, %443, %cst_206 [1] : vector<4x32xf32> to vector<4xf32>
    %445 = vector.shape_cast %444 : vector<4xf32> to vector<4x1xf32>
    %cst_207 = arith.constant 0.0322580636 : f32
    %446 = vector.broadcast %cst_207 : f32 to vector<4x1xf32>
    %447 = arith.mulf %445, %446 : vector<4x1xf32>
    %448 = math.sqrt %447 : vector<4x1xf32>
    %449 = vector.broadcast %440 : vector<4x1xf32> to vector<4x32xf32>
    %450 = arith.subf %432, %449 : vector<4x32xf32>
    %451 = vector.broadcast %434 : vector<1x32xf32> to vector<4x32xf32>
    %452 = arith.mulf %451, %450 : vector<4x32xf32>
    %cst_208 = arith.constant 9.99999997E-7 : f32
    %453 = vector.broadcast %cst_208 : f32 to vector<4x1xf32>
    %454 = arith.addf %448, %453 : vector<4x1xf32>
    %455 = vector.broadcast %454 : vector<4x1xf32> to vector<4x32xf32>
    %456 = arith.divf %452, %455 : vector<4x32xf32>
    %457 = vector.broadcast %436 : vector<1x32xf32> to vector<4x32xf32>
    %458 = arith.addf %456, %457 : vector<4x32xf32>
    %c2_209 = arith.constant 2 : index
    %c0_210 = arith.constant 0 : index
    %c0_211 = arith.constant 0 : index
    %459 = vector.load %arg11[%c2_209, %c0_210, %c0_211] : memref<3x32x64xf32, #tpu.memory_space<vmem>>, vector<1x32x64xf32>
    %460 = vector.shape_cast %459 : vector<1x32x64xf32> to vector<32x64xf32>
    %cst_212 = arith.constant dense<0.000000e+00> : vector<4x64xf32>
    %461 = tpu.matmul %458, %460, %cst_212 {dimension_numbers = #tpu.dot_dimension_numbers<[1], [0], [0], [1], [0, 0, 1, 1], [], []>} : vector<4x32xf32>, vector<32x64xf32>, vector<4x64xf32> -> vector<4x64xf32>
    %c2_213 = arith.constant 2 : index
    %c0_214 = arith.constant 0 : index
    %c0_215 = arith.constant 0 : index
    %462 = vector.load %arg12[%c2_213, %c0_214, %c0_215] : memref<3x1x64xf32, #tpu.memory_space<vmem>>, vector<1x1x64xf32>
    %463 = vector.shape_cast %462 : vector<1x1x64xf32> to vector<1x64xf32>
    %464 = vector.broadcast %463 : vector<1x64xf32> to vector<4x64xf32>
    %465 = arith.addf %461, %464 : vector<4x64xf32>
    %cst_216 = arith.constant 0.000000e+00 : f32
    %466 = vector.broadcast %cst_216 : f32 to vector<4x64xf32>
    %467 = arith.maximumf %465, %466 : vector<4x64xf32>
    %c2_217 = arith.constant 2 : index
    %c0_218 = arith.constant 0 : index
    %c0_219 = arith.constant 0 : index
    %468 = vector.load %arg13[%c2_217, %c0_218, %c0_219] : memref<3x64x96xf32, #tpu.memory_space<vmem>>, vector<1x64x96xf32>
    %469 = vector.shape_cast %468 : vector<1x64x96xf32> to vector<64x96xf32>
    %cst_220 = arith.constant dense<0.000000e+00> : vector<4x96xf32>
    %470 = tpu.matmul %467, %469, %cst_220 {dimension_numbers = #tpu.dot_dimension_numbers<[1], [0], [0], [1], [0, 0, 1, 1], [], []>} : vector<4x64xf32>, vector<64x96xf32>, vector<4x96xf32> -> vector<4x96xf32>
    %471 = vector.extract_strided_slice %470 {offsets = [0, 0], sizes = [4, 32], strides = [1, 1]} : vector<4x96xf32> to vector<4x32xf32>
    %472 = vector.extract_strided_slice %470 {offsets = [0, 32], sizes = [4, 32], strides = [1, 1]} : vector<4x96xf32> to vector<4x32xf32>
    %473 = vector.extract_strided_slice %470 {offsets = [0, 64], sizes = [4, 32], strides = [1, 1]} : vector<4x96xf32> to vector<4x32xf32>
    %c0_221 = arith.constant 0 : index
    %c0_222 = arith.constant 0 : index
    %474 = vector.load %arg20[%c0_221, %c0_222] : memref<2x4xf32, #tpu.memory_space<vmem>>, vector<2x4xf32>
    %c0_223 = arith.constant 0 : index
    %c0_224 = arith.constant 0 : index
    %475 = vector.load %arg21[%c0_223, %c0_224] : memref<2x4xf32, #tpu.memory_space<vmem>>, vector<2x4xf32>
    %c0_225 = arith.constant 0 : index
    %c0_226 = arith.constant 0 : index
    %476 = vector.load %arg22[%c0_225, %c0_226] : memref<2x4xf32, #tpu.memory_space<vmem>>, vector<2x4xf32>
    %c2_227 = arith.constant 2 : index
    %c0_228 = arith.constant 0 : index
    %c0_229 = arith.constant 0 : index
    %477 = vector.load %arg14[%c2_227, %c0_228, %c0_229] : memref<3x1x32xf32, #tpu.memory_space<vmem>>, vector<1x1x32xf32>
    %478 = vector.shape_cast %477 : vector<1x1x32xf32> to vector<1x32xf32>
    %479 = arith.addf %432, %472 : vector<4x32xf32>
    %cst_230 = arith.constant dense<0.000000e+00> : vector<2x32xf32>
    %480 = tpu.matmul %476, %479, %cst_230 {dimension_numbers = #tpu.dot_dimension_numbers<[1], [0], [0], [1], [0, 0, 1, 1], [], []>} : vector<2x4xf32>, vector<4x32xf32>, vector<2x32xf32> -> vector<2x32xf32>
    %481 = vector.broadcast %478 : vector<1x32xf32> to vector<2x32xf32>
    %482 = arith.addf %481, %480 : vector<2x32xf32>
    %cst_231 = arith.constant dense<0.000000e+00> : vector<2x32xf32>
    %483 = tpu.matmul %474, %471, %cst_231 {dimension_numbers = #tpu.dot_dimension_numbers<[1], [0], [0], [1], [0, 0, 1, 1], [], []>} : vector<2x4xf32>, vector<4x32xf32>, vector<2x32xf32> -> vector<2x32xf32>
    %484 = arith.addf %482, %483 : vector<2x32xf32>
    %cst_232 = arith.constant dense<0.000000e+00> : vector<2x32xf32>
    %485 = tpu.matmul %475, %473, %cst_232 {dimension_numbers = #tpu.dot_dimension_numbers<[1], [0], [0], [1], [0, 0, 1, 1], [], []>} : vector<2x4xf32>, vector<4x32xf32>, vector<2x32xf32> -> vector<2x32xf32>
    %486 = arith.addf %484, %485 : vector<2x32xf32>
    %c0_233 = arith.constant 0 : index
    %c0_234 = arith.constant 0 : index
    %c0_235 = arith.constant 0 : index
    %487 = vector.load %arg23[%c0_233, %c0_234, %c0_235] : memref<1x2x32xf32, #tpu.memory_space<vmem>>, vector<1x2x32xf32>
    %488 = vector.shape_cast %487 : vector<1x2x32xf32> to vector<2x32xf32>
    %489 = vector.shape_cast %486 : vector<2x32xf32> to vector<1x2x32xf32>
    tpu.vector_store %arg23[%c0_233, %c0_234, %c0_235], %489 {strides = array<i32>} : memref<1x2x32xf32, #tpu.memory_space<vmem>>, vector<1x2x32xf32>,
    return
  }
  func.func @transform_0(%arg0: i32) -> (i32, i32, i32) {
    %c0_i32 = arith.constant 0 : i32
    %c0_i32_0 = arith.constant 0 : i32
    %c0_i32_1 = arith.constant 0 : i32
    return %arg0, %c0_i32, %c0_i32_0 : i32, i32, i32
  }
  func.func @transform_1(%arg0: i32) -> (i32, i32, i32) {
    %c0_i32 = arith.constant 0 : i32
    %c0_i32_0 = arith.constant 0 : i32
    %c0_i32_1 = arith.constant 0 : i32
    %c0_i32_2 = arith.constant 0 : i32
    return %c0_i32, %c0_i32_0, %c0_i32_1 : i32, i32, i32
  }
  func.func @transform_2(%arg0: i32) -> (i32, i32, i32) {
    %c0_i32 = arith.constant 0 : i32
    %c0_i32_0 = arith.constant 0 : i32
    %c0_i32_1 = arith.constant 0 : i32
    %c0_i32_2 = arith.constant 0 : i32
    return %c0_i32, %c0_i32_0, %c0_i32_1 : i32, i32, i32
  }
  func.func @transform_3(%arg0: i32) -> (i32, i32, i32) {
    %c0_i32 = arith.constant 0 : i32
    %c0_i32_0 = arith.constant 0 : i32
    %c0_i32_1 = arith.constant 0 : i32
    %c0_i32_2 = arith.constant 0 : i32
    return %c0_i32, %c0_i32_0, %c0_i32_1 : i32, i32, i32
  }
  func.func @transform_4(%arg0: i32) -> (i32, i32, i32) {
    %c0_i32 = arith.constant 0 : i32
    %c0_i32_0 = arith.constant 0 : i32
    %c0_i32_1 = arith.constant 0 : i32
    %c0_i32_2 = arith.constant 0 : i32
    return %c0_i32, %c0_i32_0, %c0_i32_1 : i32, i32, i32
  }
  func.func @transform_5(%arg0: i32) -> (i32, i32, i32) {
    %c0_i32 = arith.constant 0 : i32
    %c0_i32_0 = arith.constant 0 : i32
    %c0_i32_1 = arith.constant 0 : i32
    %c0_i32_2 = arith.constant 0 : i32
    return %c0_i32, %c0_i32_0, %c0_i32_1 : i32, i32, i32
  }
  func.func @transform_6(%arg0: i32) -> (i32, i32, i32) {
    %c0_i32 = arith.constant 0 : i32
    %c0_i32_0 = arith.constant 0 : i32
    %c0_i32_1 = arith.constant 0 : i32
    %c0_i32_2 = arith.constant 0 : i32
    return %c0_i32, %c0_i32_0, %c0_i32_1 : i32, i32, i32
  }
  func.func @transform_7(%arg0: i32) -> (i32, i32, i32) {
    %c0_i32 = arith.constant 0 : i32
    %c0_i32_0 = arith.constant 0 : i32
    %c0_i32_1 = arith.constant 0 : i32
    %c0_i32_2 = arith.constant 0 : i32
    return %c0_i32, %c0_i32_0, %c0_i32_1 : i32, i32, i32
  }
  func.func @transform_8(%arg0: i32) -> (i32, i32, i32) {
    %c0_i32 = arith.constant 0 : i32
    %c0_i32_0 = arith.constant 0 : i32
    %c0_i32_1 = arith.constant 0 : i32
    %c0_i32_2 = arith.constant 0 : i32
    return %c0_i32, %c0_i32_0, %c0_i32_1 : i32, i32, i32
  }
  func.func @transform_9(%arg0: i32) -> (i32, i32, i32) {
    %c0_i32 = arith.constant 0 : i32
    %c0_i32_0 = arith.constant 0 : i32
    %c0_i32_1 = arith.constant 0 : i32
    %c0_i32_2 = arith.constant 0 : i32
    return %c0_i32, %c0_i32_0, %c0_i32_1 : i32, i32, i32
  }
  func.func @transform_10(%arg0: i32) -> (i32, i32, i32) {
    %c0_i32 = arith.constant 0 : i32
    %c0_i32_0 = arith.constant 0 : i32
    %c0_i32_1 = arith.constant 0 : i32
    %c0_i32_2 = arith.constant 0 : i32
    return %c0_i32, %c0_i32_0, %c0_i32_1 : i32, i32, i32
  }
  func.func @transform_11(%arg0: i32) -> (i32, i32, i32) {
    %c0_i32 = arith.constant 0 : i32
    %c0_i32_0 = arith.constant 0 : i32
    %c0_i32_1 = arith.constant 0 : i32
    %c0_i32_2 = arith.constant 0 : i32
    return %c0_i32, %c0_i32_0, %c0_i32_1 : i32, i32, i32
  }
  func.func @transform_12(%arg0: i32) -> (i32, i32, i32) {
    %c0_i32 = arith.constant 0 : i32
    %c0_i32_0 = arith.constant 0 : i32
    %c0_i32_1 = arith.constant 0 : i32
    %c0_i32_2 = arith.constant 0 : i32
    return %c0_i32, %c0_i32_0, %c0_i32_1 : i32, i32, i32
  }
  func.func @transform_13(%arg0: i32) -> (i32, i32, i32) {
    %c0_i32 = arith.constant 0 : i32
    %c0_i32_0 = arith.constant 0 : i32
    %c0_i32_1 = arith.constant 0 : i32
    %c0_i32_2 = arith.constant 0 : i32
    return %c0_i32, %c0_i32_0, %c0_i32_1 : i32, i32, i32
  }
  func.func @transform_14(%arg0: i32) -> (i32, i32) {
    %c0_i32 = arith.constant 0 : i32
    %c0_i32_0 = arith.constant 0 : i32
    %c0_i32_1 = arith.constant 0 : i32
    return %c0_i32, %c0_i32_0 : i32, i32
  }
  func.func @transform_15(%arg0: i32) -> (i32, i32) {
    %c0_i32 = arith.constant 0 : i32
    %c0_i32_0 = arith.constant 0 : i32
    %c0_i32_1 = arith.constant 0 : i32
    return %c0_i32, %c0_i32_0 : i32, i32
  }
  func.func @transform_16(%arg0: i32) -> (i32, i32) {
    %c0_i32 = arith.constant 0 : i32
    %c0_i32_0 = arith.constant 0 : i32
    %c0_i32_1 = arith.constant 0 : i32
    return %c0_i32, %c0_i32_0 : i32, i32
  }
  func.func @transform_17(%arg0: i32) -> (i32, i32) {
    %c0_i32 = arith.constant 0 : i32
    %c0_i32_0 = arith.constant 0 : i32
    %c0_i32_1 = arith.constant 0 : i32
    return %c0_i32, %c0_i32_0 : i32, i32
  }
  func.func @transform_18(%arg0: i32) -> (i32, i32) {
    %c0_i32 = arith.constant 0 : i32
    %c0_i32_0 = arith.constant 0 : i32
    %c0_i32_1 = arith.constant 0 : i32
    return %c0_i32, %c0_i32_0 : i32, i32
  }
  func.func @transform_19(%arg0: i32) -> (i32, i32) {
    %c0_i32 = arith.constant 0 : i32
    %c0_i32_0 = arith.constant 0 : i32
    %c0_i32_1 = arith.constant 0 : i32
    return %c0_i32, %c0_i32_0 : i32, i32
  }
  func.func @transform_20(%arg0: i32) -> (i32, i32) {
    %c0_i32 = arith.constant 0 : i32
    %c0_i32_0 = arith.constant 0 : i32
    %c0_i32_1 = arith.constant 0 : i32
    return %c0_i32, %c0_i32_0 : i32, i32
  }
  func.func @transform_21(%arg0: i32) -> (i32, i32) {
    %c0_i32 = arith.constant 0 : i32
    %c0_i32_0 = arith.constant 0 : i32
    %c0_i32_1 = arith.constant 0 : i32
    return %c0_i32, %c0_i32_0 : i32, i32
  }
  func.func @transform_22(%arg0: i32) -> (i32, i32, i32) {
    %c0_i32 = arith.constant 0 : i32
    %c0_i32_0 = arith.constant 0 : i32
    %c0_i32_1 = arith.constant 0 : i32
    return %arg0, %c0_i32, %c0_i32_0 : i32, i32, i32
  }
}

</mosaic_0001>

<bundles_post_ra>
// kernel: tpu_custom_call.1
= control target key start
LH: loop header
LB: loop body
LE: loop exit
PB: predicated region body
PF: predicated region fallthrough
CT: control target
= control target key end

     0   :  { %s4719_s0 = inlined_call_operand.hbm [shape: f32[2,8,32], index: 0, kind: input, shape index: {}]   ;;  %s4720_s1 = inlined_call_operand.hbm [shape: f32[3,8,32], index: 1, kind: input, shape index: {}]   ;;  %s4721_s2 = inlined_call_operand.hbm [shape: f32[3,1,32], index: 2, kind: input, shape index: {}]   ;;  %s4722_s3 = inlined_call_operand.hbm [shape: f32[3,1,32], index: 3, kind: input, shape index: {}]   ;;  %s4723_s4 = inlined_call_operand.hbm [shape: f32[3,1,32], index: 4, kind: input, shape index: {}]   ;;  %s4724_s5 = inlined_call_operand.hbm [shape: f32[3,1,32], index: 5, kind: input, shape index: {}]   ;;  %s4725_s6 = inlined_call_operand.hbm [shape: f32[3,32,96], index: 6, kind: input, shape index: {}]   ;;  %s4726_s7 = inlined_call_operand.hbm [shape: f32[3,1,96], index: 7, kind: input, shape index: {}]   ;;  %s4727_s8 = inlined_call_operand.hbm [shape: f32[3,32,32], index: 8, kind: input, shape index: {}]   ;;  %s4728_s9 = inlined_call_operand.hbm [shape: f32[3,1,32], index: 9, kind: input, shape index: {}]   ;;  %s4729_s10 = inlined_call_operand.hbm [shape: f32[3,32,64], index: 10, kind: input, shape index: {}]   ;;  %s4730_s11 = inlined_call_operand.hbm [shape: f32[3,1,64], index: 11, kind: input, shape index: {}]   ;;  %s4731_s12 = inlined_call_operand.hbm [shape: f32[3,64,96], index: 12, kind: input, shape index: {}]   ;;  %s4732_s13 = inlined_call_operand.hbm [shape: f32[3,1,32], index: 13, kind: input, shape index: {}]   ;;  %s4733_s14 = inlined_call_operand.vmem [shape: f32[8,8], index: 14, kind: input, shape index: {}]   ;;  %s4734_s15 = inlined_call_operand.hbm [shape: f32[8,8], index: 15, kind: input, shape index: {}]   ;;  %s4735_s16 = inlined_call_operand.vmem [shape: f32[4,8], index: 16, kind: input, shape index: {}]   ;;  %s4736_s17 = inlined_call_operand.vmem [shape: f32[4,8], index: 17, kind: input, shape index: {}]   ;;  %s4737_s18 = inlined_call_operand.hbm [shape: f32[4,8], index: 18, kind: input, shape index: {}]   ;;  %s4738_s19 = inlined_call_operand.vmem [shape: f32[2,4], index: 19, kind: input, shape index: {}]   ;;  %s4739_s20 = inlined_call_operand.hbm [shape: f32[2,4], index: 20, kind: input, shape index: {}]   ;;  %s4740_s21 = inlined_call_operand.vmem [shape: f32[2,4], index: 21, kind: input, shape index: {}]   ;;  %s4741_s22 = inlined_call_operand.hbm [shape: f32[2,2,32], index: 22, kind: output, shape index: {}]  }
   0x1   :  { %4761 = sst [smem:[#allocation41_spill]] %s4719_s0 }
   0x2   :  { %4762 = sst [smem:[#allocation42_spill]] %s4720_s1 }
   0x3   :  { %4763 = sst [smem:[#allocation43_spill]] %s4721_s2 }
   0x4   :  { %4764 = sst [smem:[#allocation44_spill]] %s4722_s3 }
   0x5   :  { %4765 = sst [smem:[#allocation45_spill]] %s4723_s4 }
   0x6   :  { %4766 = sst [smem:[#allocation46_spill]] %s4724_s5 }
   0x7   :  { %4767 = sst [smem:[#allocation47_spill]] %s4725_s6 }
   0x8   :  { %4768 = sst [smem:[#allocation48_spill]] %s4726_s7 }
   0x9   :  { %4769 = sst [smem:[#allocation49_spill]] %s4727_s8 }
   0xa   :  { %4770 = sst [smem:[#allocation50_spill]] %s4728_s9 }
   0xb   :  { %4771 = sst [smem:[#allocation51_spill]] %s4729_s10 }
   0xc   :  { %4772 = sst [smem:[#allocation52_spill]] %s4733_s14 }
   0xd   :  { %4773 = sst [smem:[#allocation53_spill]] %s4735_s16 }
   0xe   :  { %4774 = sst [smem:[#allocation54_spill]] %s4736_s17 }
   0xf   :  { %4775 = sst [smem:[#allocation55_spill]] %s4738_s19 }
  0x10   :  { %4776 = sst [smem:[#allocation56_spill]] %s4740_s21 }
  0x11   :  { %4777 = sst [smem:[#allocation57_spill]] %s4741_s22 }
  0x12   :  { %27 = vsyncpa [#allocation3], 0 }
  0x13   :  { %29 = vsyncpa [#allocation3 + $0x1], 0 }
  0x14   :  { %30 = vsyncpa [#allocation6], 0 }
  0x15   :  { %31 = vsyncpa [#allocation9], 0 }
  0x16   :  { %32 = vsyncpa [#allocation12], 0 }
  0x17   :  { %33 = vsyncpa [#allocation15], 0 }
  0x18   :  { %34 = vsyncpa [#allocation18], 0 }
  0x19   :  { %35 = vsyncpa [#allocation21], 0 }
  0x1a   :  { %36 = vsyncpa [#allocation24], 0 }
  0x1b   :  { %37 = vsyncpa [#allocation27], 0 }
  0x1c   :  { %38 = vsyncpa [#allocation4], 0 }
  0x1d   :  { %40 = vsyncpa [#allocation4 + $0x1], 0  ;;  %s4177_s3 = smov 0   ;;  %s4179_s28 = smov 0  }
  0x1e   :  { %s4181_s29 = smov 0   ;;  %s4183_s30 = smov 0  }
  0x1f LB: > { %s4778_s23 = sld [smem:[#allocation42_spill]]  ;;  %s4201_s5 = sadd.s32 4294967295, %s4025_s30   ;;  %s4025_s30 = sphi %s4183_s30, %s4819_s30   ;;  %s4021_s29 = sphi %s4181_s29, %s4818_s29   ;;  %s4017_s28 = sphi %s4179_s28, %s4817_s28   ;;  %s4013_s3 = sphi %s4177_s3, %s4816_s3  }
  0x20   : > { %p2987_p0 = scmp.ge.s32.totalorder %s4025_s30, 1  ;;  %p67_p1 = scmp.eq.s32.totalorder %s4201_s5, 0 }
  0x21   : > { %p544_p2 = scmp.lt.s32.totalorder %s4025_s30, 3  ;;  %s4027_s6 = smov [#allocation5]  }
  0x22   : > { %s557_s25 = sshll.u32 %s4027_s6, 4  ;;  %s4782_s4 = sld [smem:[#allocation44_spill]]  ;;  %s558_s25 = int_to_ptr.vmem [resolvable:$true] %s557_s25 }
  0x23   : > { %p4206_p3 = pnand %p2987_p0, %p544_p2  ;;  %s4747_s22 = smov 8  }
  0x24   : > { %s4030_s6 = smov [#allocation8]   ;;  %s4783_s16 = sld [smem:[#allocation46_spill]] }
  0x25   : > { %s555_s1 = sshll.u32 %s4778_s23, 4  ;;  %p3161_p4 = pneg %p4206_p3  ;;  %s556_s1 = int_to_ptr.hbm [resolvable:$true] %s555_s1 }
  0x26   : > { %s4779_s24 = scalar_select %p4206_p3, 1, 0 }
  0x27   : > { %p4215_p6 = pnand %p3161_p4, %p67_p1  ;;  %s4745_s23 = smov 128  }
  0x28   : > { %4780 = sst [smem:[#allocation40_spill]] %s4779_s24  ;;  %s583_s0 = sshll.u32 %s4782_s4, 4  ;;  %s584_s0 = int_to_ptr.hbm [resolvable:$true] %s583_s0 }
  0x29   : > { %3164 = dma.hbm_to_vmem [thread:$0]  (!%p4215_p6), %s556_s1, 384, %s558_s25, [#allocation6], %s4745_s23, %s4745_s23, %s4747_s22  }
  0x2a   : > { %s585_s21 = sshll.u32 %s4030_s6, 4  ;;  %s611_s14 = sshll.u32 %s4783_s16, 4  ;;  %s586_s21 = int_to_ptr.vmem [resolvable:$true] %s585_s21  ;;  %s612_s14 = int_to_ptr.hbm [resolvable:$true] %s611_s14 }
  0x2b   : > { %s4031_s2 = smov 16   ;;  %s4032_s27 = smov 1  }
  0x2c   : > { %3170 = dma.hbm_to_vmem [thread:$0]  (!%p4215_p6), %s584_s0, 48, %s586_s21, [#allocation9], %s4031_s2, %s4031_s2, %s4032_s27  }
  0x2d   : > { %s4784_s7 = sld [smem:[#allocation48_spill]]  ;;  %s4033_s25 = smov [#allocation11]  }
  0x2e   : > { %s613_s6 = sshll.u32 %s4033_s25, 4  ;;  %s4034_s16 = smov [#allocation14]   ;;  %s614_s6 = int_to_ptr.vmem [resolvable:$true] %s613_s6 }
  0x2f   : > { %3176 = dma.hbm_to_vmem [thread:$0]  (!%p4215_p6), %s612_s14, 48, %s614_s6, [#allocation12], %s4031_s2, %s4031_s2, %s4032_s27  }
  0x30   : > { %s641_s17 = sshll.u32 %s4034_s16, 4  ;;  %s4785_s9 = sld [smem:[#allocation50_spill]]  ;;  %s642_s17 = int_to_ptr.vmem [resolvable:$true] %s641_s17 }
  0x31   : > { %s695_s4 = sshll.u32 %s4730_s11, 4  ;;  %s4035_s25 = smov [#allocation17]   ;;  %s696_s4 = int_to_ptr.hbm [resolvable:$true] %s695_s4 }
  0x32   : > { %s669_s14 = sshll.u32 %s4035_s25, 4  ;;  %s4036_s23 = smov [#allocation20]   ;;  %s670_s14 = int_to_ptr.vmem [resolvable:$true] %s669_s14 }
  0x33   : > { %s639_s1 = sshll.u32 %s4784_s7, 4  ;;  %s697_s6 = sshll.u32 %s4036_s23, 4  ;;  %s640_s1 = int_to_ptr.hbm [resolvable:$true] %s639_s1  ;;  %s698_s6 = int_to_ptr.vmem [resolvable:$true] %s697_s6 }
  0x34   : > { %3182 = dma.hbm_to_vmem [thread:$0]  (!%p4215_p6), %s640_s1, 48, %s642_s17, [#allocation15], %s4031_s2, %s4031_s2, %s4032_s27  }
  0x35   : > { %s723_s1 = sshll.u32 %s4732_s13, 4  ;;  %s759_s0 = sshll.u32 %s4737_s18, 4  ;;  %s724_s1 = int_to_ptr.hbm [resolvable:$true] %s723_s1  ;;  %s760_s0 = int_to_ptr.hbm [resolvable:$true] %s759_s0 }
  0x36   : > { %s667_s21 = sshll.u32 %s4785_s9, 4  ;;  %s4037_s25 = smov [#allocation23]   ;;  %s668_s21 = int_to_ptr.hbm [resolvable:$true] %s667_s21 }
  0x37   : > { %3188 = dma.hbm_to_vmem [thread:$0]  (!%p4215_p6), %s668_s21, 48, %s670_s14, [#allocation18], %s4031_s2, %s4031_s2, %s4032_s27  }
  0x38   : > { %3194 = dma.hbm_to_vmem [thread:$0]  (!%p4215_p6), %s696_s4, 48, %s698_s6, [#allocation21], %s4031_s2, %s4031_s2, %s4032_s27  }
  0x39   : > { %s725_s21 = sshll.u32 %s4037_s25, 4  ;;  %s4038_s14 = smov [#allocation26]   ;;  %s726_s21 = int_to_ptr.vmem [resolvable:$true] %s725_s21 }
  0x3a   : > { %3200 = dma.hbm_to_vmem [thread:$0]  (!%p4215_p6), %s724_s1, 48, %s726_s21, [#allocation24], %s4031_s2, %s4031_s2, %s4032_s27  }
  0x3b   : > { %s761_s23 = sshll.u32 %s4038_s14, 4  ;;  %s4786_s22 = sld [smem:[#allocation43_spill]]  ;;  %s762_s23 = int_to_ptr.vmem [resolvable:$true] %s761_s23 }
  0x3c   : > { %3206 = dma.hbm_to_vmem [thread:$0]  (!%p4215_p6), %s760_s0, 64, %s762_s23, [#allocation27]  }
  0x3d   : > { %s4787_s24 = sld [smem:[#allocation45_spill]]  ;;  %s4039_s7 = smov [#allocation7]  }
  0x3e   : > { %s571_s9 = sshll.u32 %s4039_s7, 4  ;;  %s4040_s1 = smov [#allocation10]   ;;  %s572_s9 = int_to_ptr.vmem [resolvable:$true] %s571_s9 }
  0x3f   : > { %s4788_s16 = sld [smem:[#allocation47_spill]]  ;;  %s4041_s6 = smov [#allocation13]  }
  0x40   : > { %s4789_s8 = sld [smem:[#allocation49_spill]]  ;;  %s4791_s17 = smov 128  }
  0x41   : > { %s569_s4 = sshll.u32 %s4786_s22, 4  ;;  %s599_s22 = sshll.u32 %s4040_s1, 4  ;;  %s570_s4 = int_to_ptr.hbm [resolvable:$true] %s569_s4  ;;  %s600_s22 = int_to_ptr.vmem [resolvable:$true] %s599_s22 }
  0x42   : > { %3167 = dma.hbm_to_vmem [thread:$0]  (!%p4215_p6), %s570_s4, 48, %s572_s9, [#allocation6], %s4031_s2, %s4031_s2, %s4032_s27  }
  0x43   : > { %s597_s25 = sshll.u32 %s4787_s24, 4  ;;  %s627_s9 = sshll.u32 %s4041_s6, 4  ;;  %s598_s25 = int_to_ptr.hbm [resolvable:$true] %s597_s25  ;;  %s628_s9 = int_to_ptr.vmem [resolvable:$true] %s627_s9 }
  0x44   : > { %3173 = dma.hbm_to_vmem [thread:$0]  (!%p4215_p6), %s598_s25, 48, %s600_s22, [#allocation9], %s4031_s2, %s4031_s2, %s4032_s27  }
  0x45   : > { %s625_s0 = sshll.u32 %s4788_s16, 4  ;;  %s4790_s4 = smov 8   ;;  %s626_s0 = int_to_ptr.hbm [resolvable:$true] %s625_s0 }
  0x46   : > { %s653_s19 = sshll.u32 %s4789_s8, 4  ;;  %s4042_s24 = smov [#allocation16]   ;;  %s654_s19 = int_to_ptr.hbm [resolvable:$true] %s653_s19 }
  0x47   : > { %3179 = dma.hbm_to_vmem [thread:$0]  (!%p4215_p6), %s626_s0, 1536, %s628_s9, [#allocation12], %s4791_s17, %s4791_s17, %s4790_s4  }
  0x48   : > { %s655_s1 = sshll.u32 %s4042_s24, 4  ;;  %s4792_s10 = sld [smem:[#allocation51_spill]]  ;;  %s656_s1 = int_to_ptr.vmem [resolvable:$true] %s655_s1 }
  0x49   : > { %3185 = dma.hbm_to_vmem [thread:$0]  (!%p4215_p6), %s654_s19, 1536, %s656_s1, [#allocation15], %s4791_s17, %s4791_s17, %s4790_s4  }
  0x4a   : > { %s709_s22 = sshll.u32 %s4731_s12, 4  ;;  %s4043_s16 = smov [#allocation19]   ;;  %s710_s22 = int_to_ptr.hbm [resolvable:$true] %s709_s22 }
  0x4b   : > { %s683_s0 = sshll.u32 %s4043_s16, 4  ;;  %s4044_s7 = smov [#allocation22]   ;;  %s684_s0 = int_to_ptr.vmem [resolvable:$true] %s683_s0 }
  0x4c   : > { %s711_s23 = sshll.u32 %s4044_s7, 4  ;;  %s741_s9 = sshll.u32 %s4734_s15, 4  ;;  %s712_s23 = int_to_ptr.vmem [resolvable:$true] %s711_s23  ;;  %s742_s9 = int_to_ptr.hbm [resolvable:$true] %s741_s9 }
  0x4d   : > { %3197 = dma.hbm_to_vmem [thread:$0]  (!%p4215_p6), %s710_s22, 3072, %s712_s23, [#allocation21], %s4791_s17, %s4791_s17, %s4790_s4  }
  0x4e   : > { %s681_s2 = sshll.u32 %s4792_s10, 4  ;;  %s774_s21 = sshll.u32 %s4739_s20, 4  ;;  %s682_s2 = int_to_ptr.hbm [resolvable:$true] %s681_s2  ;;  %s775_s21 = int_to_ptr.hbm [resolvable:$true] %s774_s21 }
  0x4f   : > { %3191 = dma.hbm_to_vmem [thread:$0]  (!%p4215_p6), %s682_s2, 1536, %s684_s0, [#allocation18], %s4791_s17, %s4791_s17, %s4790_s4  }
  0x50   : > { %s4045_s14 = smov [#allocation25]   ;;  %s4046_s27 = smov [#allocation28]  }
  0x51   : > { %s743_s2 = sshll.u32 %s4045_s14, 4  ;;  %s776_s4 = sshll.u32 %s4046_s27, 4  ;;  %s744_s2 = int_to_ptr.vmem [resolvable:$true] %s743_s2  ;;  %s777_s4 = int_to_ptr.vmem [resolvable:$true] %s776_s4 }
  0x52   : > { %3203 = dma.hbm_to_vmem [thread:$0]  (!%p4215_p6), %s742_s9, 128, %s744_s2, [#allocation24]  }
  0x53   : > { %3209 = dma.hbm_to_vmem [thread:$0]  (!%p4215_p6), %s775_s21, 32, %s777_s4, [#allocation27]  }
  0x54   : > { %s2986_s17 = sadd.s32 4294967294, %s4025_s30   ;;  %s4337_s25 = sadd.s32 1, %s4025_s30  }
  0x55   : > { %s50_s22 = ssub.s32 %s4025_s30, %s4337_s25  ;;  %s53_s16 = sadd.s32 1, %s4021_s29 }
  0x56   : > { %p51_p7 = scmp.eq.s32.totalorder %s50_s22, 0  ;;  %p60_p8 = scmp.ne.s32.totalorder %s4021_s29, %s4017_s28 }
  0x57   : > { %p61_p9 = scmp.eq.s32.totalorder %s4025_s30, 0  ;;  %p66_p10 = scmp.ne.s32.totalorder %s4017_s28, %s4013_s3 }
  0x58   : > { %s4348_s0 = scalar_select %p51_p7, %s4021_s29, %s53_s16  }
  0x59   : > { %p4350_p11 = por %p61_p9, %p60_p8  ;;  %p4356_p12 = por %p67_p1, %p66_p10 }
  0x5a   : > { %p531_p13 = scmp.eq.s32.totalorder %s4201_s5, 1  ;;  %p537_p0 = scmp.eq.s32.totalorder %s2986_s17, 1 }
  0x5b   : > { %p3234_p2 = scmp.lt.s32.totalorder %s4025_s30, 2  ;;  %s790_s23 = sand.u32 1, %s4021_s29  }
  0x5c   : > { %p4363_p4 = por %p531_p13, %p60_p8  ;;  %p4367_p6 = por %p537_p0, %p66_p10 }
  0x5d   : > { %s3005_s9 = sshll.u32 %s790_s23, 3  ;;  %s3006_s24 = sshll.u32 %s4025_s30, 3 }
  0x5e   : > { %s4797_s14 = sld [smem:[#allocation41_spill]]  ;;  %s794_s27 = scalar_lea.vmem [#allocation2], %s3005_s9 }
  0x5f   : > { %s802_s4 = sshll.u32 %s794_s27, 4  ;;  %p4377_p7 = pnand %p3234_p2, %p4350_p11  ;;  %s803_s4 = int_to_ptr.vmem [resolvable:$true] %s802_s4 }
  0x60   : > { %s791_s16 = scalar_lea.sflag [#allocation3], %s790_s23 }
  0x61   : > { %p3901_p9 = pneg %p4377_p7 }
  0x64   : > { %s798_s2 = scalar_lea.hbm %s4797_s14, %s3006_s24  ;;  %s3904_s1 = scalar_lea.hbm %s4797_s14, 16 }
  0x65   : > { %s800_s22 = sshll.u32 %s798_s2, 4  ;;  %s801_s22 = int_to_ptr.hbm [resolvable:$true] %s800_s22 }
  0x66   : > { %s3897_s8 = sshra.s32 %s801_s22, 4  ;;  %s3898_s8 = int_to_ptr.hbm [resolvable:$true] %s3897_s8 }
  0x67   : > { %s3899_s10 = scalar_lea.hbm %s3898_s8, 8  ;;  %p3905_p11 = scmp.lt.s32.totalorder %s3898_s8, %s4797_s14 }
  0x68   : > { %p3900_p8 = scmp.ne.s32.totalorder %s3898_s8, %s3899_s10  ;;  %p3906_p0 = scmp.lt.s32.totalorder %s3904_s1, %s3899_s10 }
  0x6a   : > { %p3902_p10 = pnand %p3901_p9, %p3900_p8  ;;  %p3907_p2 = por %p3906_p0, %p3905_p11 }
  0x6c   : > { %p3903_p13 = pneg %p3902_p10 }
  0x6e   : > { %p3908_p5 = pnand %p3907_p2, %p3903_p13 }
  0x70   : > { %3911 = shalt.err (!%p3908_p5)
}
  0x71   : > { %3213 = dma.hbm_to_vmem [thread:$0]  (!%p4377_p7), %s801_s22, 128, %s803_s4, %s791_s16  }
  0x72   : > { %811 = sbr.rel (%p4206_p3) target bundleno = 6464 (0x1940), region = 108  ;;  %s4394_s2 = sand.u32 (!%p4206_p3), 1, %s4017_s28  }
  0x73   : > { %s3008_s27 = sshll.u32 (!%p4206_p3), %s4394_s2, 3  ;;  %s814_s9 = scalar_lea.sflag (!%p4206_p3), [#allocation3], %s4394_s2 }
  0x74   : > { %s817_s24 = scalar_lea.vmem (!%p4206_p3), [#allocation2], %s3008_s27 }
  0x77   : > { %3972 = dma.done.wait (%p4356_p12), %s814_s9, 128  }
  0x78   : > { %3974 = vsyncadd (%p4356_p12), %s814_s9, 4294967168 }
  0x79   : > { %3976 = dma.done.wait (%p67_p1), [#allocation6], 432  }
  0x7a   : > { %3978 = vsyncadd (%p67_p1), [#allocation6], 4294966864 }
  0x7b   : > { %3980 = dma.done.wait (%p67_p1), [#allocation9], 96  }
  0x7c   : > { %3982 = vsyncadd (%p67_p1), [#allocation9], 4294967200 }
  0x7d   : > { %3984 = dma.done.wait (%p67_p1), [#allocation12], 1584  }
  0x7e   : > { %3986 = vsyncadd (%p67_p1), [#allocation12], 4294965712 }
  0x7f   : > { %3988 = dma.done.wait (%p67_p1), [#allocation15], 1584  }
  0x80   : > { %3990 = vsyncadd (%p67_p1), [#allocation15], 4294965712 }
  0x81   : > { %3992 = dma.done.wait (%p67_p1), [#allocation18], 1584  }
  0x82   : > { %3994 = vsyncadd (%p67_p1), [#allocation18], 4294965712 }
  0x83   : > { %3996 = dma.done.wait (%p67_p1), [#allocation21], 3120  }
  0x84   : > { %3998 = vsyncadd (%p67_p1), [#allocation21], 4294964176 }
  0x85   : > { %4000 = dma.done.wait (%p67_p1), [#allocation24], 176  }
  0x86   : > { %4002 = vsyncadd (%p67_p1), [#allocation24], 4294967120 }
  0x87   : > { %4004 = dma.done.wait (%p67_p1), [#allocation27], 96  }
  0x88   : > { %4006 = vsyncadd (%p67_p1), [#allocation27], 4294967200  ;;  %v959_v0 = vld [vmem:[%s817_s24] sm:$0xff]  ;;  %v960_v1 = vld [vmem:[#allocation5] sm:$0xff]  ;;  %vm964_vm0 = vcmask 261120   ;;  %v4047_v4 = vmov 32.0  }
  0x89   : > { %v4434_v2 = vadd.f32 %v960_v1, %v959_v0  ;;  %3343 = vrcp.f32 %v4047_v4  ;;  %v1021_v16 = vld [vmem:[#allocation13 + $0x18] sm:$0xff]  ;;  %v1020_v17 = vld [vmem:[#allocation13 + $0x10] sm:$0xff]  ;;  %v1019_v18 = vld [vmem:[#allocation13 + $0x8] sm:$0xff]  ;;  %s4760_s8 = smov 72   ;;  %s4049_s10 = smov 120   ;;  %vm1052_vm8 = vcmask 64512  }
  0x8a   : > { %1041 = vmatpush.msra.mxu0 %v1021_v16  ;;  %v1018_v19 = vld [vmem:[#allocation13] sm:$0xff]  ;;  %v3319_v37 = vld [vmem:[#allocation7] ss:$0 sm:$0xff]  ;;  %v3320_v44 = vld [vmem:[#allocation8] ss:$0 sm:$0xff]  ;;  %s4050_s26 = smov 96  }
  0x8b   : > { %v965_v3 = vsel %vm964_vm0, %v4434_v2, 0.0  ;;  %v3321_v48 = vld [vmem:[#allocation14] ss:$0 sm:$0xff]  ;;  %s4051_s4 = smov 80   ;;  %s4052_s22 = smov 88   ;;  %vm1322_vm9 = vcmask 130048  }
  0x8c   : > { %966 = vadd.xlane.f32.xlu0 %v965_v3  ;;  %1042 = vmatpush.msra.mxu0 %v1020_v17  ;;  %s4758_s17 = smov 104   ;;  %s4759_s16 = smov 112   ;;  %vm1324_vm10 = vcmask 195584  }
  0x8d   : > { %s4055_s1 = smov 64   ;;  %s4757_s21 = smov 40  }
  0x8e   : > { %1043 = vmatpush.msra.mxu0 %v1019_v18  ;;  %s4756_s7 = smov 56   ;;  %s4755_s23 = smov 48  }
  0x8f   : > { %v3344_v5 = vpop.eup %3343  ;;  %s4753_s27 = smov 16   ;;  %s4751_s9 = smov 8  }
  0x90   : > { %v969_v6 = vmul.f32 32.0, %v3344_v5  ;;  %vm973_vm1 = vweird.f32 %v3344_v5  ;;  %1044 = vmatpush.msra.mxu0 %v1018_v19  ;;  %s4749_s24 = smov 24  }
  0x92   : > { %v970_v7 = vsub.f32 1.0, %v969_v6 }
  0x94   : > { %v971_v8 = vmul.f32 %v3344_v5, %v970_v7 }
  0x96   : > { %v972_v9 = vadd.f32 %v3344_v5, %v971_v8 }
  0x98   : > { %v4438_v10 = vsel %vm973_vm1, %v3344_v5, %v972_v9 }
  0xff   : > { %v967_v11 = vpop.xlane.xlu0 %966 }
 0x100   : > { %v975_v12 = vmul.f32 %v4438_v10, %v967_v11 }
 0x102   : > { %v976_v13 = vsub.f32 %v4434_v2, %v975_v12 }
 0x104   : > { %v977_v14 = vmul.f32 %v976_v13, %v976_v13  ;;  %v997_v42 = vmul.f32 %v3319_v37, %v976_v13 }
 0x106   : > { %v978_v15 = vsel %vm964_vm0, %v977_v14, 0.0 }
 0x107   : > { %979 = vadd.xlane.f32.xlu0 %v978_v15 }
 0x17a   : > { %v980_v20 = vpop.xlane.xlu0 %979 }
 0x17b   : > { %v981_v21 = vmul.f32 0.032258064, %v980_v20 }
 0x17d   : > { %3345 = vrsqrt.f32 %v981_v21  ;;  %vm989_vm2 = vcmp.eq.f32.partialorder %v981_v21, inf  ;;  %v992_v29 = vand.u32 2147483648, %v981_v21  ;;  %vm991_vm3 = vcmp.eq.f32.partialorder %v981_v21, 0.0 }
 0x183   : > { %v3346_v22 = vpop.eup %3345 }
 0x184   : > { %v983_v23 = vmul.f32 %v3346_v22, %v981_v21 }
 0x186   : > { %v984_v24 = vmul.f32 %v3346_v22, %v983_v23 }
 0x188   : > { %v985_v25 = vmul.f32 0.5, %v984_v24 }
 0x18a   : > { %v986_v26 = vsub.f32 1.5, %v985_v25 }
 0x18c   : > { %v987_v27 = vmul.f32 %v3346_v22, %v986_v26 }
 0x18e   : > { %v988_v28 = vmul.f32 %v987_v27, %v981_v21 }
 0x190   : > { %v990_v30 = vsel %vm989_vm2, %v981_v21, %v988_v28  ;;  %vm1447_vm2 = vcmask 523264  }
 0x191   : > { %v993_v31 = vsel %vm991_vm3, %v992_v29, %v990_v30 }
 0x192   : > { %v998_v32 = vadd.f32 1e-06, %v993_v31 }
 0x194   : > { %3347 = vrcp.f32 %v998_v32  ;;  %v1010_v36 = vand.u32 2147483648, %v998_v32  ;;  %v1008_v39 = vand.u32 2147483647, %v998_v32  ;;  %vm1004_vm5 = vweird.f32 %v998_v32 }
 0x196   : > { %v1011_v41 = vor.u32 1.1754944e-38, %v1010_v36  ;;  %vm1009_vm7 = vcmp.eq.f32.partialorder %v1008_v39, 8.507059e+37 }
 0x19a   : > { %v3348_v33 = vpop.eup %3347 }
 0x19b   : > { %v1000_v34 = vmul.f32 %v3348_v33, %v998_v32  ;;  %vm1005_vm4 = vweird.f32 %v3348_v33 }
 0x19c   : > { %vm1006_vm6 = vmor %vm1004_vm5, %vm1005_vm4 }
 0x19d   : > { %v1001_v35 = vsub.f32 1.0, %v1000_v34 }
 0x19f   : > { %v1002_v38 = vmul.f32 %v3348_v33, %v1001_v35 }
 0x1a1   : > { %v1003_v40 = vadd.f32 %v3348_v33, %v1002_v38 }
 0x1a3   : > { %v1007_v43 = vsel %vm1006_vm6, %v3348_v33, %v1003_v40 }
 0x1a4   : > { %v1012_v45 = vsel %vm1009_vm7, %v1011_v41, %v1007_v43 }
 0x1a5   : > { %v1013_v46 = vmul.f32 %v1012_v45, %v997_v42  ;;  %v1328_v45 = vld [vmem:[#allocation16 + $0x10] sm:$0xff] }
 0x1a7   : > { %v1017_v47 = vadd.f32 %v3320_v44, %v1013_v46  ;;  %v1329_v44 = vld [vmem:[#allocation16 + $0x18] sm:$0xff]  ;;  %v1327_v46 = vld [vmem:[#allocation16 + $0x8] sm:$0xff] }
 0x1a9   : > { %3026 = vmatmul.msk.f32.vlgmr.msra.gmra.mxu0 %vm964_vm0, %v1017_v47  ;;  %v1326_v47 = vld [vmem:[#allocation16] sm:$0xff] }
 0x226   : > { %v1046_v49 = vpop.f32.mrf.mxu0 }
 0x227   : > { %v4444_v50 = vadd.f32 %v3321_v48, %v1046_v49 }
 0x229   : > { %1246 = vrot.lane.b32.xlu0 %v4444_v50, %s4760_s8  ;;  %1114 = vrot.lane.b32.xlu2 %v4444_v50, %s4049_s10 }
 0x22a   : > { %1050 = vrot.lane.b32.xlu1 %v4444_v50, %s4050_s26 }
 0x231   : > { %1181 = vrot.lane.b32.xlu2 %v4444_v50, %s4051_s4 }
 0x232   : > { %1116 = vrot.lane.b32.xlu1 %v4444_v50, %s4052_s22 }
 0x239   : > { %1244 = vrot.lane.b32.xlu2 %v4444_v50, %s4758_s17 }
 0x23a   : > { %1179 = vrot.lane.b32.xlu1 %v4444_v50, %s4759_s16 }
 0x283   : > { %v1115_v51 = vpop.permute.xlu2 %1114 }
 0x28b   : > { %v1182_v52 = vpop.permute.xlu2 %1181 }
 0x293   : > { %v1245_v55 = vpop.permute.xlu2 %1244 }
 0x29b   : > { %v1247_v53 = vpop.permute.xlu0 %1246 }
 0x29c   : > { %v1051_v54 = vpop.permute.xlu1 %1050  ;;  %3036 = vmatpush.xpose.msk.msrb.mxu0 %vm1052_vm8, %v1247_v53 }
 0x29d   : > { %3027 = vmatpush.xpose.msk.msra.mxu1 %vm1052_vm8, %v1051_v54  ;;  %v3322_v54 = vld [vmem:[#allocation17] ss:$0 sm:$0xff] }
 0x29f   : > { %3037 = vmatmul.msk.f32.vlgmr.msrb.gmra.mxu0 %vm1052_vm8, %v1245_v55 }
 0x2a0   : > { %3028 = vmatmul.msk.f32.vlgmr.msra.gmra.mxu1 %vm1052_vm8, %v4444_v50 }
 0x2a1   : > { %3033 = vmatpush.xpose.msk.msrb.mxu1 %vm1052_vm8, %v1182_v52 }
 0x2a4   : > { %v1117_v56 = vpop.permute.xlu1 %1116 }
 0x2a5   : > { %3030 = vmatpush.xpose.msk.msra.mxu3 %vm1052_vm8, %v1117_v56  ;;  %1345 = vmatpush.msra.mxu1 %v1329_v44 }
 0x2a7   : > { %1346 = vmatpush.msra.mxu1 %v1328_v45 }
 0x2a8   : > { %3031 = vmatmul.msk.f32.vlgmr.msra.gmra.mxu3 %vm1052_vm8, %v1115_v51 }
 0x2a9   : > { %1347 = vmatpush.msra.mxu1 %v1327_v46 }
 0x2ab   : > { %1348 = vmatpush.msra.mxu1 %v1326_v47  ;;  %v1472_v47 = vld [vmem:[#allocation25] sm:$0xff] }
 0x2ac   : > { %v1180_v57 = vpop.permute.xlu1 %1179 }
 0x2ad   : > { %3034 = vmatmul.msk.f32.vlgmr.msrb.gmra.mxu1 %vm1052_vm8, %v1180_v57 }
 0x31c   : > { %v1269_v0 = vpop.f32.mrf.mxu0 }
 0x31d   : > { %v1074_v58 = vpop.f32.mrf.mxu1  ;;  %v1272_v1 = vsel %vm1052_vm8, %v1269_v0, -inf }
 0x31e   : > { %v1077_v59 = vsel %vm1052_vm8, %v1074_v58, -inf }
 0x31f   : > { %1078 = vmax.xlane.f32.xlu1 %v1077_v59 }
 0x32a   : > { %v1204_v60 = vpop.f32.mrf.mxu1 }
 0x32b   : > { %v1139_v61 = vpop.f32.mrf.mxu3  ;;  %v1207_v62 = vsel %vm1052_vm8, %v1204_v60, -inf }
 0x32c   : > { %1208 = vmax.xlane.f32.xlu0 %v1207_v62  ;;  %v1142_v63 = vsel %vm1052_vm8, %v1139_v61, -inf }
 0x32d   : > { %1143 = vmax.xlane.f32.xlu2 %v1142_v63 }
 0x335   : > { %1273 = vmax.xlane.f32.xlu2 %v1272_v1  ;;  %v1409_v1 = vld [vmem:[#allocation19 + $0x10] sm:$0xff] }
 0x338   : > { %1088 = vrot.lane.b32.xlu1 %v4444_v50, %s4055_s1 }
 0x392   : > { %v1079_v3 = vpop.xlane.xlu1 %1078 }
 0x393   : > { %v1080_v4 = vsub.f32 %v1074_v58, %v1079_v3  ;;  %v1408_v3 = vld [vmem:[#allocation19 + $0x8] sm:$0xff] }
 0x395   : > { %v1081_v5 = vmul.f32 1.442695, %v1080_v4 }
 0x397   : > { %3349 = vpow2.f32 %v1081_v5 }
 0x39d   : > { %v3350_v6 = vpop.eup %3349 }
 0x39e   : > { %v1083_v7 = vsel %vm1052_vm8, %v3350_v6, 0.0 }
 0x39f   : > { %v1209_v8 = vpop.xlane.xlu0 %1208  ;;  %1084 = vadd.xlane.f32.xlu1 %v1083_v7 }
 0x3a0   : > { %v1210_v9 = vsub.f32 %v1204_v60, %v1209_v8  ;;  %v1144_v11 = vpop.xlane.xlu2 %1143 }
 0x3a1   : > { %v1145_v17 = vsub.f32 %v1139_v61, %v1144_v11  ;;  %v1446_v11 = vld [vmem:[#allocation22 + $0x38] sm:$0xff] }
 0x3a2   : > { %v1211_v12 = vmul.f32 1.442695, %v1210_v9  ;;  %1459 = vmatpush.msra.mxu0 %v1446_v11 }
 0x3a3   : > { %v1146_v20 = vmul.f32 1.442695, %v1145_v17 }
 0x3a4   : > { %3351 = vpow2.f32 %v1211_v12  ;;  %v1445_v12 = vld [vmem:[#allocation22 + $0x30] sm:$0xff] }
 0x3a5   : > { %1460 = vmatpush.msra.mxu0 %v1445_v12 }
 0x3a8   : > { %v1274_v13 = vpop.xlane.xlu2 %1273 }
 0x3a9   : > { %v1275_v14 = vsub.f32 %v1269_v0, %v1274_v13  ;;  %v1410_v0 = vld [vmem:[#allocation19 + $0x18] sm:$0xff] }
 0x3aa   : > { %v3352_v15 = vpop.eup %3351  ;;  %v1089_v16 = vpop.permute.xlu1 %1088 }
 0x3ab   : > { %v1276_v18 = vmul.f32 1.442695, %v1275_v14  ;;  %1109 = vmatpush.msra.mxu2 %v1089_v16  ;;  %v1213_v19 = vsel %vm1052_vm8, %v3352_v15, 0.0  ;;  %v1444_v14 = vld [vmem:[#allocation22 + $0x28] sm:$0xff]  ;;  %v1443_v16 = vld [vmem:[#allocation22 + $0x20] sm:$0xff] }
 0x3ac   : > { %1214 = vadd.xlane.f32.xlu0 %v1213_v19  ;;  %1461 = vmatpush.msra.mxu0 %v1444_v14  ;;  %v1442_v19 = vld [vmem:[#allocation22 + $0x18] sm:$0xff] }
 0x3ad   : > { %3353 = vpow2.f32 %v1276_v18 }
 0x3ae   : > { %3355 = vpow2.f32 %v1146_v20  ;;  %1462 = vmatpush.msra.mxu0 %v1443_v16 }
 0x3b0   : > { %1463 = vmatpush.msra.mxu0 %v1442_v19 }
 0x3b3   : > { %v3354_v21 = vpop.eup %3353 }
 0x3b4   : > { %v1278_v22 = vsel %vm1052_vm8, %v3354_v21, 0.0  ;;  %v3356_v23 = vpop.eup %3355 }
 0x3b5   : > { %1279 = vadd.xlane.f32.xlu2 %v1278_v22  ;;  %v1148_v24 = vsel %vm1052_vm8, %v3356_v23, 0.0 }
 0x3b8   : > { %1283 = vrot.lane.b32.xlu1 %v4444_v50, %s4757_s21 }
 0x3bd   : > { %1149 = vadd.xlane.f32.xlu2 %v1148_v24 }
 0x3c0   : > { %1153 = vrot.lane.b32.xlu0 %v4444_v50, %s4756_s7 }
 0x3d5   : > { %1218 = vrot.lane.b32.xlu2 %v4444_v50, %s4755_s23 }
 0x412   : > { %v1085_v25 = vpop.xlane.xlu1 %1084 }
 0x413   : > { %3357 = vrcp.f32 %v1085_v25 }
 0x419   : > { %v3358_v26 = vpop.eup %3357 }
 0x41a   : > { %v1087_v27 = vmul.f32 %v3358_v26, %v3350_v6 }
 0x41c   : > { %3029 = vmatmul.msk.f32.vlgmr.msra.gmra.mxu2 %vm1052_vm8, %v1087_v27  ;;  %v3323_v27 = vld [vmem:[#allocation10] ss:$0 sm:$0xff] }
 0x41f   : > { %v1215_v29 = vpop.xlane.xlu0 %1214 }
 0x420   : > { %3359 = vrcp.f32 %v1215_v29 }
 0x426   : > { %v3360_v33 = vpop.eup %3359 }
 0x427   : > { %v1217_v37 = vmul.f32 %v3360_v33, %v3352_v15 }
 0x428   : > { %v1280_v28 = vpop.xlane.xlu2 %1279 }
 0x42a   : > { %v1284_v32 = vpop.permute.xlu1 %1283 }
 0x430   : > { %v1150_v30 = vpop.xlane.xlu2 %1149 }
 0x431   : > { %3361 = vrcp.f32 %v1150_v30 }
 0x432   : > { %v1154_v31 = vpop.permute.xlu0 %1153  ;;  %3363 = vrcp.f32 %v1280_v28 }
 0x433   : > { %1174 = vmatpush.msrb.mxu2 %v1154_v31 }
 0x435   : > { %1304 = vmatpush.msra.mxu2 %v1284_v32 }
 0x437   : > { %v3362_v34 = vpop.eup %3361 }
 0x438   : > { %v1219_v35 = vpop.permute.xlu2 %1218  ;;  %v1152_v36 = vmul.f32 %v3362_v34, %v3356_v23  ;;  %v3364_v38 = vpop.eup %3363  ;;  %v3324_v34 = vld [vmem:[#allocation11] ss:$0 sm:$0xff] }
 0x439   : > { %1239 = vmatpush.msrb.mxu3 %v1219_v35  ;;  %v1282_v39 = vmul.f32 %v3364_v38, %v3354_v21  ;;  %v1441_v38 = vld [vmem:[#allocation22 + $0x10] sm:$0xff] }
 0x43a   : > { %3032 = vmatmul.msk.f32.vlgmr.msrb.gmra.mxu2 %vm1052_vm8, %v1152_v36  ;;  %3035 = vmatmul.msk.f32.vlgmr.msrb.gmra.mxu3 %vm1052_vm8, %v1217_v37 }
 0x43b   : > { %1430 = vmatpush.msra.mxu3 %v1410_v0  ;;  %1464 = vmatpush.msra.mxu0 %v1441_v38 }
 0x43d   : > { %1431 = vmatpush.msra.mxu3 %v1409_v1  ;;  %v1591_v1 = vld [vmem:[#allocation13 + $0x38] sm:$0xff] }
 0x43f   : > { %1432 = vmatpush.msra.mxu3 %v1408_v3  ;;  %v1590_v3 = vld [vmem:[#allocation13 + $0x30] sm:$0xff] }
 0x442   : > { %3038 = vmatmul.msk.f32.vlgmr.msra.gmra.mxu2 %vm1052_vm8, %v1282_v39  ;;  %v1440_v39 = vld [vmem:[#allocation22 + $0x8] sm:$0xff] }
 0x443   : > { %1465 = vmatpush.msra.mxu0 %v1440_v39 }
 0x49f   : > { %v1111_v40 = vpop.f32.mrf.mxu2 }
 0x4bd   : > { %v1176_v41 = vpop.f32.mrf.mxu2  ;;  %v1241_v42 = vpop.f32.mrf.mxu3 }
 0x4be   : > { %1314 = vrot.lane.b32.xlu1 %v1241_v42, %s4753_s27  ;;  %1310 = vrot.lane.b32.xlu0 %v1176_v41, %s4751_s9  ;;  %v3325_v41 = vld [vmem:[#allocation20] ss:$0 sm:$0xff]  ;;  %s4800_s27 = sld [smem:[#allocation52_spill]]  ;;  %s4802_s9 = smov 8  }
 0x4c4   : > { %v1471_v45 = vld [vmem:[%s4800_s27] sm:$0xff]  ;;  %s4801_s27 = smov 16  }
 0x4c5   : > { %v1306_v43 = vpop.f32.mrf.mxu2 }
 0x4c6   : > { %1318 = vrot.lane.b32.xlu2 %v1306_v43, %s4749_s24  ;;  %s4803_s24 = smov 24  }
 0x520   : > { %v1319_v51 = vpop.permute.xlu2 %1318 }
 0x530   : > { %v1311_v48 = vpop.permute.xlu0 %1310  ;;  %v1315_v49 = vpop.permute.xlu1 %1314 }
 0x531   : > { %v1321_v50 = vsel %vm1052_vm8, %v1111_v40, %v1311_v48  ;;  %v1439_v40 = vld [vmem:[#allocation22] sm:$0xff] }
 0x532   : > { %v1323_v52 = vsel %vm1322_vm9, %v1321_v50, %v1315_v49  ;;  %1466 = vmatpush.msra.mxu0 %v1439_v40  ;;  %v3326_v49 = vld [vmem:[#allocation23] ss:$0 sm:$0xff] }
 0x533   : > { %v1325_v53 = vsel %vm1324_vm10, %v1323_v52, %v1319_v51 }
 0x534   : > { %3039 = vmatmul.msk.f32.vlgmr.msra.gmra.mxu1 %vm964_vm0, %v1325_v53 }
 0x5b1   : > { %v1350_v55 = vpop.f32.mrf.mxu1 }
 0x5b2   : > { %v1353_v56 = vadd.f32 %v1350_v55, %v4434_v2  ;;  %v1407_v2 = vld [vmem:[#allocation19] sm:$0xff] }
 0x5b3   : > { %1433 = vmatpush.msra.mxu3 %v1407_v2  ;;  %v1589_v2 = vld [vmem:[#allocation13 + $0x28] sm:$0xff] }
 0x5b4   : > { %v4497_v57 = vadd.f32 %v3322_v54, %v1353_v56  ;;  %v1535_v56 = vld [vmem:[#allocation5 + $0x8] sm:$0xff] }
 0x5b5   : > { %1612 = vmatpush.msrb.mxu3 %v1591_v1 }
 0x5b6   : > { %v1361_v58 = vsel %vm964_vm0, %v4497_v57, 0.0  ;;  %v1477_v51 = vadd.f32 %v3326_v49, %v4497_v57 }
 0x5b7   : > { %1362 = vadd.xlane.f32.xlu0 %v1361_v58  ;;  %1613 = vmatpush.msrb.mxu3 %v1590_v3 }
 0x5b9   : > { %1614 = vmatpush.msrb.mxu3 %v1589_v2 }
 0x62a   : > { %v1363_v59 = vpop.xlane.xlu0 %1362 }
 0x62b   : > { %v1364_v60 = vmul.f32 %v1363_v59, %v4438_v10 }
 0x62d   : > { %v1365_v61 = vsub.f32 %v4497_v57, %v1364_v60 }
 0x62f   : > { %v1366_v62 = vmul.f32 %v1365_v61, %v1365_v61  ;;  %v1386_v32 = vmul.f32 %v3323_v27, %v1365_v61 }
 0x631   : > { %v1367_v63 = vsel %vm964_vm0, %v1366_v62, 0.0 }
 0x632   : > { %1368 = vadd.xlane.f32.xlu1 %v1367_v63 }
 0x6a5   : > { %v1369_v4 = vpop.xlane.xlu1 %1368 }
 0x6a6   : > { %v1370_v5 = vmul.f32 0.032258064, %v1369_v4  ;;  %v1588_v4 = vld [vmem:[#allocation13 + $0x20] sm:$0xff] }
 0x6a7   : > { %1615 = vmatpush.msrb.mxu3 %v1588_v4 }
 0x6a8   : > { %3365 = vrsqrt.f32 %v1370_v5  ;;  %vm1378_vm11 = vcmp.eq.f32.partialorder %v1370_v5, inf  ;;  %v1381_v18 = vand.u32 2147483648, %v1370_v5  ;;  %vm1380_vm12 = vcmp.eq.f32.partialorder %v1370_v5, 0.0 }
 0x6ae   : > { %v3366_v6 = vpop.eup %3365 }
 0x6af   : > { %v1372_v7 = vmul.f32 %v3366_v6, %v1370_v5 }
 0x6b1   : > { %v1373_v8 = vmul.f32 %v3366_v6, %v1372_v7 }
 0x6b3   : > { %v1374_v9 = vmul.f32 0.5, %v1373_v8 }
 0x6b5   : > { %v1375_v13 = vsub.f32 1.5, %v1374_v9 }
 0x6b7   : > { %v1376_v15 = vmul.f32 %v3366_v6, %v1375_v13 }
 0x6b9   : > { %v1377_v17 = vmul.f32 %v1376_v15, %v1370_v5 }
 0x6bb   : > { %v1379_v20 = vsel %vm1378_vm11, %v1370_v5, %v1377_v17 }
 0x6bc   : > { %v1382_v21 = vsel %vm1380_vm12, %v1381_v18, %v1379_v20 }
 0x6bd   : > { %v1387_v22 = vadd.f32 1e-06, %v1382_v21 }
 0x6bf   : > { %3367 = vrcp.f32 %v1387_v22  ;;  %v1399_v26 = vand.u32 2147483648, %v1387_v22  ;;  %v1397_v29 = vand.u32 2147483647, %v1387_v22  ;;  %vm1393_vm14 = vweird.f32 %v1387_v22 }
 0x6c1   : > { %v1400_v31 = vor.u32 1.1754944e-38, %v1399_v26  ;;  %vm1398_vm1 = vcmp.eq.f32.partialorder %v1397_v29, 8.507059e+37 }
 0x6c5   : > { %v3368_v23 = vpop.eup %3367 }
 0x6c6   : > { %v1389_v24 = vmul.f32 %v3368_v23, %v1387_v22  ;;  %vm1394_vm13 = vweird.f32 %v3368_v23 }
 0x6c7   : > { %vm1395_vm15 = vmor %vm1393_vm14, %vm1394_vm13 }
 0x6c8   : > { %v1390_v25 = vsub.f32 1.0, %v1389_v24 }
 0x6ca   : > { %v1391_v28 = vmul.f32 %v3368_v23, %v1390_v25 }
 0x6cc   : > { %v1392_v30 = vadd.f32 %v3368_v23, %v1391_v28 }
 0x6ce   : > { %v1396_v33 = vsel %vm1395_vm15, %v3368_v23, %v1392_v30  ;;  %v3327_v23 = vld [vmem:[#allocation7 + $0x1] ss:$0 sm:$0xff]  ;;  %v3328_v30 = vld [vmem:[#allocation8 + $0x1] ss:$0 sm:$0xff] }
 0x6cf   : > { %v1401_v35 = vsel %vm1398_vm1, %v1400_v31, %v1396_v33 }
 0x6d0   : > { %v1402_v36 = vmul.f32 %v1401_v35, %v1386_v32 }
 0x6d2   : > { %v1406_v37 = vadd.f32 %v3324_v34, %v1402_v36  ;;  %v3329_v34 = vld [vmem:[#allocation14 + $0x1] ss:$0 sm:$0xff] }
 0x6d4   : > { %3040 = vmatmul.msk.f32.vlgmr.msra.gmra.mxu3 %vm964_vm0, %v1406_v37 }
 0x757   : > { %v1435_v42 = vpop.f32.mrf.mxu3 }
 0x758   : > { %v1436_v43 = vadd.f32 %v3325_v41, %v1435_v42 }
 0x75a   : > { %v1438_v44 = vmax.f32 %v1436_v43, 0.0 }
 0x75c   : > { %3041 = vmatmul.msk.f32.vlgmr.msra.gmra.mxu0 %vm1447_vm2, %v1438_v44 }
 0x7d9   : > { %v1468_v46 = vpop.f32.mrf.mxu0 }
 0x7da   : > { %1507 = vrot.lane.b32.xlu2 %v1468_v46, %s4055_s1  ;;  %1501 = vmatpush.msrb.mxu2 %v1468_v46 }
 0x7db   : > { %3042 = vmatmul.msk.f32.vlgmr.msrb.gmra.mxu2 %vm1052_vm8, %v1471_v45 }
 0x7e2   : > { %1479 = vrot.lane.b32.xlu2 %v1468_v46, %s4050_s26 }
 0x834   : > { %v1508_v48 = vpop.permute.xlu2 %1507 }
 0x835   : > { %1528 = vmatpush.msrb.mxu1 %v1508_v48 }
 0x836   : > { %3043 = vmatmul.msk.f32.vlgmr.msrb.gmra.mxu1 %vm1052_vm8, %v1472_v47 }
 0x83c   : > { %v1480_v50 = vpop.permute.xlu2 %1479 }
 0x83d   : > { %v1482_v53 = vadd.f32 %v1480_v50, %v1477_v51 }
 0x85e   : > { %v1503_v52 = vpop.f32.mrf.mxu2 }
 0x85f   : > { %v1506_v54 = vadd.f32 %v1503_v52, %v1482_v53 }
 0x8b3   : > { %v1530_v55 = vpop.f32.mrf.mxu1 }
 0x8b4   : > { %v1533_v58 = vadd.f32 %v1530_v55, %v1506_v54 }
 0x8b6   : > { %v4514_v59 = vadd.f32 %v1535_v56, %v1533_v58 }
 0x8b8   : > { %v1541_v60 = vsel %vm964_vm0, %v4514_v59, 0.0 }
 0x8b9   : > { %1542 = vadd.xlane.f32.xlu2 %v1541_v60 }
 0x92c   : > { %v1543_v61 = vpop.xlane.xlu2 %1542 }
 0x92d   : > { %v1544_v62 = vmul.f32 %v1543_v61, %v4438_v10 }
 0x92f   : > { %v1545_v63 = vsub.f32 %v4514_v59, %v1544_v62 }
 0x931   : > { %v1546_v0 = vmul.f32 %v1545_v63, %v1545_v63  ;;  %v1566_v28 = vmul.f32 %v3327_v23, %v1545_v63 }
 0x933   : > { %v1547_v57 = vsel %vm964_vm0, %v1546_v0, 0.0 }
 0x934   : > { %1548 = vadd.xlane.f32.xlu0 %v1547_v57 }
 0x9a7   : > { %v1549_v5 = vpop.xlane.xlu0 %1548 }
 0x9a8   : > { %v1550_v6 = vmul.f32 0.032258064, %v1549_v5 }
 0x9aa   : > { %3369 = vrsqrt.f32 %v1550_v6  ;;  %vm1558_vm3 = vcmp.eq.f32.partialorder %v1550_v6, inf  ;;  %v1561_v15 = vand.u32 2147483648, %v1550_v6  ;;  %vm1560_vm4 = vcmp.eq.f32.partialorder %v1550_v6, 0.0 }
 0x9b0   : > { %v3370_v7 = vpop.eup %3369 }
 0x9b1   : > { %v1552_v8 = vmul.f32 %v3370_v7, %v1550_v6 }
 0x9b3   : > { %v1553_v9 = vmul.f32 %v3370_v7, %v1552_v8 }
 0x9b5   : > { %v1554_v11 = vmul.f32 0.5, %v1553_v9 }
 0x9b7   : > { %v1555_v12 = vsub.f32 1.5, %v1554_v11 }
 0x9b9   : > { %v1556_v13 = vmul.f32 %v3370_v7, %v1555_v12 }
 0x9bb   : > { %v1557_v14 = vmul.f32 %v1556_v13, %v1550_v6 }
 0x9bd   : > { %v1559_v16 = vsel %vm1558_vm3, %v1550_v6, %v1557_v14 }
 0x9be   : > { %v1562_v17 = vsel %vm1560_vm4, %v1561_v15, %v1559_v16  ;;  %vm2140_vm4 = vcmask 257024  }
 0x9bf   : > { %v1567_v18 = vadd.f32 1e-06, %v1562_v17 }
 0x9c1   : > { %3371 = vrcp.f32 %v1567_v18  ;;  %v1579_v22 = vand.u32 2147483648, %v1567_v18  ;;  %v1577_v25 = vand.u32 2147483647, %v1567_v18  ;;  %vm1573_vm6 = vweird.f32 %v1567_v18 }
 0x9c3   : > { %v1580_v27 = vor.u32 1.1754944e-38, %v1579_v22  ;;  %vm1578_vm11 = vcmp.eq.f32.partialorder %v1577_v25, 8.507059e+37 }
 0x9c7   : > { %v3372_v19 = vpop.eup %3371 }
 0x9c8   : > { %v1569_v20 = vmul.f32 %v3372_v19, %v1567_v18  ;;  %vm1574_vm5 = vweird.f32 %v3372_v19 }
 0x9c9   : > { %vm1575_vm7 = vmor %vm1573_vm6, %vm1574_vm5 }
 0x9ca   : > { %v1570_v21 = vsub.f32 1.0, %v1569_v20 }
 0x9cc   : > { %v1571_v24 = vmul.f32 %v3372_v19, %v1570_v21 }
 0x9ce   : > { %v1572_v26 = vadd.f32 %v3372_v19, %v1571_v24 }
 0x9d0   : > { %v1576_v29 = vsel %vm1575_vm7, %v3372_v19, %v1572_v26 }
 0x9d1   : > { %v1581_v31 = vsel %vm1578_vm11, %v1580_v27, %v1576_v29 }
 0x9d2   : > { %v1582_v32 = vmul.f32 %v1581_v31, %v1566_v28  ;;  %v1897_v31 = vld [vmem:[#allocation16 + $0x30] sm:$0xff] }
 0x9d4   : > { %v1586_v33 = vadd.f32 %v3328_v30, %v1582_v32  ;;  %v1898_v30 = vld [vmem:[#allocation16 + $0x38] sm:$0xff]  ;;  %v1896_v32 = vld [vmem:[#allocation16 + $0x28] sm:$0xff] }
 0x9d6   : > { %3044 = vmatmul.msk.f32.vlgmr.msrb.gmra.mxu3 %vm964_vm0, %v1586_v33  ;;  %v1895_v33 = vld [vmem:[#allocation16 + $0x20] sm:$0xff] }
 0xa59   : > { %v1617_v35 = vpop.f32.mrf.mxu3 }
 0xa5a   : > { %v4522_v36 = vadd.f32 %v3329_v34, %v1617_v35 }
 0xa5c   : > { %1684 = vrot.lane.b32.xlu2 %v4522_v36, %s4049_s10  ;;  %1686 = vrot.lane.b32.xlu0 %v4522_v36, %s4052_s22 }
 0xa5d   : > { %1621 = vrot.lane.b32.xlu1 %v4522_v36, %s4050_s26 }
 0xa64   : > { %1816 = vrot.lane.b32.xlu0 %v4522_v36, %s4760_s8  ;;  %s4805_s8 = sld [smem:[#allocation54_spill]] }
 0xa65   : > { %1751 = vrot.lane.b32.xlu1 %v4522_v36, %s4051_s4 }
 0xa6c   : > { %1814 = vrot.lane.b32.xlu0 %v4522_v36, %s4758_s17  ;;  %s4807_s17 = smov 112  }
 0xa6d   : > { %1749 = vrot.lane.b32.xlu1 %v4522_v36, %s4759_s16  ;;  %s4808_s16 = smov 104  }
 0xab6   : > { %v1685_v39 = vpop.permute.xlu2 %1684 }
 0xace   : > { %v1687_v37 = vpop.permute.xlu0 %1686 }
 0xacf   : > { %v1622_v38 = vpop.permute.xlu1 %1621  ;;  %3048 = vmatpush.xpose.msk.msra.mxu3 %vm1052_vm8, %v1687_v37 }
 0xad0   : > { %3045 = vmatpush.xpose.msk.msra.mxu2 %vm1052_vm8, %v1622_v38 }
 0xad2   : > { %3049 = vmatmul.msk.f32.vlgmr.msra.gmra.mxu3 %vm1052_vm8, %v1685_v39 }
 0xad3   : > { %3046 = vmatmul.msk.f32.vlgmr.msra.gmra.mxu2 %vm1052_vm8, %v4522_v36 }
 0xad6   : > { %v1817_v40 = vpop.permute.xlu0 %1816 }
 0xad7   : > { %v1752_v41 = vpop.permute.xlu1 %1751  ;;  %3054 = vmatpush.xpose.msk.msrb.mxu3 %vm1052_vm8, %v1817_v40  ;;  %v3330_v40 = vld [vmem:[#allocation17 + $0x1] ss:$0 sm:$0xff] }
 0xad8   : > { %3051 = vmatpush.xpose.msk.msrb.mxu2 %vm1052_vm8, %v1752_v41 }
 0xadc   : > { %1914 = vmatpush.msra.mxu2 %v1898_v30 }
 0xade   : > { %v1815_v42 = vpop.permute.xlu0 %1814  ;;  %1915 = vmatpush.msra.mxu2 %v1897_v31 }
 0xadf   : > { %v1750_v43 = vpop.permute.xlu1 %1749  ;;  %3055 = vmatmul.msk.f32.vlgmr.msrb.gmra.mxu3 %vm1052_vm8, %v1815_v42 }
 0xae0   : > { %3052 = vmatmul.msk.f32.vlgmr.msrb.gmra.mxu2 %vm1052_vm8, %v1750_v43 }
 0xae1   : > { %1916 = vmatpush.msra.mxu2 %v1896_v32 }
 0xae3   : > { %1917 = vmatpush.msra.mxu2 %v1895_v33 }
 0xb55   : > { %v1709_v44 = vpop.f32.mrf.mxu3 }
 0xb56   : > { %v1644_v45 = vpop.f32.mrf.mxu2  ;;  %v1712_v46 = vsel %vm1052_vm8, %v1709_v44, -inf }
 0xb57   : > { %1713 = vmax.xlane.f32.xlu0 %v1712_v46  ;;  %v1647_v47 = vsel %vm1052_vm8, %v1644_v45, -inf }
 0xb58   : > { %1648 = vmax.xlane.f32.xlu1 %v1647_v47 }
 0xb62   : > { %v1839_v48 = vpop.f32.mrf.mxu3 }
 0xb63   : > { %v1774_v49 = vpop.f32.mrf.mxu2  ;;  %v1842_v50 = vsel %vm1052_vm8, %v1839_v48, -inf }
 0xb64   : > { %1843 = vmax.xlane.f32.xlu1 %v1842_v50  ;;  %v1777_v51 = vsel %vm1052_vm8, %v1774_v49, -inf  ;;  %v1983_v50 = vld [vmem:[#allocation19 + $0x38] sm:$0xff] }
 0xb65   : > { %1778 = vmax.xlane.f32.xlu2 %v1777_v51  ;;  %v1982_v51 = vld [vmem:[#allocation19 + $0x30] sm:$0xff] }
 0xb6b   : > { %1658 = vrot.lane.b32.xlu0 %v4522_v36, %s4055_s1 }
 0xbca   : > { %v1714_v52 = vpop.xlane.xlu0 %1713 }
 0xbcb   : > { %v1715_v53 = vsub.f32 %v1709_v44, %v1714_v52  ;;  %v1649_v54 = vpop.xlane.xlu1 %1648  ;;  %v1981_v52 = vld [vmem:[#allocation19 + $0x28] sm:$0xff] }
 0xbcc   : > { %v1650_v55 = vsub.f32 %v1644_v45, %v1649_v54 }
 0xbcd   : > { %v1716_v56 = vmul.f32 1.442695, %v1715_v53 }
 0xbce   : > { %v1651_v58 = vmul.f32 1.442695, %v1650_v55 }
 0xbcf   : > { %3373 = vpow2.f32 %v1716_v56 }
 0xbd0   : > { %3375 = vpow2.f32 %v1651_v58 }
 0xbd5   : > { %v3374_v60 = vpop.eup %3373 }
 0xbd6   : > { %v3376_v61 = vpop.eup %3375  ;;  %v1718_v62 = vsel %vm1052_vm8, %v3374_v60, 0.0 }
 0xbd7   : > { %1719 = vadd.xlane.f32.xlu2 %v1718_v62  ;;  %v1653_v63 = vsel %vm1052_vm8, %v3376_v61, 0.0  ;;  %v1844_v0 = vpop.xlane.xlu1 %1843  ;;  %v2020_v62 = vld [vmem:[#allocation22 + $0x70] sm:$0xff] }
 0xbd8   : > { %v1779_v57 = vpop.xlane.xlu2 %1778  ;;  %1654 = vadd.xlane.f32.xlu0 %v1653_v63  ;;  %v1845_v1 = vsub.f32 %v1839_v48, %v1844_v0  ;;  %v2019_v0 = vld [vmem:[#allocation22 + $0x68] sm:$0xff] }
 0xbd9   : > { %v1780_v3 = vsub.f32 %v1774_v49, %v1779_v57 }
 0xbda   : > { %v1846_v2 = vmul.f32 1.442695, %v1845_v1  ;;  %v2018_v1 = vld [vmem:[#allocation22 + $0x60] sm:$0xff] }
 0xbdb   : > { %v1781_v4 = vmul.f32 1.442695, %v1780_v3 }
 0xbdc   : > { %3377 = vpow2.f32 %v1846_v2 }
 0xbdd   : > { %3379 = vpow2.f32 %v1781_v4  ;;  %v1659_v5 = vpop.permute.xlu0 %1658  ;;  %v2017_v4 = vld [vmem:[#allocation22 + $0x58] sm:$0xff] }
 0xbde   : > { %1679 = vmatpush.msra.mxu1 %v1659_v5 }
 0xbe2   : > { %v3378_v6 = vpop.eup %3377 }
 0xbe3   : > { %v3380_v7 = vpop.eup %3379  ;;  %v1848_v8 = vsel %vm1052_vm8, %v3378_v6, 0.0 }
 0xbe4   : > { %v1783_v9 = vsel %vm1052_vm8, %v3380_v7, 0.0  ;;  %1849 = vadd.xlane.f32.xlu2 %v1848_v8 }
 0xbe5   : > { %1784 = vadd.xlane.f32.xlu1 %v1783_v9 }
 0xbec   : > { %1853 = vrot.lane.b32.xlu0 %v4522_v36, %s4757_s21  ;;  %s4804_s21 = sld [smem:[#allocation53_spill]] }
 0xbf2   : > { %v2045_v32 = vld [vmem:[%s4804_s21] sm:$0xf] }
 0xbfc   : > { %1788 = vrot.lane.b32.xlu2 %v4522_v36, %s4755_s23  ;;  %s4812_s23 = sld [smem:[#allocation55_spill]] }
 0xbfe   : > { %1723 = vrot.lane.b32.xlu1 %v4522_v36, %s4756_s7  ;;  %s2749_s7 = scalar_lea.sflag [#allocation4], %s4394_s2 }
 0xc4a   : > { %v1720_v12 = vpop.xlane.xlu2 %1719 }
 0xc4b   : > { %v1655_v11 = vpop.xlane.xlu0 %1654 }
 0xc4c   : > { %3381 = vrcp.f32 %v1655_v11 }
 0xc52   : > { %v3382_v13 = vpop.eup %3381 }
 0xc53   : > { %v1657_v14 = vmul.f32 %v3382_v13, %v3376_v61  ;;  %v2021_v61 = vld [vmem:[#allocation22 + $0x78] sm:$0xff]  ;;  %v3331_v13 = vld [vmem:[#allocation10 + $0x1] ss:$0 sm:$0xff] }
 0xc54   : > { %2033 = vmatpush.msra.mxu3 %v2021_v61 }
 0xc55   : > { %3047 = vmatmul.msk.f32.vlgmr.msra.gmra.mxu1 %vm1052_vm8, %v1657_v14 }
 0xc56   : > { %2034 = vmatpush.msra.mxu3 %v2020_v62 }
 0xc57   : > { %v1850_v15 = vpop.xlane.xlu2 %1849 }
 0xc58   : > { %v1785_v16 = vpop.xlane.xlu1 %1784  ;;  %2035 = vmatpush.msra.mxu3 %v2019_v0 }
 0xc59   : > { %3383 = vrcp.f32 %v1785_v16 }
 0xc5a   : > { %3385 = vrcp.f32 %v1720_v12  ;;  %2036 = vmatpush.msra.mxu3 %v2018_v1 }
 0xc5b   : > { %3387 = vrcp.f32 %v1850_v15 }
 0xc5c   : > { %2037 = vmatpush.msra.mxu3 %v2017_v4 }
 0xc5e   : > { %v1854_v23 = vpop.permute.xlu0 %1853 }
 0xc5f   : > { %v3384_v17 = vpop.eup %3383  ;;  %v1789_v18 = vpop.permute.xlu2 %1788 }
 0xc60   : > { %v1787_v19 = vmul.f32 %v3384_v17, %v3380_v7  ;;  %1809 = vmatpush.msrb.mxu1 %v1789_v18  ;;  %v3386_v20 = vpop.eup %3385 }
 0xc61   : > { %v1722_v21 = vmul.f32 %v3386_v20, %v3374_v60  ;;  %v3388_v24 = vpop.eup %3387  ;;  %v3332_v20 = vld [vmem:[#allocation11 + $0x1] ss:$0 sm:$0xff] }
 0xc62   : > { %3053 = vmatmul.msk.f32.vlgmr.msrb.gmra.mxu1 %vm1052_vm8, %v1787_v19  ;;  %v1852_v25 = vmul.f32 %v3388_v24, %v3378_v6  ;;  %v2016_v24 = vld [vmem:[#allocation22 + $0x50] sm:$0xff] }
 0xc63   : > { %2004 = vmatpush.msra.mxu1 %v1983_v50  ;;  %2038 = vmatpush.msra.mxu3 %v2016_v24 }
 0xc65   : > { %2005 = vmatpush.msra.mxu1 %v1982_v51 }
 0xc67   : > { %2006 = vmatpush.msra.mxu1 %v1981_v52 }
 0xc70   : > { %v1724_v22 = vpop.permute.xlu1 %1723 }
 0xc71   : > { %1744 = vmatpush.msrb.mxu0 %v1724_v22 }
 0xc72   : > { %3050 = vmatmul.msk.f32.vlgmr.msrb.gmra.mxu0 %vm1052_vm8, %v1722_v21 }
 0xc73   : > { %1874 = vmatpush.msra.mxu0 %v1854_v23 }
 0xc7a   : > { %3056 = vmatmul.msk.f32.vlgmr.msra.gmra.mxu0 %vm1052_vm8, %v1852_v25  ;;  %v2015_v25 = vld [vmem:[#allocation22 + $0x48] sm:$0xff] }
 0xc7b   : > { %2039 = vmatpush.msra.mxu3 %v2015_v25 }
 0xcd2   : > { %v1681_v26 = vpop.f32.mrf.mxu1 }
 0xcdf   : > { %v1811_v27 = vpop.f32.mrf.mxu1 }
 0xce0   : > { %1884 = vrot.lane.b32.xlu1 %v1811_v27, %s4801_s27  ;;  %v3333_v27 = vld [vmem:[#allocation20 + $0x1] ss:$0 sm:$0xff] }
 0xcef   : > { %v1746_v28 = vpop.f32.mrf.mxu0 }
 0xcf0   : > { %1880 = vrot.lane.b32.xlu0 %v1746_v28, %s4802_s9 }
 0xcf7   : > { %v1876_v29 = vpop.f32.mrf.mxu0 }
 0xcf8   : > { %1888 = vrot.lane.b32.xlu2 %v1876_v29, %s4803_s24 }
 0xd52   : > { %v1885_v35 = vpop.permute.xlu1 %1884  ;;  %v1889_v37 = vpop.permute.xlu2 %1888 }
 0xd62   : > { %v1881_v34 = vpop.permute.xlu0 %1880 }
 0xd63   : > { %v1891_v36 = vsel %vm1052_vm8, %v1681_v26, %v1881_v34  ;;  %v2014_v26 = vld [vmem:[#allocation22 + $0x40] sm:$0xff] }
 0xd64   : > { %v1892_v38 = vsel %vm1322_vm9, %v1891_v36, %v1885_v35  ;;  %2040 = vmatpush.msra.mxu3 %v2014_v26  ;;  %v2047_v35 = vld [vmem:[#allocation26] sm:$0xf]  ;;  %v2046_v36 = vld [vmem:[%s4805_s8] sm:$0xf]  ;;  %s4806_s8 = smov 72  }
 0xd65   : > { %v1893_v39 = vsel %vm1324_vm10, %v1892_v38, %v1889_v37  ;;  %v3334_v38 = vld [vmem:[#allocation23 + $0x1] ss:$0 sm:$0xff] }
 0xd66   : > { %3057 = vmatmul.msk.f32.vlgmr.msra.gmra.mxu2 %vm964_vm0, %v1893_v39 }
 0xde9   : > { %v1919_v41 = vpop.f32.mrf.mxu2 }
 0xdea   : > { %v1922_v42 = vadd.f32 %v1919_v41, %v4514_v59  ;;  %v1980_v59 = vld [vmem:[#allocation19 + $0x20] sm:$0xff] }
 0xdeb   : > { %2007 = vmatpush.msra.mxu1 %v1980_v59  ;;  %v2191_v59 = vld [vmem:[#allocation13 + $0x58] sm:$0xff] }
 0xdec   : > { %v4575_v43 = vadd.f32 %v3330_v40, %v1922_v42 }
 0xdee   : > { %v1933_v44 = vsel %vm964_vm0, %v4575_v43, 0.0 }
 0xdef   : > { %1934 = vadd.xlane.f32.xlu0 %v1933_v44 }
 0xe62   : > { %v1935_v45 = vpop.xlane.xlu0 %1934 }
 0xe63   : > { %v1936_v46 = vmul.f32 %v1935_v45, %v4438_v10  ;;  %v2134_v45 = vld [vmem:[#allocation5 + $0x10] sm:$0xff] }
 0xe65   : > { %v1937_v47 = vsub.f32 %v4575_v43, %v1936_v46 }
 0xe67   : > { %v1938_v48 = vmul.f32 %v1937_v47, %v1937_v47  ;;  %v1958_v18 = vmul.f32 %v3331_v13, %v1937_v47 }
 0xe69   : > { %v1939_v49 = vsel %vm964_vm0, %v1938_v48, 0.0 }
 0xe6a   : > { %1940 = vadd.xlane.f32.xlu1 %v1939_v49 }
 0xedd   : > { %v1941_v53 = vpop.xlane.xlu1 %1940 }
 0xede   : > { %v1942_v54 = vmul.f32 0.032258064, %v1941_v53  ;;  %v2190_v53 = vld [vmem:[#allocation13 + $0x50] sm:$0xff] }
 0xee0   : > { %3389 = vrsqrt.f32 %v1942_v54  ;;  %vm1950_vm12 = vcmp.eq.f32.partialorder %v1942_v54, inf  ;;  %v1953_v2 = vand.u32 2147483648, %v1942_v54  ;;  %vm1952_vm13 = vcmp.eq.f32.partialorder %v1942_v54, 0.0 }
 0xee6   : > { %v3390_v55 = vpop.eup %3389 }
 0xee7   : > { %v1944_v56 = vmul.f32 %v3390_v55, %v1942_v54 }
 0xee9   : > { %v1945_v58 = vmul.f32 %v3390_v55, %v1944_v56 }
 0xeeb   : > { %v1946_v60 = vmul.f32 0.5, %v1945_v58 }
 0xeed   : > { %v1947_v63 = vsub.f32 1.5, %v1946_v60 }
 0xeef   : > { %v1948_v57 = vmul.f32 %v3390_v55, %v1947_v63  ;;  %v2188_v55 = vld [vmem:[#allocation13 + $0x40] sm:$0xff] }
 0xef1   : > { %v1949_v3 = vmul.f32 %v1948_v57, %v1942_v54 }
 0xef3   : > { %v1951_v5 = vsel %vm1950_vm12, %v1942_v54, %v1949_v3  ;;  %v2189_v54 = vld [vmem:[#allocation13 + $0x48] sm:$0xff] }
 0xef4   : > { %v1954_v6 = vsel %vm1952_vm13, %v1953_v2, %v1951_v5 }
 0xef5   : > { %v1959_v7 = vadd.f32 1e-06, %v1954_v6 }
 0xef7   : > { %3391 = vrcp.f32 %v1959_v7  ;;  %v1971_v12 = vand.u32 2147483648, %v1959_v7  ;;  %v1969_v15 = vand.u32 2147483647, %v1959_v7  ;;  %vm1965_vm15 = vweird.f32 %v1959_v7 }
 0xef9   : > { %v1972_v17 = vor.u32 1.1754944e-38, %v1971_v12  ;;  %vm1970_vm3 = vcmp.eq.f32.partialorder %v1969_v15, 8.507059e+37 }
 0xefd   : > { %v3392_v8 = vpop.eup %3391 }
 0xefe   : > { %v1961_v9 = vmul.f32 %v3392_v8, %v1959_v7  ;;  %vm1966_vm14 = vweird.f32 %v3392_v8 }
 0xeff   : > { %vm1967_vm1 = vmor %vm1965_vm15, %vm1966_vm14  ;;  %vm2247_vm14 = vcmask 27648   ;;  %vm2265_vm15 = vcmask 1043456  }
 0xf00   : > { %v1962_v11 = vsub.f32 1.0, %v1961_v9 }
 0xf02   : > { %v1963_v14 = vmul.f32 %v3392_v8, %v1962_v11  ;;  %v3335_v11 = vld [vmem:[#allocation7 + $0x2] ss:$0 sm:$0xff] }
 0xf04   : > { %v1964_v16 = vadd.f32 %v3392_v8, %v1963_v14 }
 0xf06   : > { %v1968_v19 = vsel %vm1967_vm1, %v3392_v8, %v1964_v16  ;;  %vm2261_vm1 = vcmask 31744  }
 0xf07   : > { %v1973_v21 = vsel %vm1970_vm3, %v1972_v17, %v1968_v19 }
 0xf08   : > { %v1974_v22 = vmul.f32 %v1973_v21, %v1958_v18  ;;  %v3336_v18 = vld [vmem:[#allocation8 + $0x2] ss:$0 sm:$0xff] }
 0xf0a   : > { %v1978_v23 = vadd.f32 %v3332_v20, %v1974_v22  ;;  %v3337_v22 = vld [vmem:[#allocation14 + $0x2] ss:$0 sm:$0xff] }
 0xf0c   : > { %3058 = vmatmul.msk.f32.vlgmr.msra.gmra.mxu1 %vm964_vm0, %v1978_v23 }
 0xf89   : > { %v2009_v28 = vpop.f32.mrf.mxu1 }
 0xf8a   : > { %v2010_v29 = vadd.f32 %v3333_v27, %v2009_v28 }
 0xf8c   : > { %v2012_v30 = vmax.f32 %v2010_v29, 0.0 }
 0xf8e   : > { %3059 = vmatmul.msk.f32.vlgmr.msra.gmra.mxu3 %vm1447_vm2, %v2012_v30 }
0x1011   : > { %v2042_v31 = vpop.f32.mrf.mxu3 }
0x1012   : > { %2051 = vrot.lane.b32.xlu2 %v2042_v31, %s4050_s26  ;;  %2100 = vmatpush.msrb.mxu2 %v2042_v31 }
0x1013   : > { %3061 = vmatmul.msk.f32.vlgmr.msrb.gmra.mxu2 %vm1052_vm8, %v2045_v32 }
0x101a   : > { %2106 = vrot.lane.b32.xlu2 %v2042_v31, %s4055_s1 }
0x106c   : > { %v2052_v33 = vpop.permute.xlu2 %2051 }
0x106d   : > { %v2054_v34 = vadd.f32 %v2052_v33, %v4575_v43 }
0x106f   : > { %2073 = vmatpush.msrb.mxu0 %v2054_v34 }
0x1070   : > { %3060 = vmatmul.msk.f32.vlgmr.msrb.gmra.mxu0 %vm1052_vm8, %v2047_v35 }
0x1071   : > { %2212 = vmatpush.msra.mxu0 %v2191_v59 }
0x1073   : > { %2213 = vmatpush.msra.mxu0 %v2190_v53 }
0x1074   : > { %v2107_v37 = vpop.permute.xlu2 %2106 }
0x1075   : > { %2127 = vmatpush.msrb.mxu1 %v2107_v37  ;;  %2214 = vmatpush.msra.mxu0 %v2189_v54 }
0x1076   : > { %3062 = vmatmul.msk.f32.vlgmr.msrb.gmra.mxu1 %vm1052_vm8, %v2046_v36 }
0x1077   : > { %2215 = vmatpush.msra.mxu0 %v2188_v55 }
0x1096   : > { %v2102_v40 = vpop.f32.mrf.mxu2 }
0x10ed   : > { %v2075_v39 = vpop.f32.mrf.mxu0 }
0x10ee   : > { %v2081_v41 = vadd.f32 %v3334_v38, %v2075_v39 }
0x10f0   : > { %v2105_v42 = vadd.f32 %v2102_v40, %v2081_v41 }
0x10f3   : > { %v2129_v44 = vpop.f32.mrf.mxu1 }
0x10f4   : > { %v2132_v43 = vadd.f32 %v2129_v44, %v2105_v42 }
0x10f6   : > { %v4596_v46 = vadd.f32 %v2134_v45, %v2132_v43 }
0x10f8   : > { %v2141_v47 = vsel %vm2140_vm4, %v4596_v46, 0.0 }
0x10f9   : > { %2142 = vadd.xlane.f32.xlu2 %v2141_v47 }
0x116c   : > { %v2143_v48 = vpop.xlane.xlu2 %2142 }
0x116d   : > { %v2144_v49 = vmul.f32 %v2143_v48, %v4438_v10 }
0x116f   : > { %v2145_v50 = vsub.f32 %v4596_v46, %v2144_v49 }
0x1171   : > { %v2146_v51 = vmul.f32 %v2145_v50, %v2145_v50  ;;  %v2166_v16 = vmul.f32 %v3335_v11, %v2145_v50 }
0x1173   : > { %v2147_v52 = vsel %vm2140_vm4, %v2146_v51, 0.0 }
0x1174   : > { %2148 = vadd.xlane.f32.xlu0 %v2147_v52 }
0x11e7   : > { %v2149_v56 = vpop.xlane.xlu0 %2148 }
0x11e8   : > { %v2150_v58 = vmul.f32 0.032258064, %v2149_v56 }
0x11ea   : > { %3393 = vrsqrt.f32 %v2150_v58  ;;  %vm2158_vm5 = vcmp.eq.f32.partialorder %v2150_v58, inf  ;;  %v2161_v3 = vand.u32 2147483648, %v2150_v58  ;;  %vm2160_vm6 = vcmp.eq.f32.partialorder %v2150_v58, 0.0 }
0x11f0   : > { %v3394_v60 = vpop.eup %3393 }
0x11f1   : > { %v2152_v61 = vmul.f32 %v3394_v60, %v2150_v58 }
0x11f3   : > { %v2153_v62 = vmul.f32 %v3394_v60, %v2152_v61 }
0x11f5   : > { %v2154_v63 = vmul.f32 0.5, %v2153_v62 }
0x11f7   : > { %v2155_v0 = vsub.f32 1.5, %v2154_v63 }
0x11f9   : > { %v2156_v57 = vmul.f32 %v3394_v60, %v2155_v0 }
0x11fb   : > { %v2157_v1 = vmul.f32 %v2156_v57, %v2150_v58 }
0x11fd   : > { %v2159_v2 = vsel %vm2158_vm5, %v2150_v58, %v2157_v1 }
0x11fe   : > { %v2162_v4 = vsel %vm2160_vm6, %v2161_v3, %v2159_v2 }
0x11ff   : > { %v2167_v5 = vadd.f32 1e-06, %v2162_v4 }
0x1201   : > { %3395 = vrcp.f32 %v2167_v5  ;;  %v2179_v9 = vand.u32 2147483648, %v2167_v5  ;;  %v2177_v13 = vand.u32 2147483647, %v2167_v5  ;;  %vm2173_vm11 = vweird.f32 %v2167_v5 }
0x1203   : > { %v2180_v15 = vor.u32 1.1754944e-38, %v2179_v9  ;;  %vm2178_vm13 = vcmp.eq.f32.partialorder %v2177_v13, 8.507059e+37 }
0x1207   : > { %v3396_v6 = vpop.eup %3395 }
0x1208   : > { %v2169_v7 = vmul.f32 %v3396_v6, %v2167_v5  ;;  %vm2174_vm7 = vweird.f32 %v3396_v6 }
0x1209   : > { %vm2175_vm12 = vmor %vm2173_vm11, %vm2174_vm7 }
0x120a   : > { %v2170_v8 = vsub.f32 1.0, %v2169_v7 }
0x120c   : > { %v2171_v12 = vmul.f32 %v3396_v6, %v2170_v8 }
0x120e   : > { %v2172_v14 = vadd.f32 %v3396_v6, %v2171_v12 }
0x1210   : > { %v2176_v17 = vsel %vm2175_vm12, %v3396_v6, %v2172_v14 }
0x1211   : > { %v2181_v19 = vsel %vm2178_vm13, %v2180_v15, %v2176_v17 }
0x1212   : > { %v2182_v20 = vmul.f32 %v2181_v19, %v2166_v16  ;;  %v2504_v19 = vld [vmem:[#allocation16 + $0x50] sm:$0xff] }
0x1214   : > { %v2186_v21 = vadd.f32 %v3336_v18, %v2182_v20  ;;  %v2505_v18 = vld [vmem:[#allocation16 + $0x58] sm:$0xff]  ;;  %v2503_v20 = vld [vmem:[#allocation16 + $0x48] sm:$0xff] }
0x1216   : > { %3063 = vmatmul.msk.f32.vlgmr.msra.gmra.mxu0 %vm964_vm0, %v2186_v21  ;;  %v2502_v21 = vld [vmem:[#allocation16 + $0x40] sm:$0xff] }
0x1293   : > { %v2217_v23 = vpop.f32.mrf.mxu0 }
0x1294   : > { %v4604_v24 = vadd.f32 %v3337_v22, %v2217_v23 }
0x1296   : > { %2288 = vrot.lane.b32.xlu2 %v4604_v24, %s4049_s10  ;;  %2290 = vrot.lane.b32.xlu0 %v4604_v24, %s4052_s22  ;;  %s4809_s10 = smov 40   ;;  %s4811_s22 = smov 48  }
0x1297   : > { %2221 = vrot.lane.b32.xlu1 %v4604_v24, %s4050_s26 }
0x129e   : > { %2356 = vrot.lane.b32.xlu0 %v4604_v24, %s4051_s4  ;;  %s4810_s4 = smov 56  }
0x129f   : > { %2422 = vrot.lane.b32.xlu1 %v4604_v24, %s4806_s8 }
0x12a6   : > { %2354 = vrot.lane.b32.xlu0 %v4604_v24, %s4807_s17 }
0x12a7   : > { %2420 = vrot.lane.b32.xlu1 %v4604_v24, %s4808_s16  ;;  %s4814_s16 = sld [smem:[#allocation57_spill]] }
0x12f0   : > { %v2289_v27 = vpop.permute.xlu2 %2288 }
0x1308   : > { %v2291_v25 = vpop.permute.xlu0 %2290 }
0x1309   : > { %v2222_v26 = vpop.permute.xlu1 %2221  ;;  %3068 = vmatpush.xpose.msk.msrb.mxu3 %vm1052_vm8, %v2291_v25 }
0x130a   : > { %3064 = vmatpush.xpose.msk.msra.mxu2 %vm1052_vm8, %v2222_v26 }
0x130c   : > { %3069 = vmatmul.msk.f32.vlgmr.msrb.gmra.mxu3 %vm1052_vm8, %v2289_v27 }
0x130d   : > { %3065 = vmatmul.msk.f32.vlgmr.msra.gmra.mxu2 %vm1052_vm8, %v4604_v24 }
0x1310   : > { %v2357_v28 = vpop.permute.xlu0 %2356 }
0x1311   : > { %v2423_v29 = vpop.permute.xlu1 %2422  ;;  %3072 = vmatpush.xpose.msk.msrb.mxu2 %vm1052_vm8, %v2357_v28  ;;  %v3338_v28 = vld [vmem:[#allocation17 + $0x2] ss:$0 sm:$0xff] }
0x1312   : > { %3076 = vmatpush.xpose.msk.msra.mxu3 %vm1052_vm8, %v2423_v29 }
0x1315   : > { %2521 = vmatpush.msra.mxu2 %v2505_v18 }
0x1317   : > { %2522 = vmatpush.msra.mxu2 %v2504_v19  ;;  %v2652_v19 = vld [vmem:[%s4812_s23] sm:$0x3] }
0x1318   : > { %v2355_v30 = vpop.permute.xlu0 %2354 }
0x1319   : > { %v2421_v31 = vpop.permute.xlu1 %2420  ;;  %3073 = vmatmul.msk.f32.vlgmr.msrb.gmra.mxu2 %vm1052_vm8, %v2355_v30 }
0x131a   : > { %3077 = vmatmul.msk.f32.vlgmr.msra.gmra.mxu3 %vm1052_vm8, %v2421_v31  ;;  %2523 = vmatpush.msra.mxu2 %v2503_v20 }
0x131c   : > { %2524 = vmatpush.msra.mxu2 %v2502_v21 }
0x138f   : > { %v2313_v32 = vpop.f32.mrf.mxu3 }
0x1390   : > { %v2244_v33 = vpop.f32.mrf.mxu2  ;;  %v2316_v34 = vsel %vm2247_vm14, %v2313_v32, -inf }
0x1391   : > { %2317 = vmax.xlane.f32.xlu1 %v2316_v34  ;;  %v2248_v35 = vsel %vm2247_vm14, %v2244_v33, -inf }
0x1392   : > { %2249 = vmax.xlane.f32.xlu0 %v2248_v35 }
0x139c   : > { %v2379_v36 = vpop.f32.mrf.mxu2 }
0x139d   : > { %v2382_v37 = vsel %vm2247_vm14, %v2379_v36, -inf  ;;  %v2445_v38 = vpop.f32.mrf.mxu3 }
0x139e   : > { %2383 = vmax.xlane.f32.xlu2 %v2382_v37  ;;  %v2448_v39 = vsel %vm2247_vm14, %v2445_v38, -inf }
0x13a6   : > { %2259 = vrot.lane.b32.xlu0 %v4604_v24, %s4055_s1  ;;  %2449 = vmax.xlane.f32.xlu2 %v2448_v39  ;;  %v2589_v39 = vld [vmem:[#allocation19 + $0x50] sm:$0xff] }
0x1404   : > { %v2318_v40 = vpop.xlane.xlu1 %2317 }
0x1405   : > { %v2250_v41 = vpop.xlane.xlu0 %2249  ;;  %v2319_v42 = vsub.f32 %v2313_v32, %v2318_v40  ;;  %v2588_v40 = vld [vmem:[#allocation19 + $0x48] sm:$0xff] }
0x1406   : > { %v2251_v44 = vsub.f32 %v2244_v33, %v2250_v41 }
0x1407   : > { %v2320_v45 = vmul.f32 1.442695, %v2319_v42 }
0x1408   : > { %v2252_v43 = vmul.f32 1.442695, %v2251_v44 }
0x1409   : > { %3397 = vpow2.f32 %v2320_v45 }
0x140a   : > { %3399 = vpow2.f32 %v2252_v43 }
0x140f   : > { %v3398_v47 = vpop.eup %3397 }
0x1410   : > { %v3400_v48 = vpop.eup %3399  ;;  %v2322_v49 = vsel %vm2247_vm14, %v3398_v47, 0.0 }
0x1411   : > { %v2384_v50 = vpop.xlane.xlu2 %2383  ;;  %v2254_v51 = vsel %vm2247_vm14, %v3400_v48, 0.0  ;;  %2323 = vadd.xlane.f32.xlu1 %v2322_v49 }
0x1412   : > { %v2385_v52 = vsub.f32 %v2379_v36, %v2384_v50  ;;  %2255 = vadd.xlane.f32.xlu0 %v2254_v51  ;;  %v2626_v50 = vld [vmem:[#allocation22 + $0xa8] sm:$0xff] }
0x1414   : > { %v2386_v59 = vmul.f32 1.442695, %v2385_v52  ;;  %v2625_v52 = vld [vmem:[#allocation22 + $0xa0] sm:$0xff] }
0x1416   : > { %3401 = vpow2.f32 %v2386_v59 }
0x1418   : > { %v2260_v53 = vpop.permute.xlu0 %2259 }
0x1419   : > { %3066 = vmatpush.msk.msra.mxu1 %vm2265_vm15, %v2260_v53  ;;  %v2450_v54 = vpop.xlane.xlu2 %2449 }
0x141a   : > { %v2451_v55 = vsub.f32 %v2445_v38, %v2450_v54  ;;  %v2590_v38 = vld [vmem:[#allocation19 + $0x58] sm:$0xff] }
0x141b   : > { %v2624_v54 = vld [vmem:[#allocation22 + $0x98] sm:$0xff] }
0x141c   : > { %v3402_v56 = vpop.eup %3401  ;;  %v2452_v58 = vmul.f32 1.442695, %v2451_v55 }
0x141d   : > { %v2388_v60 = vsel %vm2247_vm14, %v3402_v56, 0.0 }
0x141e   : > { %3403 = vpow2.f32 %v2452_v58  ;;  %2389 = vadd.xlane.f32.xlu2 %v2388_v60 }
0x1424   : > { %v3404_v61 = vpop.eup %3403 }
0x1425   : > { %v2454_v62 = vsel %vm2247_vm14, %v3404_v61, 0.0 }
0x1426   : > { %2459 = vrot.lane.b32.xlu0 %v4604_v24, %s4809_s10  ;;  %2455 = vadd.xlane.f32.xlu1 %v2454_v62 }
0x1436   : > { %2327 = vrot.lane.b32.xlu2 %v4604_v24, %s4810_s4 }
0x143f   : > { %2393 = vrot.lane.b32.xlu1 %v4604_v24, %s4811_s22 }
0x1484   : > { %v2324_v1 = vpop.xlane.xlu1 %2323 }
0x1485   : > { %v2256_v63 = vpop.xlane.xlu0 %2255 }
0x1486   : > { %3405 = vrcp.f32 %v2256_v63 }
0x1487   : > { %3407 = vrcp.f32 %v2324_v1 }
0x148c   : > { %v3406_v0 = vpop.eup %3405 }
0x148d   : > { %v2258_v57 = vmul.f32 %v3406_v0, %v3400_v48  ;;  %v3408_v2 = vpop.eup %3407  ;;  %v2627_v48 = vld [vmem:[#allocation22 + $0xb0] sm:$0xff]  ;;  %v3339_v0 = vld [vmem:[#allocation10 + $0x2] ss:$0 sm:$0xff] }
0x148e   : > { %v2326_v4 = vmul.f32 %v3408_v2, %v3398_v47  ;;  %v2628_v47 = vld [vmem:[#allocation22 + $0xb8] sm:$0xff] }
0x148f   : > { %3067 = vmatmul.msk.f32.vlgmr.msra.gmra.mxu1 %vm2261_vm1, %v2258_v57  ;;  %2640 = vmatpush.msrb.mxu3 %v2628_v47 }
0x1491   : > { %v2390_v3 = vpop.xlane.xlu2 %2389  ;;  %2641 = vmatpush.msrb.mxu3 %v2627_v48 }
0x1493   : > { %2642 = vmatpush.msrb.mxu3 %v2626_v50 }
0x1495   : > { %2643 = vmatpush.msrb.mxu3 %v2625_v52 }
0x1497   : > { %2644 = vmatpush.msrb.mxu3 %v2624_v54 }
0x1498   : > { %v2460_v7 = vpop.permute.xlu0 %2459 }
0x1499   : > { %v2328_v5 = vpop.permute.xlu2 %2327  ;;  %v2456_v6 = vpop.xlane.xlu1 %2455 }
0x149a   : > { %3409 = vrcp.f32 %v2456_v6  ;;  %3070 = vmatpush.msk.msrb.mxu0 %vm2265_vm15, %v2328_v5  ;;  %v3340_v6 = vld [vmem:[#allocation11 + $0x2] ss:$0 sm:$0xff] }
0x149b   : > { %3071 = vmatmul.msk.f32.vlgmr.msrb.gmra.mxu0 %vm2261_vm1, %v2326_v4  ;;  %3411 = vrcp.f32 %v2390_v3 }
0x149c   : > { %3078 = vmatpush.msk.msra.mxu0 %vm2265_vm15, %v2460_v7 }
0x14a0   : > { %v3410_v8 = vpop.eup %3409 }
0x14a1   : > { %v2458_v9 = vmul.f32 %v3410_v8, %v3404_v61  ;;  %v3412_v11 = vpop.eup %3411 }
0x14a2   : > { %v2392_v12 = vmul.f32 %v3412_v11, %v3402_v56  ;;  %v2623_v11 = vld [vmem:[#allocation22 + $0x90] sm:$0xff] }
0x14a3   : > { %3079 = vmatmul.msk.f32.vlgmr.msra.gmra.mxu0 %vm2261_vm1, %v2458_v9  ;;  %2645 = vmatpush.msrb.mxu3 %v2623_v11 }
0x14b1   : > { %v2394_v13 = vpop.permute.xlu1 %2393 }
0x14b2   : > { %3074 = vmatpush.msk.msrb.mxu1 %vm2265_vm15, %v2394_v13  ;;  %v2621_v13 = vld [vmem:[#allocation22 + $0x80] sm:$0xff] }
0x14b3   : > { %3075 = vmatmul.msk.f32.vlgmr.msrb.gmra.mxu1 %vm2261_vm1, %v2392_v12  ;;  %v2622_v12 = vld [vmem:[#allocation22 + $0x88] sm:$0xff] }
0x14b4   : > { %2611 = vmatpush.msra.mxu1 %v2590_v38  ;;  %2646 = vmatpush.msrb.mxu3 %v2622_v12 }
0x14b6   : > { %2612 = vmatpush.msra.mxu1 %v2589_v39  ;;  %2647 = vmatpush.msrb.mxu3 %v2621_v13 }
0x14b8   : > { %2613 = vmatpush.msra.mxu1 %v2588_v40 }
0x150c   : > { %v2285_v16 = vpop.f32.mrf.mxu1 }
0x1518   : > { %v2351_v14 = vpop.f32.mrf.mxu0 }
0x1519   : > { %2487 = vrot.lane.b32.xlu0 %v2351_v14, %s4802_s9  ;;  %v3341_v14 = vld [vmem:[#allocation20 + $0x2] ss:$0 sm:$0xff] }
0x1520   : > { %v2483_v15 = vpop.f32.mrf.mxu0 }
0x1521   : > { %2495 = vrot.lane.b32.xlu1 %v2483_v15, %s4803_s24  ;;  %s4813_s24 = sld [smem:[#allocation56_spill]] }
0x1530   : > { %v2417_v17 = vpop.f32.mrf.mxu1 }
0x1531   : > { %2491 = vrot.lane.b32.xlu2 %v2417_v17, %s4801_s27 }
0x158b   : > { %v2488_v22 = vpop.permute.xlu0 %2487  ;;  %v2492_v24 = vpop.permute.xlu2 %2491 }
0x158c   : > { %v2498_v23 = vsel %vm1052_vm8, %v2285_v16, %v2488_v22  ;;  %v2654_v22 = vld [vmem:[%s4813_s24] sm:$0x3]  ;;  %s3947_s24 = scalar_lea.hbm %s4814_s16, 4 }
0x158d   : > { %v2499_v25 = vsel %vm1322_vm9, %v2498_v23, %v2492_v24  ;;  %v2653_v23 = vld [vmem:[#allocation28] sm:$0x3] }
0x1593   : > { %v2496_v26 = vpop.permute.xlu1 %2495 }
0x1594   : > { %v2500_v27 = vsel %vm1324_vm10, %v2499_v25, %v2496_v26  ;;  %v3342_v25 = vld [vmem:[#allocation23 + $0x2] ss:$0 sm:$0xff] }
0x1595   : > { %3080 = vmatmul.msk.f32.vlgmr.msra.gmra.mxu2 %vm964_vm0, %v2500_v27 }
0x1618   : > { %v2526_v29 = vpop.f32.mrf.mxu2 }
0x1619   : > { %v2529_v30 = vadd.f32 %v2526_v29, %v4596_v46  ;;  %v2587_v46 = vld [vmem:[#allocation19 + $0x40] sm:$0xff] }
0x161a   : > { %2614 = vmatpush.msra.mxu1 %v2587_v46 }
0x161b   : > { %v4661_v31 = vadd.f32 %v3338_v28, %v2529_v30 }
0x161d   : > { %v2540_v32 = vsel %vm2140_vm4, %v4661_v31, 0.0 }
0x161e   : > { %2541 = vadd.xlane.f32.xlu0 %v2540_v32 }
0x1691   : > { %v2542_v33 = vpop.xlane.xlu0 %2541 }
0x1692   : > { %v2543_v34 = vmul.f32 %v2542_v33, %v4438_v10 }
0x1694   : > { %v2544_v35 = vsub.f32 %v4661_v31, %v2543_v34 }
0x1696   : > { %v2545_v36 = vmul.f32 %v2544_v35, %v2544_v35  ;;  %v2565_v4 = vmul.f32 %v3339_v0, %v2544_v35 }
0x1698   : > { %v2546_v37 = vsel %vm2140_vm4, %v2545_v36, 0.0 }
0x1699   : > { %2547 = vadd.xlane.f32.xlu2 %v2546_v37 }
0x170c   : > { %v2548_v41 = vpop.xlane.xlu2 %2547 }
0x170d   : > { %v2549_v42 = vmul.f32 0.032258064, %v2548_v41 }
0x170f   : > { %3413 = vrsqrt.f32 %v2549_v42  ;;  %vm2557_vm8 = vcmp.eq.f32.partialorder %v2549_v42, inf  ;;  %v2560_v53 = vand.u32 2147483648, %v2549_v42  ;;  %vm2559_vm9 = vcmp.eq.f32.partialorder %v2549_v42, 0.0 }
0x1715   : > { %v3414_v44 = vpop.eup %3413 }
0x1716   : > { %v2551_v45 = vmul.f32 %v3414_v44, %v2549_v42 }
0x1718   : > { %v2552_v10 = vmul.f32 %v3414_v44, %v2551_v45 }
0x171a   : > { %v2553_v43 = vmul.f32 0.5, %v2552_v10 }
0x171c   : > { %v2554_v49 = vsub.f32 1.5, %v2553_v43 }
0x171e   : > { %v2555_v51 = vmul.f32 %v3414_v44, %v2554_v49 }
0x1720   : > { %v2556_v59 = vmul.f32 %v2555_v51, %v2549_v42 }
0x1722   : > { %v2558_v55 = vsel %vm2557_vm8, %v2549_v42, %v2556_v59 }
0x1723   : > { %v2561_v56 = vsel %vm2559_vm9, %v2560_v53, %v2558_v55 }
0x1724   : > { %v2566_v58 = vadd.f32 1e-06, %v2561_v56 }
0x1726   : > { %3415 = vrcp.f32 %v2566_v58  ;;  %v2578_v63 = vand.u32 2147483648, %v2566_v58  ;;  %v2576_v1 = vand.u32 2147483647, %v2566_v58  ;;  %vm2572_vm3 = vweird.f32 %v2566_v58 }
0x1728   : > { %v2579_v2 = vor.u32 1.1754944e-38, %v2578_v63  ;;  %vm2577_vm5 = vcmp.eq.f32.partialorder %v2576_v1, 8.507059e+37 }
0x172c   : > { %v3416_v60 = vpop.eup %3415 }
0x172d   : > { %v2568_v61 = vmul.f32 %v3416_v60, %v2566_v58  ;;  %vm2573_vm10 = vweird.f32 %v3416_v60 }
0x172e   : > { %vm2574_vm4 = vmor %vm2572_vm3, %vm2573_vm10 }
0x172f   : > { %v2569_v62 = vsub.f32 1.0, %v2568_v61 }
0x1731   : > { %v2570_v57 = vmul.f32 %v3416_v60, %v2569_v62 }
0x1733   : > { %v2571_v3 = vadd.f32 %v3416_v60, %v2570_v57 }
0x1735   : > { %v2575_v5 = vsel %vm2574_vm4, %v3416_v60, %v2571_v3 }
0x1736   : > { %v2580_v7 = vsel %vm2577_vm5, %v2579_v2, %v2575_v5 }
0x1737   : > { %v2581_v8 = vmul.f32 %v2580_v7, %v2565_v4 }
0x1739   : > { %v2585_v9 = vadd.f32 %v3340_v6, %v2581_v8 }
0x173b   : > { %3081 = vmatmul.msk.f32.vlgmr.msra.gmra.mxu1 %vm964_vm0, %v2585_v9  ;;  %vm2746_vm0 = vcmask 254976  }
0x17b8   : > { %v2616_v15 = vpop.f32.mrf.mxu1 }
0x17b9   : > { %v2617_v16 = vadd.f32 %v3341_v14, %v2616_v15 }
0x17bb   : > { %v2619_v17 = vmax.f32 %v2617_v16, 0.0 }
0x17bd   : > { %3082 = vmatmul.msk.f32.vlgmr.msrb.gmra.mxu3 %vm1447_vm2, %v2619_v17 }
0x1840   : > { %v2649_v18 = vpop.f32.mrf.mxu3 }
0x1841   : > { %2658 = vrot.lane.b32.xlu1 %v2649_v18, %s4050_s26  ;;  %3085 = vmatpush.msk.msrb.mxu2 %vm2265_vm15, %v2649_v18  ;;  %s3025_s26 = sshll.u32 %s4394_s2, 1 }
0x1842   : > { %3086 = vmatmul.msk.f32.vlgmr.msrb.gmra.mxu2 %vm2261_vm1, %v2652_v19  ;;  %s958_s4 = scalar_lea.vmem [#allocation29], %s3025_s26 }
0x1843   : > { %s2761_s22 = sshll.u32 %s958_s4, 4  ;;  %s2762_s22 = int_to_ptr.vmem [resolvable:$true] %s2761_s22 }
0x1849   : > { %2718 = vrot.lane.b32.xlu1 %v2649_v18, %s4055_s1  ;;  %s3090_s1 = sshll.u32 %s4201_s5, 1 }
0x184a   : > { %s2759_s10 = scalar_lea.hbm %s4814_s16, %s3090_s1 }
0x184b   : > { %s2763_s21 = sshll.u32 %s2759_s10, 4  ;;  %s2764_s21 = int_to_ptr.hbm [resolvable:$true] %s2763_s21 }
0x184c   : > { %s3941_s5 = sshra.s32 %s2764_s21, 4  ;;  %s3942_s5 = int_to_ptr.hbm [resolvable:$true] %s3941_s5 }
0x184d   : > { %s3943_s23 = scalar_lea.hbm %s3942_s5, 2  ;;  %p3948_p12 = scmp.lt.s32.totalorder %s3942_s5, %s4814_s16 }
0x184e   : > { %p3944_p1 = scmp.ne.s32.totalorder %s3942_s5, %s3943_s23  ;;  %p3949_p7 = scmp.lt.s32.totalorder %s3947_s24, %s3943_s23 }
0x1850   : > { %p3945_p3 = pnand %p3944_p1, %p4363_p4  ;;  %p3950_p8 = por %p3949_p7, %p3948_p12 }
0x1852   : > { %p3946_p5 = pneg %p3945_p3 }
0x1854   : > { %p3951_p9 = pnand %p3950_p8, %p3946_p5 }
0x18b3   : > { %v2659_v20 = vpop.permute.xlu1 %2658 }
0x18b4   : > { %v2661_v21 = vadd.f32 %v2659_v20, %v4661_v31 }
0x18b6   : > { %3083 = vmatpush.msk.msrb.mxu0 %vm2265_vm15, %v2661_v21 }
0x18b7   : > { %3084 = vmatmul.msk.f32.vlgmr.msrb.gmra.mxu0 %vm2261_vm1, %v2654_v22 }
0x18bb   : > { %v2719_v24 = vpop.permute.xlu1 %2718 }
0x18bc   : > { %3087 = vmatpush.msk.msrb.mxu1 %vm2265_vm15, %v2719_v24 }
0x18bd   : > { %3088 = vmatmul.msk.f32.vlgmr.msrb.gmra.mxu1 %vm2261_vm1, %v2653_v23 }
0x18c5   : > { %v2714_v27 = vpop.f32.mrf.mxu2 }
0x1934   : > { %v2685_v26 = vpop.f32.mrf.mxu0 }
0x1935   : > { %v2691_v28 = vadd.f32 %v3342_v25, %v2685_v26 }
0x1937   : > { %v2717_v29 = vadd.f32 %v2714_v27, %v2691_v28 }
0x193a   : > { %v2742_v30 = vpop.f32.mrf.mxu1 }
0x193b   : > { %v2745_v31 = vadd.f32 %v2742_v30, %v2717_v29 }
0x193d   : > { %2747 = vst.msk [vmem:[%s958_s4] sm:$0x3] %vm2746_vm0, %v2745_v31 }
0x193e   : > { %3954 = shalt.err (!%p3951_p9)
}
0x193f   : > { %3159 = dma.vmem_to_hbm [thread:$0]  (%p4363_p4), %s2762_s22, 32, %s2764_s21, %s2749_s7  }
0x1940 PF: > { %s2775_s2 = sand.u32 1, %s4013_s3   ;;  %p4815_p10 = scmp.ge.s32.totalorder %s4025_s30, 2 }
0x1941   : > { %s2776_s8 = scalar_lea.sflag [#allocation4], %s2775_s2 }
0x1942   : > { %p3215_p13 = pnand %p4815_p10, %p4367_p6 }
0x1944   : > { %p3216_p11 = pneg %p3215_p13 }
0x1946   : > { %4008 = dma.done.wait (%p3216_p11), %s2776_s8, 32  }
0x1947   : > { %4010 = vsyncadd (%p3216_p11), %s2776_s8, 4294967264  ;;  %p43_p0 = scmp.ge.s32.totalorder %s4337_s25, 4   ;;  %s4816_s3 = smov %s4017_s28 }
0x1948   : > { %s4817_s28 = smov %s4021_s29  ;;  %s4818_s29 = smov %s4348_s0 }
0x1949   : > { %s4819_s30 = smov %s4337_s25  ;;  %45 = sbr.rel (!%p43_p0) target bundleno = 31 (0x1f), region = 243 }
0x194e   :  { %2782 = vsyncpa [#allocation3], 1 }
0x194f   :  { %2784 = vsyncpa [#allocation3 + $0x1], 1 }
0x1950   :  { %2785 = vsyncpa [#allocation6], 1 }
0x1951   :  { %2786 = vsyncpa [#allocation9], 1 }
0x1952   :  { %2787 = vsyncpa [#allocation12], 1 }
0x1953   :  { %2788 = vsyncpa [#allocation15], 1 }
0x1954   :  { %2789 = vsyncpa [#allocation18], 1 }
0x1955   :  { %2790 = vsyncpa [#allocation21], 1 }
0x1956   :  { %2791 = vsyncpa [#allocation24], 1 }
0x1957   :  { %2792 = vsyncpa [#allocation27], 1 }
0x1958   :  { %2793 = vsyncpa [#allocation4], 1 }
0x1959   :  { %2795 = vsyncpa [#allocation4 + $0x1], 1 }

</bundles_post_ra>
